<compile_context>
chip_gen: v7x
topology: tpu7x:2x2x1
jax: 0.10.0
libtpu: 0.0.40
codegen_flags: <defaults>
</compile_context>

<pallas_src>
import math

import jax
import jax.numpy as jnp
from jax.experimental import pallas as pl
from jax.experimental.pallas import tpu as pltpu

# ----------------------------- config (small synthetic sizes) -----------------------------
B = 2              # batch
C_IN = 3           # conv input channels
IMG_H = IMG_W = 8  # spatial
K_POS = IMG_H * IMG_W   # 64 image positions
D_IMG = 16         # conv output channels (image feature dim)
HID = 32           # hidden / mfb dim
EMB = 16           # word embedding dim
N_HEADS = 4
D_K = HID // N_HEADS
MAX_ROLES = 6
NUM_VERBS = 10
NUM_ROLES = 12     # role-embedding padding index == NUM_ROLES
NUM_ANS = 20
CLS_HID = 2 * HID
PATCH = 9 * C_IN          # 27
PATCH_PAD = 32            # padded contraction dim for the conv matmul
OUT_PAD = 128             # lane-dense padded answer dim
SLAB_LANES = 128
BR = B * MAX_ROLES
BK = B * K_POS

# ------------------------- packed weight-slab layout (static) -----------------------------
# Matrix slab: bf16, every block's row offset is a multiple of 8, columns start at lane 0.
_MAT_DEFS = (
    ("conv_w",     PATCH_PAD, D_IMG),        # im2col conv weight (rows 27..31 are zero)
    ("qc_w",       2 * EMB,   HID),          # query composer
    ("wq_fused",   HID,       2 * HID),      # [att_wq | qnet_w]
    ("wimg_fused", D_IMG,     HID + D_IMG),  # [att_wv | rsz_wi]
    ("vnet_w",     D_IMG,     HID),
    ("w_qkv",      HID,       3 * HID),      # [W_q | W_k | W_v]  (heads in column blocks)
    ("w_o",        HID,       HID),
    ("rsz_wc",     HID,       D_IMG),
    ("cls_w1",     HID,       CLS_HID),
    ("cls_w2",     CLS_HID,   OUT_PAD),      # answer dim padded to 128 (lane dense)
)
MAT_OFF = {}
_off = 0
for _n, _r, _c in _MAT_DEFS:
    MAT_OFF[_n] = (_off, _r, _c)
    _off += _r
MAT_ROWS = _off                               # 320

# Vector slab: f32, one row per bias / projection row.
_VEC_DEFS = (
    ("conv_b", D_IMG), ("qc_b", HID), ("bq_fused", 2 * HID),
    ("lin_w", HID), ("lin_b", 1), ("vnet_b", HID),
    ("b_qkv", 3 * HID), ("b_o", HID), ("rsz_b", D_IMG),
    ("cls_b1", CLS_HID), ("cls_b2", OUT_PAD),
)
VEC_OFF = {n: (i, c) for i, (n, c) in enumerate(_VEC_DEFS)}
VEC_ROWS = 16  # padded row count of the vector slab


# ----------------------------------- in-kernel helpers ------------------------------------
def _mm(a_bf16, w_bf16):
    """MXU matmul: bf16 inputs (pre-cast), f32 accumulation."""
    return jnp.dot(a_bf16, w_bf16, preferred_element_type=jnp.float32)


def _softmax_col(x):
    """Softmax over axis 0 of an (n, 1) column, EUP reciprocal."""
    m = jnp.max(x, axis=0, keepdims=True)
    e = jnp.exp(x - m)
    return e * pl.reciprocal(jnp.sum(e, axis=0, keepdims=True), approx=True)


def _softmax_row(x):
    """Softmax over the last axis, EUP reciprocal."""
    m = jnp.max(x, axis=-1, keepdims=True)
    e = jnp.exp(x - m)
    return e * pl.reciprocal(jnp.sum(e, axis=-1, keepdims=True), approx=True)


def _signed_sqrt_l2(x):
    """MFB tail: signed sqrt then row-wise L2 normalize (F.normalize, eps=1e-12)."""
    s = jnp.sqrt(jnp.maximum(x, 0.0)) - jnp.sqrt(jnp.maximum(-x, 0.0))
    sq = jnp.sum(s * s, axis=1, keepdims=True)
    return s * jax.lax.rsqrt(jnp.maximum(sq, 1e-24))


# ----------------------------------- fused Pallas kernel ----------------------------------
def _fused_forward_kernel(patch_ref, rv_ref, amask_ref, wm_ref, wv_ref, out_ref,
                          v_scr, iatt_scr, igate_scr, qatt_scr, ctx_scr,
                          ctxp_scr, vemb1_scr, vemb2_scr):
    f32, bf16 = jnp.float32, jnp.bfloat16
    R, K = MAX_ROLES, K_POS

    def W(name):                                   # static slice of the bf16 matrix slab
        r0, nr, nc = MAT_OFF[name]
        return wm_ref[r0:r0 + nr, 0:nc]

    def bvec(name):                                # static slice of the f32 vector slab
        r, nc = VEC_OFF[name]
        return wv_ref[r:r + 1, 0:nc]

    # ---------- phase A: batched projections (batch folded, one wide matmul each) ----------
    v = jnp.maximum(_mm(patch_ref[...], W("conv_w")) + bvec("conv_b"), 0.0)      # (BK,16)
    v_scr[...] = v
    img_fused = _mm(v.astype(bf16), W("wimg_fused"))                             # (BK,48)
    iatt_scr[...] = img_fused[:, 0:HID]                 # image half of v_att FCNet
    igate_scr[...] = img_fused[:, HID:HID + D_IMG]      # image half of resize_ctx

    q_emb = jnp.maximum(_mm(rv_ref[...], W("qc_w")) + bvec("qc_b"), 0.0)         # (BR,32)
    q_fused = _mm(q_emb.astype(bf16), W("wq_fused")) + bvec("bq_fused")          # (BR,64)
    q_att = q_fused[:, 0:HID]                           # query half of v_att FCNet (+bias)
    q_repr = jnp.maximum(q_fused[:, HID:2 * HID], 0.0)  # q_net output
    qatt_scr[...] = q_att

    lin_w = bvec("lin_w")                               # (1, HID) attention logit row
    lin_b = bvec("lin_b")                               # (1, 1)
    att_wv = W("wimg_fused")[:, 0:HID]                  # (D_IMG, HID) bf16, for pass 2

    # ---------- phase B: pass-1 attention, per-role loop (bounded live set) ----------
    for b in range(B):
        row0 = b * K

        @pl.loop(0, R)
        def _pass1(r, b=b, row0=row0):
            i = b * R + r
            img_att_b = iatt_scr[row0:row0 + K, :]                               # (K,HID)
            qa = qatt_scr[pl.ds(i, 1), :]                                        # (1,HID)
            joint = jnp.maximum(img_att_b + qa, 0.0)
            logits = jnp.sum(joint * lin_w, axis=-1, keepdims=True) + lin_b      # (K,1)
            att = _softmax_col(logits)
            vemb1_scr[pl.ds(i, 1), :] = jnp.sum(                                 # f32 pool
                att * v_scr[row0:row0 + K, :], axis=0, keepdims=True)

    v_repr1 = jnp.maximum(
        _mm(vemb1_scr[...].astype(bf16), W("vnet_w")) + bvec("vnet_b"), 0.0)     # (BR,HID)
    out1 = _signed_sqrt_l2(q_repr * v_repr1)                                     # (BR,HID)

    # ---------- phase C: neighbour multi-head attention over roles ----------
    qkv = _mm(out1.astype(bf16), W("w_qkv")) + bvec("b_qkv")                     # (BR,96)
    inv_sqrt_dk = 1.0 / math.sqrt(D_K)
    for b in range(B):
        amask = amask_ref[b]                                                     # (R,R) additive
        qkv_b = qkv[b * R:(b + 1) * R, :]                                        # (R,96)
        heads = []
        for h in range(N_HEADS):
            qh = qkv_b[:, h * D_K:(h + 1) * D_K]                                 # (R,D_K)
            kh = qkv_b[:, HID + h * D_K:HID + (h + 1) * D_K]
            vh = qkv_b[:, 2 * HID + h * D_K:2 * HID + (h + 1) * D_K]
            s = jax.lax.dot_general(qh, kh, (((1,), (1,)), ((), ())),
                                    preferred_element_type=f32) * inv_sqrt_dk + amask
            p = _softmax_row(s)                                                  # (R,R)
            heads.append(jnp.dot(p, vh, preferred_element_type=f32))             # (R,D_K)
        ctx_scr[b * R:(b + 1) * R, :] = jnp.concatenate(heads, axis=1)           # (R,HID)

    withctx = _mm(ctx_scr[...].astype(bf16), W("w_o")) + bvec("b_o")             # (BR,HID)
    ctxp_scr[...] = _mm(withctx.astype(bf16), W("rsz_wc")) + bvec("rsz_b")       # (BR,D_IMG)

    # ---------- phase D: context gating fused into pass-2 attention, per role ----------
    for b in range(B):
        row0 = b * K

        @pl.loop(0, R)
        def _pass2(r, b=b, row0=row0):
            i = b * R + r
            v_b = v_scr[row0:row0 + K, :]                                        # (K,D_IMG)
            gate_i = jax.nn.sigmoid(igate_scr[row0:row0 + K, :] +
                                    ctxp_scr[pl.ds(i, 1), :])
            upd = gate_i * v_b                       # gated image, only this role's slab live
            qa = qatt_scr[pl.ds(i, 1), :]
            joint = jnp.maximum(_mm(upd.astype(bf16), att_wv) + qa, 0.0)         # (K,HID)
            logits = jnp.sum(joint * lin_w, axis=-1, keepdims=True) + lin_b
            att = _softmax_col(logits)
            vemb2_scr[pl.ds(i, 1), :] = jnp.sum(att * upd, axis=0, keepdims=True)

    v_repr2 = jnp.maximum(
        _mm(vemb2_scr[...].astype(bf16), W("vnet_w")) + bvec("vnet_b"), 0.0)
    out2 = _signed_sqrt_l2(q_repr * v_repr2)

    # ---------- gated combination with previous answer + classifier ----------
    gate = jax.nn.sigmoid(v_repr1 * v_repr2)
    out = gate * out1 + (1.0 - gate) * out2
    h1 = jnp.maximum(_mm(out.astype(bf16), W("cls_w1")) + bvec("cls_b1"), 0.0)   # (BR,2H)
    out_ref[...] = _mm(h1.astype(bf16), W("cls_w2")) + bvec("cls_b2")            # (BR,128)


# ------------------------------- parameters / packing -------------------------------------
def init_params(key):
    ks = iter(jax.random.split(key, 32))

    def nrm(shape):
        return 0.1 * jax.random.normal(next(ks), shape, dtype=jnp.float32)

    p = {}
    p["conv_w"] = nrm((PATCH, D_IMG))                 # im2col layout: (kh*kw*Cin, Dimg)
    p["conv_b"] = nrm((D_IMG,))
    p["verb_emb"] = nrm((NUM_VERBS, EMB))
    role_tbl = nrm((NUM_ROLES + 1, EMB))
    p["role_emb"] = role_tbl.at[NUM_ROLES].set(0.0)   # padding_idx row = 0
    p["qc_w"] = nrm((2 * EMB, HID)); p["qc_b"] = nrm((HID,))
    p["att_wv"] = nrm((D_IMG, HID)); p["att_wq"] = nrm((HID, HID)); p["att_b"] = nrm((HID,))
    p["att_lin_w"] = nrm((HID,)); p["att_lin_b"] = nrm((1,))
    p["qnet_w"] = nrm((HID, HID)); p["qnet_b"] = nrm((HID,))
    p["vnet_w"] = nrm((D_IMG, HID)); p["vnet_b"] = nrm((HID,))
    p["mha_wq"] = nrm((HID, HID)); p["mha_bq"] = nrm((HID,))
    p["mha_wk"] = nrm((HID, HID)); p["mha_bk"] = nrm((HID,))
    p["mha_wv"] = nrm((HID, HID)); p["mha_bv"] = nrm((HID,))
    p["mha_wo"] = nrm((HID, HID)); p["mha_bo"] = nrm((HID,))
    p["rsz_wc"] = nrm((HID, D_IMG)); p["rsz_wi"] = nrm((D_IMG, D_IMG)); p["rsz_b"] = nrm((D_IMG,))
    p["cls_w1"] = nrm((HID, CLS_HID)); p["cls_b1"] = nrm((CLS_HID,))
    p["cls_w2"] = nrm((CLS_HID, NUM_ANS)); p["cls_b2"] = nrm((NUM_ANS,))

    # synthetic encoder: role ids + role counts per verb (deterministic)
    role_counts = (jnp.arange(NUM_VERBS) % MAX_ROLES) + 1
    ridx = (jnp.arange(NUM_VERBS)[:, None] * 3
            + jnp.arange(MAX_ROLES)[None, :]) % NUM_ROLES
    valid = jnp.arange(MAX_ROLES)[None, :] < role_counts[:, None]
    p["role_ids_table"] = jnp.where(valid, ridx, NUM_ROLES).astype(jnp.int32)
    p["role_counts"] = role_counts.astype(jnp.int32)
    return p


def pack_params(p):
    """Pre-pack all weights into one bf16 matrix slab + one f32 vector slab (done once)."""
    mat = jnp.zeros((MAT_ROWS, SLAB_LANES), jnp.float32)

    def put(slab, name, w):
        r0, _, _ = MAT_OFF[name]
        w = jnp.asarray(w, jnp.float32)
        return slab.at[r0:r0 + w.shape[0], 0:w.shape[1]].set(w)

    mat = put(mat, "conv_w", p["conv_w"])
    mat = put(mat, "qc_w", p["qc_w"])
    mat = put(mat, "wq_fused", jnp.concatenate([p["att_wq"], p["qnet_w"]], axis=1))
    mat = put(mat, "wimg_fused", jnp.concatenate([p["att_wv"], p["rsz_wi"]], axis=1))
    mat = put(mat, "vnet_w", p["vnet_w"])
    mat = put(mat, "w_qkv", jnp.concatenate([p["mha_wq"], p["mha_wk"], p["mha_wv"]], axis=1))
    mat = put(mat, "w_o", p["mha_wo"])
    mat = put(mat, "rsz_wc", p["rsz_wc"])
    mat = put(mat, "cls_w1", p["cls_w1"])
    mat = put(mat, "cls_w2", p["cls_w2"])

    vec = jnp.zeros((VEC_ROWS, SLAB_LANES), jnp.float32)

    def putv(slab, name, b):
        r, _ = VEC_OFF[name]
        b = jnp.asarray(b, jnp.float32).reshape(-1)
        return slab.at[r, 0:b.shape[0]].set(b)

    vec = putv(vec, "conv_b", p["conv_b"])
    vec = putv(vec, "qc_b", p["qc_b"])
    vec = putv(vec, "bq_fused", jnp.concatenate([p["att_b"], p["qnet_b"]]))
    vec = putv(vec, "lin_w", p["att_lin_w"])
    vec = putv(vec, "lin_b", p["att_lin_b"])
    vec = putv(vec, "vnet_b", p["vnet_b"])
    vec = putv(vec, "b_qkv", jnp.concatenate([p["mha_bq"], p["mha_bk"], p["mha_bv"]]))
    vec = putv(vec, "b_o", p["mha_bo"])
    vec = putv(vec, "rsz_b", p["rsz_b"])
    vec = putv(vec, "cls_b1", p["cls_b1"])
    vec = putv(vec, "cls_b2", p["cls_b2"])

    return {"mat": mat.astype(jnp.bfloat16), "vec": vec,
            "verb_emb": p["verb_emb"], "role_emb": p["role_emb"],
            "role_ids_table": p["role_ids_table"], "role_counts": p["role_counts"]}


# ----------------------------------- forward pass -----------------------------------------
def top_down_forward(packed, v_org, gt_verb):
    Bb, Cin, Hh, Ww = v_org.shape
    R, K = MAX_ROLES, Hh * Ww

    # --- im2col for the 3x3 / stride-1 / pad-1 conv (the matmul itself runs in-kernel) ---
    # TODO(synk): fold the patch extraction into the kernel (shifted VMEM reads) for
    # production image sizes; at 8x8 it is a negligible XLA prologue.
    x = jnp.transpose(v_org, (0, 2, 3, 1))                                       # NCHW->NHWC
    xp = jnp.pad(x, ((0, 0), (1, 1), (1, 1), (0, 0)))
    patches = jnp.stack([xp[:, dh:dh + Hh, dw:dw + Ww, :]
                         for dh in range(3) for dw in range(3)], axis=3)
    patches = patches.reshape(Bb * K, PATCH)
    patches = jnp.pad(patches, ((0, 0), (0, PATCH_PAD - PATCH))).astype(jnp.bfloat16)

    # --- encoder glue: role ids, additive adjacency-noself mask, embedding gathers ---
    role_idx = packed["role_ids_table"][gt_verb]                                 # (B, R)
    rc = packed["role_counts"][gt_verb]
    valid = jnp.arange(R)[None, :] < rc[:, None]
    adj = (valid[:, :, None] & valid[:, None, :]
           & (~jnp.eye(R, dtype=bool))[None])                                    # (B, R, R)
    amask = jnp.where(adj, 0.0, -1e9).astype(jnp.float32)                        # additive

    verb_e = packed["verb_emb"][gt_verb]                                         # (B, E)
    role_e = packed["role_emb"][role_idx]                                        # (B, R, E)
    role_verb = jnp.concatenate(
        [jnp.broadcast_to(verb_e[:, None, :], (Bb, R, EMB)), role_e], axis=-1)
    role_verb = role_verb.reshape(Bb * R, 2 * EMB).astype(jnp.bfloat16)

    def full(shape):
        zeros = (0,) * len(shape)
        return pl.BlockSpec(shape, lambda i, _z=zeros: _z)

    out = pl.pallas_call(
        _fused_forward_kernel,
        grid=(1,),                                   # batch folded: single invocation
        in_specs=[full(patches.shape), full(role_verb.shape), full(amask.shape),
                  full(packed["mat"].shape), full(packed["vec"].shape)],
        out_specs=full((Bb * R, OUT_PAD)),
        out_shape=jax.ShapeDtypeStruct((Bb * R, OUT_PAD), jnp.float32),
        scratch_shapes=[
            pltpu.VMEM((Bb * K, D_IMG), jnp.float32),   # v (image features)
            pltpu.VMEM((Bb * K, HID), jnp.float32),     # img half of v_att FCNet
            pltpu.VMEM((Bb * K, D_IMG), jnp.float32),   # img half of resize_ctx
            pltpu.VMEM((Bb * R, HID), jnp.float32),     # q_att (query half of v_att)
            pltpu.VMEM((Bb * R, HID), jnp.float32),     # MHA context (concat heads)
            pltpu.VMEM((Bb * R, D_IMG), jnp.float32),   # ctx half of resize_ctx
            pltpu.VMEM((Bb * R, D_IMG), jnp.float32),   # v_emb pass 1
            pltpu.VMEM((Bb * R, D_IMG), jnp.float32),   # v_emb pass 2
        ],
    )(patches, role_verb, amask, packed["mat"], packed["vec"])

    return out[:, :NUM_ANS].reshape(Bb, R, NUM_ANS)


# --------------------------------------- main ----------------------------------------------
if __name__ == "__main__":
    key = jax.random.PRNGKey(0)
    pkey, xkey, vkey = jax.random.split(key, 3)
    params = init_params(pkey)
    packed = pack_params(params)                       # weight packing done once, outside jit
    v_org = jax.random.normal(xkey, (B, C_IN, IMG_H, IMG_W), dtype=jnp.float32)
    gt_verb = jax.random.randint(vkey, (B,), 0, NUM_VERBS)

    fwd = jax.jit(top_down_forward)
    role_label_pred = fwd(packed, v_org, gt_verb)
    jax.block_until_ready(role_label_pred)
    assert role_label_pred.shape == (B, MAX_ROLES, NUM_ANS)
    assert bool(jnp.all(jnp.isfinite(role_label_pred)))
    print("KERNEL_OK")
</pallas_src>

<mosaic_0001>
module attributes {stable_mosaic.version = 11 : i64} {
  func.func @_fused_forward_kernel(%arg0: i32, %arg1: memref<128x32xbf16, #tpu.memory_space<vmem>>, %arg2: memref<12x32xbf16, #tpu.memory_space<vmem>>, %arg3: memref<2x6x6xf32, #tpu.memory_space<vmem>>, %arg4: memref<320x128xbf16, #tpu.memory_space<vmem>>, %arg5: memref<16x128xf32, #tpu.memory_space<vmem>>, %arg6: memref<12x128xf32, #tpu.memory_space<vmem>>, %arg7: memref<128x16xf32, #tpu.memory_space<vmem>>, %arg8: memref<128x32xf32, #tpu.memory_space<vmem>>, %arg9: memref<128x16xf32, #tpu.memory_space<vmem>>, %arg10: memref<12x32xf32, #tpu.memory_space<vmem>>, %arg11: memref<12x32xf32, #tpu.memory_space<vmem>>, %arg12: memref<12x16xf32, #tpu.memory_space<vmem>>, %arg13: memref<12x16xf32, #tpu.memory_space<vmem>>, %arg14: memref<12x16xf32, #tpu.memory_space<vmem>>) attributes {dimension_semantics = [#tpu.dimension_semantics<arbitrary>], iteration_bounds = array<i64: 1>, scalar_prefetch = 0 : i64, scratch_operands = 8 : i64, tpu.core_type = #tpu.core_type<tc>, window_params = [{pipeline_mode = #tpu.pipeline_mode<synchronous>, transform_indices = @transform_0, window_bounds = array<i64: 128, 32>}, {pipeline_mode = #tpu.pipeline_mode<synchronous>, transform_indices = @transform_1, window_bounds = array<i64: 12, 32>}, {pipeline_mode = #tpu.pipeline_mode<synchronous>, transform_indices = @transform_2, window_bounds = array<i64: 2, 6, 6>}, {pipeline_mode = #tpu.pipeline_mode<synchronous>, transform_indices = @transform_3, window_bounds = array<i64: 320, 128>}, {pipeline_mode = #tpu.pipeline_mode<synchronous>, transform_indices = @transform_4, window_bounds = array<i64: 16, 128>}, {pipeline_mode = #tpu.pipeline_mode<synchronous>, transform_indices = @transform_5, window_bounds = array<i64: 12, 128>}]} {
    %c0 = arith.constant 0 : index
    %c0_0 = arith.constant 0 : index
    %0 = vector.load %arg1[%c0, %c0_0] : memref<128x32xbf16, #tpu.memory_space<vmem>>, vector<128x32xbf16>
    %c0_1 = arith.constant 0 : index
    %c0_2 = arith.constant 0 : index
    %1 = vector.load %arg4[%c0_1, %c0_2] : memref<320x128xbf16, #tpu.memory_space<vmem>>, vector<32x16xbf16>
    %cst = arith.constant dense<0.000000e+00> : vector<128x16xf32>
    %2 = tpu.matmul %0, %1, %cst {dimension_numbers = #tpu.dot_dimension_numbers<[1], [0], [0], [1], [0, 0, 1, 1], [], []>} : vector<128x32xbf16>, vector<32x16xbf16>, vector<128x16xf32> -> vector<128x16xf32>
    %c0_3 = arith.constant 0 : index
    %c0_4 = arith.constant 0 : index
    %3 = vector.load %arg5[%c0_3, %c0_4] : memref<16x128xf32, #tpu.memory_space<vmem>>, vector<1x16xf32>
    %4 = vector.broadcast %3 : vector<1x16xf32> to vector<128x16xf32>
    %5 = arith.addf %2, %4 : vector<128x16xf32>
    %cst_5 = arith.constant 0.000000e+00 : f32
    %6 = vector.broadcast %cst_5 : f32 to vector<128x16xf32>
    %7 = arith.maximumf %5, %6 : vector<128x16xf32>
    %c0_6 = arith.constant 0 : index
    %c0_7 = arith.constant 0 : index
    %8 = vector.load %arg7[%c0_6, %c0_7] : memref<128x16xf32, #tpu.memory_space<vmem>>, vector<128x16xf32>
    tpu.vector_store %arg7[%c0_6, %c0_7], %7 {strides = array<i32>} : memref<128x16xf32, #tpu.memory_space<vmem>>, vector<128x16xf32>,
    %9 = arith.truncf %7 : vector<128x16xf32> to vector<128x16xbf16>
    %c96 = arith.constant 96 : index
    %c0_8 = arith.constant 0 : index
    %10 = vector.load %arg4[%c96, %c0_8] : memref<320x128xbf16, #tpu.memory_space<vmem>>, vector<16x48xbf16>
    %cst_9 = arith.constant dense<0.000000e+00> : vector<128x48xf32>
    %11 = tpu.matmul %9, %10, %cst_9 {dimension_numbers = #tpu.dot_dimension_numbers<[1], [0], [0], [1], [0, 0, 1, 1], [], []>} : vector<128x16xbf16>, vector<16x48xbf16>, vector<128x48xf32> -> vector<128x48xf32>
    %12 = vector.extract_strided_slice %11 {offsets = [0, 0], sizes = [128, 32], strides = [1, 1]} : vector<128x48xf32> to vector<128x32xf32>
    %c0_10 = arith.constant 0 : index
    %c0_11 = arith.constant 0 : index
    %13 = vector.load %arg8[%c0_10, %c0_11] : memref<128x32xf32, #tpu.memory_space<vmem>>, vector<128x32xf32>
    tpu.vector_store %arg8[%c0_10, %c0_11], %12 {strides = array<i32>} : memref<128x32xf32, #tpu.memory_space<vmem>>, vector<128x32xf32>,
    %14 = vector.extract_strided_slice %11 {offsets = [0, 32], sizes = [128, 16], strides = [1, 1]} : vector<128x48xf32> to vector<128x16xf32>
    %c0_12 = arith.constant 0 : index
    %c0_13 = arith.constant 0 : index
    %15 = vector.load %arg9[%c0_12, %c0_13] : memref<128x16xf32, #tpu.memory_space<vmem>>, vector<128x16xf32>
    tpu.vector_store %arg9[%c0_12, %c0_13], %14 {strides = array<i32>} : memref<128x16xf32, #tpu.memory_space<vmem>>, vector<128x16xf32>,
    %c0_14 = arith.constant 0 : index
    %c0_15 = arith.constant 0 : index
    %16 = vector.load %arg2[%c0_14, %c0_15] : memref<12x32xbf16, #tpu.memory_space<vmem>>, vector<12x32xbf16>
    %c32 = arith.constant 32 : index
    %c0_16 = arith.constant 0 : index
    %17 = vector.load %arg4[%c32, %c0_16] : memref<320x128xbf16, #tpu.memory_space<vmem>>, vector<32x32xbf16>
    %cst_17 = arith.constant dense<0.000000e+00> : vector<12x32xf32>
    %18 = tpu.matmul %16, %17, %cst_17 {dimension_numbers = #tpu.dot_dimension_numbers<[1], [0], [0], [1], [0, 0, 1, 1], [], []>} : vector<12x32xbf16>, vector<32x32xbf16>, vector<12x32xf32> -> vector<12x32xf32>
    %c1 = arith.constant 1 : index
    %c0_18 = arith.constant 0 : index
    %19 = vector.load %arg5[%c1, %c0_18] : memref<16x128xf32, #tpu.memory_space<vmem>>, vector<1x32xf32>
    %20 = vector.broadcast %19 : vector<1x32xf32> to vector<12x32xf32>
    %21 = arith.addf %18, %20 : vector<12x32xf32>
    %cst_19 = arith.constant 0.000000e+00 : f32
    %22 = vector.broadcast %cst_19 : f32 to vector<12x32xf32>
    %23 = arith.maximumf %21, %22 : vector<12x32xf32>
    %24 = arith.truncf %23 : vector<12x32xf32> to vector<12x32xbf16>
    %c64 = arith.constant 64 : index
    %c0_20 = arith.constant 0 : index
    %25 = vector.load %arg4[%c64, %c0_20] : memref<320x128xbf16, #tpu.memory_space<vmem>>, vector<32x64xbf16>
    %cst_21 = arith.constant dense<0.000000e+00> : vector<12x64xf32>
    %26 = tpu.matmul %24, %25, %cst_21 {dimension_numbers = #tpu.dot_dimension_numbers<[1], [0], [0], [1], [0, 0, 1, 1], [], []>} : vector<12x32xbf16>, vector<32x64xbf16>, vector<12x64xf32> -> vector<12x64xf32>
    %c2 = arith.constant 2 : index
    %c0_22 = arith.constant 0 : index
    %27 = vector.load %arg5[%c2, %c0_22] : memref<16x128xf32, #tpu.memory_space<vmem>>, vector<1x64xf32>
    %28 = vector.broadcast %27 : vector<1x64xf32> to vector<12x64xf32>
    %29 = arith.addf %26, %28 : vector<12x64xf32>
    %30 = vector.extract_strided_slice %29 {offsets = [0, 0], sizes = [12, 32], strides = [1, 1]} : vector<12x64xf32> to vector<12x32xf32>
    %31 = vector.extract_strided_slice %29 {offsets = [0, 32], sizes = [12, 32], strides = [1, 1]} : vector<12x64xf32> to vector<12x32xf32>
    %cst_23 = arith.constant 0.000000e+00 : f32
    %32 = vector.broadcast %cst_23 : f32 to vector<12x32xf32>
    %33 = arith.maximumf %31, %32 : vector<12x32xf32>
    %c0_24 = arith.constant 0 : index
    %c0_25 = arith.constant 0 : index
    %34 = vector.load %arg10[%c0_24, %c0_25] : memref<12x32xf32, #tpu.memory_space<vmem>>, vector<12x32xf32>
    tpu.vector_store %arg10[%c0_24, %c0_25], %30 {strides = array<i32>} : memref<12x32xf32, #tpu.memory_space<vmem>>, vector<12x32xf32>,
    %c3 = arith.constant 3 : index
    %c0_26 = arith.constant 0 : index
    %35 = vector.load %arg5[%c3, %c0_26] : memref<16x128xf32, #tpu.memory_space<vmem>>, vector<1x32xf32>
    %c4 = arith.constant 4 : index
    %c0_27 = arith.constant 0 : index
    %36 = vector.load %arg5[%c4, %c0_27] : memref<16x128xf32, #tpu.memory_space<vmem>>, vector<1x1xf32>
    %c96_28 = arith.constant 96 : index
    %c0_29 = arith.constant 0 : index
    %37 = vector.load %arg4[%c96_28, %c0_29] : memref<320x128xbf16, #tpu.memory_space<vmem>>, vector<16x48xbf16>
    %38 = vector.extract_strided_slice %37 {offsets = [0, 0], sizes = [16, 32], strides = [1, 1]} : vector<16x48xbf16> to vector<16x32xbf16>
    %c0_i32 = arith.constant 0 : i32
    %c6_i32 = arith.constant 6 : i32
    %39 = arith.addi %c0_i32, %c6_i32 : i32
    %c1_i32 = arith.constant 1 : i32
    scf.for %arg15 = %c0_i32 to %39 step %c1_i32  : i32 {
      %c1_i32_141 = arith.constant 1 : i32
      %297 = arith.muli %arg15, %c1_i32_141 : i32
      %c0_i32_142 = arith.constant 0 : i32
      %298 = arith.addi %c0_i32_142, %297 : i32
      %c0_i32_143 = arith.constant 0 : i32
      %299 = arith.addi %c0_i32_143, %298 : i32
      %c0_144 = arith.constant 0 : index
      %c0_145 = arith.constant 0 : index
      %300 = vector.load %arg8[%c0_144, %c0_145] : memref<128x32xf32, #tpu.memory_space<vmem>>, vector<64x32xf32>
      %301 = arith.index_cast %299 : i32 to index
      %c0_146 = arith.constant 0 : index
      %302 = vector.load %arg10[%301, %c0_146] : memref<12x32xf32, #tpu.memory_space<vmem>>, vector<1x32xf32>
      %303 = vector.broadcast %302 : vector<1x32xf32> to vector<64x32xf32>
      %304 = arith.addf %300, %303 : vector<64x32xf32>
      %cst_147 = arith.constant 0.000000e+00 : f32
      %305 = vector.broadcast %cst_147 : f32 to vector<64x32xf32>
      %306 = arith.maximumf %304, %305 : vector<64x32xf32>
      %307 = vector.broadcast %35 : vector<1x32xf32> to vector<64x32xf32>
      %308 = arith.mulf %306, %307 : vector<64x32xf32>
      %cst_148 = arith.constant dense<0.000000e+00> : vector<64xf32>
      %309 = vector.multi_reduction <add>, %308, %cst_148 [1] : vector<64x32xf32> to vector<64xf32>
      %310 = vector.shape_cast %309 : vector<64xf32> to vector<64x1xf32>
      %311 = vector.broadcast %36 : vector<1x1xf32> to vector<64x1xf32>
      %312 = arith.addf %310, %311 : vector<64x1xf32>
      %cst_149 = arith.constant dense<0xFF800000> : vector<1xf32>
      %313 = vector.multi_reduction <maximumf>, %312, %cst_149 [0] : vector<64x1xf32> to vector<1xf32>
      %314 = vector.shape_cast %313 : vector<1xf32> to vector<1x1xf32>
      %315 = vector.broadcast %314 : vector<1x1xf32> to vector<64x1xf32>
      %316 = arith.subf %312, %315 : vector<64x1xf32>
      %317 = math.exp %316 : vector<64x1xf32>
      %cst_150 = arith.constant dense<0.000000e+00> : vector<1xf32>
      %318 = vector.multi_reduction <add>, %317, %cst_150 [0] : vector<64x1xf32> to vector<1xf32>
      %319 = vector.shape_cast %318 : vector<1xf32> to vector<1x1xf32>
      %320 = tpu.reciprocal %319 {approx = true} : vector<1x1xf32> -> vector<1x1xf32>
      %321 = vector.broadcast %320 : vector<1x1xf32> to vector<64x1xf32>
      %322 = arith.mulf %317, %321 : vector<64x1xf32>
      %c0_151 = arith.constant 0 : index
      %c0_152 = arith.constant 0 : index
      %323 = vector.load %arg7[%c0_151, %c0_152] : memref<128x16xf32, #tpu.memory_space<vmem>>, vector<64x16xf32>
      %324 = vector.broadcast %322 : vector<64x1xf32> to vector<64x16xf32>
      %325 = arith.mulf %324, %323 : vector<64x16xf32>
      %cst_153 = arith.constant dense<0.000000e+00> : vector<16xf32>
      %326 = vector.multi_reduction <add>, %325, %cst_153 [0] : vector<64x16xf32> to vector<16xf32>
      %327 = vector.shape_cast %326 : vector<16xf32> to vector<1x16xf32>
      %328 = arith.index_cast %299 : i32 to index
      %c0_154 = arith.constant 0 : index
      %329 = vector.load %arg13[%328, %c0_154] : memref<12x16xf32, #tpu.memory_space<vmem>>, vector<1x16xf32>
      tpu.vector_store %arg13[%328, %c0_154], %327 {strides = array<i32>} : memref<12x16xf32, #tpu.memory_space<vmem>>, vector<1x16xf32>,
    }
    %c6_i32_30 = arith.constant 6 : i32
    %c0_i32_31 = arith.constant 0 : i32
    %c6_i32_32 = arith.constant 6 : i32
    %40 = arith.addi %c0_i32_31, %c6_i32_32 : i32
    %c1_i32_33 = arith.constant 1 : i32
    scf.for %arg15 = %c0_i32_31 to %40 step %c1_i32_33  : i32 {
      %c1_i32_141 = arith.constant 1 : i32
      %297 = arith.muli %arg15, %c1_i32_141 : i32
      %c0_i32_142 = arith.constant 0 : i32
      %298 = arith.addi %c0_i32_142, %297 : i32
      %c6_i32_143 = arith.constant 6 : i32
      %299 = arith.addi %c6_i32_143, %298 : i32
      %c64_144 = arith.constant 64 : index
      %c0_145 = arith.constant 0 : index
      %300 = vector.load %arg8[%c64_144, %c0_145] : memref<128x32xf32, #tpu.memory_space<vmem>>, vector<64x32xf32>
      %301 = arith.index_cast %299 : i32 to index
      %c0_146 = arith.constant 0 : index
      %302 = vector.load %arg10[%301, %c0_146] : memref<12x32xf32, #tpu.memory_space<vmem>>, vector<1x32xf32>
      %303 = vector.broadcast %302 : vector<1x32xf32> to vector<64x32xf32>
      %304 = arith.addf %300, %303 : vector<64x32xf32>
      %cst_147 = arith.constant 0.000000e+00 : f32
      %305 = vector.broadcast %cst_147 : f32 to vector<64x32xf32>
      %306 = arith.maximumf %304, %305 : vector<64x32xf32>
      %307 = vector.broadcast %35 : vector<1x32xf32> to vector<64x32xf32>
      %308 = arith.mulf %306, %307 : vector<64x32xf32>
      %cst_148 = arith.constant dense<0.000000e+00> : vector<64xf32>
      %309 = vector.multi_reduction <add>, %308, %cst_148 [1] : vector<64x32xf32> to vector<64xf32>
      %310 = vector.shape_cast %309 : vector<64xf32> to vector<64x1xf32>
      %311 = vector.broadcast %36 : vector<1x1xf32> to vector<64x1xf32>
      %312 = arith.addf %310, %311 : vector<64x1xf32>
      %cst_149 = arith.constant dense<0xFF800000> : vector<1xf32>
      %313 = vector.multi_reduction <maximumf>, %312, %cst_149 [0] : vector<64x1xf32> to vector<1xf32>
      %314 = vector.shape_cast %313 : vector<1xf32> to vector<1x1xf32>
      %315 = vector.broadcast %314 : vector<1x1xf32> to vector<64x1xf32>
      %316 = arith.subf %312, %315 : vector<64x1xf32>
      %317 = math.exp %316 : vector<64x1xf32>
      %cst_150 = arith.constant dense<0.000000e+00> : vector<1xf32>
      %318 = vector.multi_reduction <add>, %317, %cst_150 [0] : vector<64x1xf32> to vector<1xf32>
      %319 = vector.shape_cast %318 : vector<1xf32> to vector<1x1xf32>
      %320 = tpu.reciprocal %319 {approx = true} : vector<1x1xf32> -> vector<1x1xf32>
      %321 = vector.broadcast %320 : vector<1x1xf32> to vector<64x1xf32>
      %322 = arith.mulf %317, %321 : vector<64x1xf32>
      %c64_151 = arith.constant 64 : index
      %c0_152 = arith.constant 0 : index
      %323 = vector.load %arg7[%c64_151, %c0_152] : memref<128x16xf32, #tpu.memory_space<vmem>>, vector<64x16xf32>
      %324 = vector.broadcast %322 : vector<64x1xf32> to vector<64x16xf32>
      %325 = arith.mulf %324, %323 : vector<64x16xf32>
      %cst_153 = arith.constant dense<0.000000e+00> : vector<16xf32>
      %326 = vector.multi_reduction <add>, %325, %cst_153 [0] : vector<64x16xf32> to vector<16xf32>
      %327 = vector.shape_cast %326 : vector<16xf32> to vector<1x16xf32>
      %328 = arith.index_cast %299 : i32 to index
      %c0_154 = arith.constant 0 : index
      %329 = vector.load %arg13[%328, %c0_154] : memref<12x16xf32, #tpu.memory_space<vmem>>, vector<1x16xf32>
      tpu.vector_store %arg13[%328, %c0_154], %327 {strides = array<i32>} : memref<12x16xf32, #tpu.memory_space<vmem>>, vector<1x16xf32>,
    }
    %c6_i32_34 = arith.constant 6 : i32
    %c0_35 = arith.constant 0 : index
    %c0_36 = arith.constant 0 : index
    %41 = vector.load %arg13[%c0_35, %c0_36] : memref<12x16xf32, #tpu.memory_space<vmem>>, vector<12x16xf32>
    %42 = arith.truncf %41 : vector<12x16xf32> to vector<12x16xbf16>
    %c112 = arith.constant 112 : index
    %c0_37 = arith.constant 0 : index
    %43 = vector.load %arg4[%c112, %c0_37] : memref<320x128xbf16, #tpu.memory_space<vmem>>, vector<16x32xbf16>
    %cst_38 = arith.constant dense<0.000000e+00> : vector<12x32xf32>
    %44 = tpu.matmul %42, %43, %cst_38 {dimension_numbers = #tpu.dot_dimension_numbers<[1], [0], [0], [1], [0, 0, 1, 1], [], []>} : vector<12x16xbf16>, vector<16x32xbf16>, vector<12x32xf32> -> vector<12x32xf32>
    %c5 = arith.constant 5 : index
    %c0_39 = arith.constant 0 : index
    %45 = vector.load %arg5[%c5, %c0_39] : memref<16x128xf32, #tpu.memory_space<vmem>>, vector<1x32xf32>
    %46 = vector.broadcast %45 : vector<1x32xf32> to vector<12x32xf32>
    %47 = arith.addf %44, %46 : vector<12x32xf32>
    %cst_40 = arith.constant 0.000000e+00 : f32
    %48 = vector.broadcast %cst_40 : f32 to vector<12x32xf32>
    %49 = arith.maximumf %47, %48 : vector<12x32xf32>
    %50 = arith.mulf %33, %49 : vector<12x32xf32>
    %cst_41 = arith.constant 0.000000e+00 : f32
    %51 = vector.broadcast %cst_41 : f32 to vector<12x32xf32>
    %52 = arith.maximumf %50, %51 : vector<12x32xf32>
    %53 = math.sqrt %52 : vector<12x32xf32>
    %cst_42 = arith.constant 0.000000e+00 : f32
    %54 = vector.broadcast %cst_42 : f32 to vector<12x32xf32>
    %55 = arith.subf %54, %50 : vector<12x32xf32>
    %cst_43 = arith.constant 0.000000e+00 : f32
    %56 = vector.broadcast %cst_43 : f32 to vector<12x32xf32>
    %57 = arith.maximumf %55, %56 : vector<12x32xf32>
    %58 = math.sqrt %57 : vector<12x32xf32>
    %59 = arith.subf %53, %58 : vector<12x32xf32>
    %60 = arith.mulf %59, %59 : vector<12x32xf32>
    %cst_44 = arith.constant dense<0.000000e+00> : vector<12xf32>
    %61 = vector.multi_reduction <add>, %60, %cst_44 [1] : vector<12x32xf32> to vector<12xf32>
    %62 = vector.shape_cast %61 : vector<12xf32> to vector<12x1xf32>
    %cst_45 = arith.constant 1.000000e-24 : f32
    %63 = vector.broadcast %cst_45 : f32 to vector<12x1xf32>
    %64 = arith.maximumf %62, %63 : vector<12x1xf32>
    %65 = math.rsqrt %64 : vector<12x1xf32>
    %66 = vector.broadcast %65 : vector<12x1xf32> to vector<12x32xf32>
    %67 = arith.mulf %59, %66 : vector<12x32xf32>
    %68 = arith.truncf %67 : vector<12x32xf32> to vector<12x32xbf16>
    %c128 = arith.constant 128 : index
    %c0_46 = arith.constant 0 : index
    %69 = vector.load %arg4[%c128, %c0_46] : memref<320x128xbf16, #tpu.memory_space<vmem>>, vector<32x96xbf16>
    %cst_47 = arith.constant dense<0.000000e+00> : vector<12x96xf32>
    %70 = tpu.matmul %68, %69, %cst_47 {dimension_numbers = #tpu.dot_dimension_numbers<[1], [0], [0], [1], [0, 0, 1, 1], [], []>} : vector<12x32xbf16>, vector<32x96xbf16>, vector<12x96xf32> -> vector<12x96xf32>
    %c6 = arith.constant 6 : index
    %c0_48 = arith.constant 0 : index
    %71 = vector.load %arg5[%c6, %c0_48] : memref<16x128xf32, #tpu.memory_space<vmem>>, vector<1x96xf32>
    %72 = vector.broadcast %71 : vector<1x96xf32> to vector<12x96xf32>
    %73 = arith.addf %70, %72 : vector<12x96xf32>
    %c0_49 = arith.constant 0 : index
    %c0_50 = arith.constant 0 : index
    %c0_51 = arith.constant 0 : index
    %74 = vector.load %arg3[%c0_49, %c0_50, %c0_51] : memref<2x6x6xf32, #tpu.memory_space<vmem>>, vector<1x6x6xf32>
    %75 = vector.shape_cast %74 : vector<1x6x6xf32> to vector<6x6xf32>
    %76 = vector.extract_strided_slice %73 {offsets = [0, 0], sizes = [6, 96], strides = [1, 1]} : vector<12x96xf32> to vector<6x96xf32>
    %77 = vector.extract_strided_slice %76 {offsets = [0, 0], sizes = [6, 8], strides = [1, 1]} : vector<6x96xf32> to vector<6x8xf32>
    %78 = vector.extract_strided_slice %76 {offsets = [0, 32], sizes = [6, 8], strides = [1, 1]} : vector<6x96xf32> to vector<6x8xf32>
    %79 = vector.extract_strided_slice %76 {offsets = [0, 64], sizes = [6, 8], strides = [1, 1]} : vector<6x96xf32> to vector<6x8xf32>
    %cst_52 = arith.constant dense<0.000000e+00> : vector<6x6xf32>
    %80 = tpu.matmul %77, %78, %cst_52 {dimension_numbers = #tpu.dot_dimension_numbers<[1], [1], [0], [0], [0, 0, 1, 0], [], []>} : vector<6x8xf32>, vector<6x8xf32>, vector<6x6xf32> -> vector<6x6xf32>
    %cst_53 = arith.constant 0.353553385 : f32
    %81 = vector.broadcast %cst_53 : f32 to vector<6x6xf32>
    %82 = arith.mulf %80, %81 : vector<6x6xf32>
    %83 = arith.addf %82, %75 : vector<6x6xf32>
    %cst_54 = arith.constant dense<0xFF800000> : vector<6xf32>
    %84 = vector.multi_reduction <maximumf>, %83, %cst_54 [1] : vector<6x6xf32> to vector<6xf32>
    %85 = vector.shape_cast %84 : vector<6xf32> to vector<6x1xf32>
    %86 = vector.broadcast %85 : vector<6x1xf32> to vector<6x6xf32>
    %87 = arith.subf %83, %86 : vector<6x6xf32>
    %88 = math.exp %87 : vector<6x6xf32>
    %cst_55 = arith.constant dense<0.000000e+00> : vector<6xf32>
    %89 = vector.multi_reduction <add>, %88, %cst_55 [1] : vector<6x6xf32> to vector<6xf32>
    %90 = vector.shape_cast %89 : vector<6xf32> to vector<6x1xf32>
    %91 = tpu.reciprocal %90 {approx = true} : vector<6x1xf32> -> vector<6x1xf32>
    %92 = vector.broadcast %91 : vector<6x1xf32> to vector<6x6xf32>
    %93 = arith.mulf %88, %92 : vector<6x6xf32>
    %cst_56 = arith.constant dense<0.000000e+00> : vector<6x8xf32>
    %94 = tpu.matmul %93, %79, %cst_56 {dimension_numbers = #tpu.dot_dimension_numbers<[1], [0], [0], [1], [0, 0, 1, 1], [], []>} : vector<6x6xf32>, vector<6x8xf32>, vector<6x8xf32> -> vector<6x8xf32>
    %95 = vector.extract_strided_slice %76 {offsets = [0, 8], sizes = [6, 8], strides = [1, 1]} : vector<6x96xf32> to vector<6x8xf32>
    %96 = vector.extract_strided_slice %76 {offsets = [0, 40], sizes = [6, 8], strides = [1, 1]} : vector<6x96xf32> to vector<6x8xf32>
    %97 = vector.extract_strided_slice %76 {offsets = [0, 72], sizes = [6, 8], strides = [1, 1]} : vector<6x96xf32> to vector<6x8xf32>
    %cst_57 = arith.constant dense<0.000000e+00> : vector<6x6xf32>
    %98 = tpu.matmul %95, %96, %cst_57 {dimension_numbers = #tpu.dot_dimension_numbers<[1], [1], [0], [0], [0, 0, 1, 0], [], []>} : vector<6x8xf32>, vector<6x8xf32>, vector<6x6xf32> -> vector<6x6xf32>
    %cst_58 = arith.constant 0.353553385 : f32
    %99 = vector.broadcast %cst_58 : f32 to vector<6x6xf32>
    %100 = arith.mulf %98, %99 : vector<6x6xf32>
    %101 = arith.addf %100, %75 : vector<6x6xf32>
    %cst_59 = arith.constant dense<0xFF800000> : vector<6xf32>
    %102 = vector.multi_reduction <maximumf>, %101, %cst_59 [1] : vector<6x6xf32> to vector<6xf32>
    %103 = vector.shape_cast %102 : vector<6xf32> to vector<6x1xf32>
    %104 = vector.broadcast %103 : vector<6x1xf32> to vector<6x6xf32>
    %105 = arith.subf %101, %104 : vector<6x6xf32>
    %106 = math.exp %105 : vector<6x6xf32>
    %cst_60 = arith.constant dense<0.000000e+00> : vector<6xf32>
    %107 = vector.multi_reduction <add>, %106, %cst_60 [1] : vector<6x6xf32> to vector<6xf32>
    %108 = vector.shape_cast %107 : vector<6xf32> to vector<6x1xf32>
    %109 = tpu.reciprocal %108 {approx = true} : vector<6x1xf32> -> vector<6x1xf32>
    %110 = vector.broadcast %109 : vector<6x1xf32> to vector<6x6xf32>
    %111 = arith.mulf %106, %110 : vector<6x6xf32>
    %cst_61 = arith.constant dense<0.000000e+00> : vector<6x8xf32>
    %112 = tpu.matmul %111, %97, %cst_61 {dimension_numbers = #tpu.dot_dimension_numbers<[1], [0], [0], [1], [0, 0, 1, 1], [], []>} : vector<6x6xf32>, vector<6x8xf32>, vector<6x8xf32> -> vector<6x8xf32>
    %113 = vector.extract_strided_slice %76 {offsets = [0, 16], sizes = [6, 8], strides = [1, 1]} : vector<6x96xf32> to vector<6x8xf32>
    %114 = vector.extract_strided_slice %76 {offsets = [0, 48], sizes = [6, 8], strides = [1, 1]} : vector<6x96xf32> to vector<6x8xf32>
    %115 = vector.extract_strided_slice %76 {offsets = [0, 80], sizes = [6, 8], strides = [1, 1]} : vector<6x96xf32> to vector<6x8xf32>
    %cst_62 = arith.constant dense<0.000000e+00> : vector<6x6xf32>
    %116 = tpu.matmul %113, %114, %cst_62 {dimension_numbers = #tpu.dot_dimension_numbers<[1], [1], [0], [0], [0, 0, 1, 0], [], []>} : vector<6x8xf32>, vector<6x8xf32>, vector<6x6xf32> -> vector<6x6xf32>
    %cst_63 = arith.constant 0.353553385 : f32
    %117 = vector.broadcast %cst_63 : f32 to vector<6x6xf32>
    %118 = arith.mulf %116, %117 : vector<6x6xf32>
    %119 = arith.addf %118, %75 : vector<6x6xf32>
    %cst_64 = arith.constant dense<0xFF800000> : vector<6xf32>
    %120 = vector.multi_reduction <maximumf>, %119, %cst_64 [1] : vector<6x6xf32> to vector<6xf32>
    %121 = vector.shape_cast %120 : vector<6xf32> to vector<6x1xf32>
    %122 = vector.broadcast %121 : vector<6x1xf32> to vector<6x6xf32>
    %123 = arith.subf %119, %122 : vector<6x6xf32>
    %124 = math.exp %123 : vector<6x6xf32>
    %cst_65 = arith.constant dense<0.000000e+00> : vector<6xf32>
    %125 = vector.multi_reduction <add>, %124, %cst_65 [1] : vector<6x6xf32> to vector<6xf32>
    %126 = vector.shape_cast %125 : vector<6xf32> to vector<6x1xf32>
    %127 = tpu.reciprocal %126 {approx = true} : vector<6x1xf32> -> vector<6x1xf32>
    %128 = vector.broadcast %127 : vector<6x1xf32> to vector<6x6xf32>
    %129 = arith.mulf %124, %128 : vector<6x6xf32>
    %cst_66 = arith.constant dense<0.000000e+00> : vector<6x8xf32>
    %130 = tpu.matmul %129, %115, %cst_66 {dimension_numbers = #tpu.dot_dimension_numbers<[1], [0], [0], [1], [0, 0, 1, 1], [], []>} : vector<6x6xf32>, vector<6x8xf32>, vector<6x8xf32> -> vector<6x8xf32>
    %131 = vector.extract_strided_slice %76 {offsets = [0, 24], sizes = [6, 8], strides = [1, 1]} : vector<6x96xf32> to vector<6x8xf32>
    %132 = vector.extract_strided_slice %76 {offsets = [0, 56], sizes = [6, 8], strides = [1, 1]} : vector<6x96xf32> to vector<6x8xf32>
    %133 = vector.extract_strided_slice %76 {offsets = [0, 88], sizes = [6, 8], strides = [1, 1]} : vector<6x96xf32> to vector<6x8xf32>
    %cst_67 = arith.constant dense<0.000000e+00> : vector<6x6xf32>
    %134 = tpu.matmul %131, %132, %cst_67 {dimension_numbers = #tpu.dot_dimension_numbers<[1], [1], [0], [0], [0, 0, 1, 0], [], []>} : vector<6x8xf32>, vector<6x8xf32>, vector<6x6xf32> -> vector<6x6xf32>
    %cst_68 = arith.constant 0.353553385 : f32
    %135 = vector.broadcast %cst_68 : f32 to vector<6x6xf32>
    %136 = arith.mulf %134, %135 : vector<6x6xf32>
    %137 = arith.addf %136, %75 : vector<6x6xf32>
    %cst_69 = arith.constant dense<0xFF800000> : vector<6xf32>
    %138 = vector.multi_reduction <maximumf>, %137, %cst_69 [1] : vector<6x6xf32> to vector<6xf32>
    %139 = vector.shape_cast %138 : vector<6xf32> to vector<6x1xf32>
    %140 = vector.broadcast %139 : vector<6x1xf32> to vector<6x6xf32>
    %141 = arith.subf %137, %140 : vector<6x6xf32>
    %142 = math.exp %141 : vector<6x6xf32>
    %cst_70 = arith.constant dense<0.000000e+00> : vector<6xf32>
    %143 = vector.multi_reduction <add>, %142, %cst_70 [1] : vector<6x6xf32> to vector<6xf32>
    %144 = vector.shape_cast %143 : vector<6xf32> to vector<6x1xf32>
    %145 = tpu.reciprocal %144 {approx = true} : vector<6x1xf32> -> vector<6x1xf32>
    %146 = vector.broadcast %145 : vector<6x1xf32> to vector<6x6xf32>
    %147 = arith.mulf %142, %146 : vector<6x6xf32>
    %cst_71 = arith.constant dense<0.000000e+00> : vector<6x8xf32>
    %148 = tpu.matmul %147, %133, %cst_71 {dimension_numbers = #tpu.dot_dimension_numbers<[1], [0], [0], [1], [0, 0, 1, 1], [], []>} : vector<6x6xf32>, vector<6x8xf32>, vector<6x8xf32> -> vector<6x8xf32>
    %149 = tpu.concatenate %94, %112, %130, %148 in 1 : vector<6x8xf32>, vector<6x8xf32>, vector<6x8xf32>, vector<6x8xf32> -> vector<6x32xf32>
    %c0_72 = arith.constant 0 : index
    %c0_73 = arith.constant 0 : index
    %150 = vector.load %arg11[%c0_72, %c0_73] : memref<12x32xf32, #tpu.memory_space<vmem>>, vector<6x32xf32>
    tpu.vector_store %arg11[%c0_72, %c0_73], %149 {strides = array<i32>} : memref<12x32xf32, #tpu.memory_space<vmem>>, vector<6x32xf32>,
    %c1_74 = arith.constant 1 : index
    %c0_75 = arith.constant 0 : index
    %c0_76 = arith.constant 0 : index
    %151 = vector.load %arg3[%c1_74, %c0_75, %c0_76] : memref<2x6x6xf32, #tpu.memory_space<vmem>>, vector<1x6x6xf32>
    %152 = vector.shape_cast %151 : vector<1x6x6xf32> to vector<6x6xf32>
    %153 = vector.extract_strided_slice %73 {offsets = [6, 0], sizes = [6, 96], strides = [1, 1]} : vector<12x96xf32> to vector<6x96xf32>
    %154 = vector.extract_strided_slice %153 {offsets = [0, 0], sizes = [6, 8], strides = [1, 1]} : vector<6x96xf32> to vector<6x8xf32>
    %155 = vector.extract_strided_slice %153 {offsets = [0, 32], sizes = [6, 8], strides = [1, 1]} : vector<6x96xf32> to vector<6x8xf32>
    %156 = vector.extract_strided_slice %153 {offsets = [0, 64], sizes = [6, 8], strides = [1, 1]} : vector<6x96xf32> to vector<6x8xf32>
    %cst_77 = arith.constant dense<0.000000e+00> : vector<6x6xf32>
    %157 = tpu.matmul %154, %155, %cst_77 {dimension_numbers = #tpu.dot_dimension_numbers<[1], [1], [0], [0], [0, 0, 1, 0], [], []>} : vector<6x8xf32>, vector<6x8xf32>, vector<6x6xf32> -> vector<6x6xf32>
    %cst_78 = arith.constant 0.353553385 : f32
    %158 = vector.broadcast %cst_78 : f32 to vector<6x6xf32>
    %159 = arith.mulf %157, %158 : vector<6x6xf32>
    %160 = arith.addf %159, %152 : vector<6x6xf32>
    %cst_79 = arith.constant dense<0xFF800000> : vector<6xf32>
    %161 = vector.multi_reduction <maximumf>, %160, %cst_79 [1] : vector<6x6xf32> to vector<6xf32>
    %162 = vector.shape_cast %161 : vector<6xf32> to vector<6x1xf32>
    %163 = vector.broadcast %162 : vector<6x1xf32> to vector<6x6xf32>
    %164 = arith.subf %160, %163 : vector<6x6xf32>
    %165 = math.exp %164 : vector<6x6xf32>
    %cst_80 = arith.constant dense<0.000000e+00> : vector<6xf32>
    %166 = vector.multi_reduction <add>, %165, %cst_80 [1] : vector<6x6xf32> to vector<6xf32>
    %167 = vector.shape_cast %166 : vector<6xf32> to vector<6x1xf32>
    %168 = tpu.reciprocal %167 {approx = true} : vector<6x1xf32> -> vector<6x1xf32>
    %169 = vector.broadcast %168 : vector<6x1xf32> to vector<6x6xf32>
    %170 = arith.mulf %165, %169 : vector<6x6xf32>
    %cst_81 = arith.constant dense<0.000000e+00> : vector<6x8xf32>
    %171 = tpu.matmul %170, %156, %cst_81 {dimension_numbers = #tpu.dot_dimension_numbers<[1], [0], [0], [1], [0, 0, 1, 1], [], []>} : vector<6x6xf32>, vector<6x8xf32>, vector<6x8xf32> -> vector<6x8xf32>
    %172 = vector.extract_strided_slice %153 {offsets = [0, 8], sizes = [6, 8], strides = [1, 1]} : vector<6x96xf32> to vector<6x8xf32>
    %173 = vector.extract_strided_slice %153 {offsets = [0, 40], sizes = [6, 8], strides = [1, 1]} : vector<6x96xf32> to vector<6x8xf32>
    %174 = vector.extract_strided_slice %153 {offsets = [0, 72], sizes = [6, 8], strides = [1, 1]} : vector<6x96xf32> to vector<6x8xf32>
    %cst_82 = arith.constant dense<0.000000e+00> : vector<6x6xf32>
    %175 = tpu.matmul %172, %173, %cst_82 {dimension_numbers = #tpu.dot_dimension_numbers<[1], [1], [0], [0], [0, 0, 1, 0], [], []>} : vector<6x8xf32>, vector<6x8xf32>, vector<6x6xf32> -> vector<6x6xf32>
    %cst_83 = arith.constant 0.353553385 : f32
    %176 = vector.broadcast %cst_83 : f32 to vector<6x6xf32>
    %177 = arith.mulf %175, %176 : vector<6x6xf32>
    %178 = arith.addf %177, %152 : vector<6x6xf32>
    %cst_84 = arith.constant dense<0xFF800000> : vector<6xf32>
    %179 = vector.multi_reduction <maximumf>, %178, %cst_84 [1] : vector<6x6xf32> to vector<6xf32>
    %180 = vector.shape_cast %179 : vector<6xf32> to vector<6x1xf32>
    %181 = vector.broadcast %180 : vector<6x1xf32> to vector<6x6xf32>
    %182 = arith.subf %178, %181 : vector<6x6xf32>
    %183 = math.exp %182 : vector<6x6xf32>
    %cst_85 = arith.constant dense<0.000000e+00> : vector<6xf32>
    %184 = vector.multi_reduction <add>, %183, %cst_85 [1] : vector<6x6xf32> to vector<6xf32>
    %185 = vector.shape_cast %184 : vector<6xf32> to vector<6x1xf32>
    %186 = tpu.reciprocal %185 {approx = true} : vector<6x1xf32> -> vector<6x1xf32>
    %187 = vector.broadcast %186 : vector<6x1xf32> to vector<6x6xf32>
    %188 = arith.mulf %183, %187 : vector<6x6xf32>
    %cst_86 = arith.constant dense<0.000000e+00> : vector<6x8xf32>
    %189 = tpu.matmul %188, %174, %cst_86 {dimension_numbers = #tpu.dot_dimension_numbers<[1], [0], [0], [1], [0, 0, 1, 1], [], []>} : vector<6x6xf32>, vector<6x8xf32>, vector<6x8xf32> -> vector<6x8xf32>
    %190 = vector.extract_strided_slice %153 {offsets = [0, 16], sizes = [6, 8], strides = [1, 1]} : vector<6x96xf32> to vector<6x8xf32>
    %191 = vector.extract_strided_slice %153 {offsets = [0, 48], sizes = [6, 8], strides = [1, 1]} : vector<6x96xf32> to vector<6x8xf32>
    %192 = vector.extract_strided_slice %153 {offsets = [0, 80], sizes = [6, 8], strides = [1, 1]} : vector<6x96xf32> to vector<6x8xf32>
    %cst_87 = arith.constant dense<0.000000e+00> : vector<6x6xf32>
    %193 = tpu.matmul %190, %191, %cst_87 {dimension_numbers = #tpu.dot_dimension_numbers<[1], [1], [0], [0], [0, 0, 1, 0], [], []>} : vector<6x8xf32>, vector<6x8xf32>, vector<6x6xf32> -> vector<6x6xf32>
    %cst_88 = arith.constant 0.353553385 : f32
    %194 = vector.broadcast %cst_88 : f32 to vector<6x6xf32>
    %195 = arith.mulf %193, %194 : vector<6x6xf32>
    %196 = arith.addf %195, %152 : vector<6x6xf32>
    %cst_89 = arith.constant dense<0xFF800000> : vector<6xf32>
    %197 = vector.multi_reduction <maximumf>, %196, %cst_89 [1] : vector<6x6xf32> to vector<6xf32>
    %198 = vector.shape_cast %197 : vector<6xf32> to vector<6x1xf32>
    %199 = vector.broadcast %198 : vector<6x1xf32> to vector<6x6xf32>
    %200 = arith.subf %196, %199 : vector<6x6xf32>
    %201 = math.exp %200 : vector<6x6xf32>
    %cst_90 = arith.constant dense<0.000000e+00> : vector<6xf32>
    %202 = vector.multi_reduction <add>, %201, %cst_90 [1] : vector<6x6xf32> to vector<6xf32>
    %203 = vector.shape_cast %202 : vector<6xf32> to vector<6x1xf32>
    %204 = tpu.reciprocal %203 {approx = true} : vector<6x1xf32> -> vector<6x1xf32>
    %205 = vector.broadcast %204 : vector<6x1xf32> to vector<6x6xf32>
    %206 = arith.mulf %201, %205 : vector<6x6xf32>
    %cst_91 = arith.constant dense<0.000000e+00> : vector<6x8xf32>
    %207 = tpu.matmul %206, %192, %cst_91 {dimension_numbers = #tpu.dot_dimension_numbers<[1], [0], [0], [1], [0, 0, 1, 1], [], []>} : vector<6x6xf32>, vector<6x8xf32>, vector<6x8xf32> -> vector<6x8xf32>
    %208 = vector.extract_strided_slice %153 {offsets = [0, 24], sizes = [6, 8], strides = [1, 1]} : vector<6x96xf32> to vector<6x8xf32>
    %209 = vector.extract_strided_slice %153 {offsets = [0, 56], sizes = [6, 8], strides = [1, 1]} : vector<6x96xf32> to vector<6x8xf32>
    %210 = vector.extract_strided_slice %153 {offsets = [0, 88], sizes = [6, 8], strides = [1, 1]} : vector<6x96xf32> to vector<6x8xf32>
    %cst_92 = arith.constant dense<0.000000e+00> : vector<6x6xf32>
    %211 = tpu.matmul %208, %209, %cst_92 {dimension_numbers = #tpu.dot_dimension_numbers<[1], [1], [0], [0], [0, 0, 1, 0], [], []>} : vector<6x8xf32>, vector<6x8xf32>, vector<6x6xf32> -> vector<6x6xf32>
    %cst_93 = arith.constant 0.353553385 : f32
    %212 = vector.broadcast %cst_93 : f32 to vector<6x6xf32>
    %213 = arith.mulf %211, %212 : vector<6x6xf32>
    %214 = arith.addf %213, %152 : vector<6x6xf32>
    %cst_94 = arith.constant dense<0xFF800000> : vector<6xf32>
    %215 = vector.multi_reduction <maximumf>, %214, %cst_94 [1] : vector<6x6xf32> to vector<6xf32>
    %216 = vector.shape_cast %215 : vector<6xf32> to vector<6x1xf32>
    %217 = vector.broadcast %216 : vector<6x1xf32> to vector<6x6xf32>
    %218 = arith.subf %214, %217 : vector<6x6xf32>
    %219 = math.exp %218 : vector<6x6xf32>
    %cst_95 = arith.constant dense<0.000000e+00> : vector<6xf32>
    %220 = vector.multi_reduction <add>, %219, %cst_95 [1] : vector<6x6xf32> to vector<6xf32>
    %221 = vector.shape_cast %220 : vector<6xf32> to vector<6x1xf32>
    %222 = tpu.reciprocal %221 {approx = true} : vector<6x1xf32> -> vector<6x1xf32>
    %223 = vector.broadcast %222 : vector<6x1xf32> to vector<6x6xf32>
    %224 = arith.mulf %219, %223 : vector<6x6xf32>
    %cst_96 = arith.constant dense<0.000000e+00> : vector<6x8xf32>
    %225 = tpu.matmul %224, %210, %cst_96 {dimension_numbers = #tpu.dot_dimension_numbers<[1], [0], [0], [1], [0, 0, 1, 1], [], []>} : vector<6x6xf32>, vector<6x8xf32>, vector<6x8xf32> -> vector<6x8xf32>
    %226 = tpu.concatenate %171, %189, %207, %225 in 1 : vector<6x8xf32>, vector<6x8xf32>, vector<6x8xf32>, vector<6x8xf32> -> vector<6x32xf32>
    %c6_97 = arith.constant 6 : index
    %c0_98 = arith.constant 0 : index
    %227 = vector.load %arg11[%c6_97, %c0_98] : memref<12x32xf32, #tpu.memory_space<vmem>>, vector<6x32xf32>
    tpu.vector_store %arg11[%c6_97, %c0_98], %226 {strides = array<i32>} : memref<12x32xf32, #tpu.memory_space<vmem>>, vector<6x32xf32>,
    %c0_99 = arith.constant 0 : index
    %c0_100 = arith.constant 0 : index
    %228 = vector.load %arg11[%c0_99, %c0_100] : memref<12x32xf32, #tpu.memory_space<vmem>>, vector<12x32xf32>
    %229 = arith.truncf %228 : vector<12x32xf32> to vector<12x32xbf16>
    %c160 = arith.constant 160 : index
    %c0_101 = arith.constant 0 : index
    %230 = vector.load %arg4[%c160, %c0_101] : memref<320x128xbf16, #tpu.memory_space<vmem>>, vector<32x32xbf16>
    %cst_102 = arith.constant dense<0.000000e+00> : vector<12x32xf32>
    %231 = tpu.matmul %229, %230, %cst_102 {dimension_numbers = #tpu.dot_dimension_numbers<[1], [0], [0], [1], [0, 0, 1, 1], [], []>} : vector<12x32xbf16>, vector<32x32xbf16>, vector<12x32xf32> -> vector<12x32xf32>
    %c7 = arith.constant 7 : index
    %c0_103 = arith.constant 0 : index
    %232 = vector.load %arg5[%c7, %c0_103] : memref<16x128xf32, #tpu.memory_space<vmem>>, vector<1x32xf32>
    %233 = vector.broadcast %232 : vector<1x32xf32> to vector<12x32xf32>
    %234 = arith.addf %231, %233 : vector<12x32xf32>
    %235 = arith.truncf %234 : vector<12x32xf32> to vector<12x32xbf16>
    %c192 = arith.constant 192 : index
    %c0_104 = arith.constant 0 : index
    %236 = vector.load %arg4[%c192, %c0_104] : memref<320x128xbf16, #tpu.memory_space<vmem>>, vector<32x16xbf16>
    %cst_105 = arith.constant dense<0.000000e+00> : vector<12x16xf32>
    %237 = tpu.matmul %235, %236, %cst_105 {dimension_numbers = #tpu.dot_dimension_numbers<[1], [0], [0], [1], [0, 0, 1, 1], [], []>} : vector<12x32xbf16>, vector<32x16xbf16>, vector<12x16xf32> -> vector<12x16xf32>
    %c8 = arith.constant 8 : index
    %c0_106 = arith.constant 0 : index
    %238 = vector.load %arg5[%c8, %c0_106] : memref<16x128xf32, #tpu.memory_space<vmem>>, vector<1x16xf32>
    %239 = vector.broadcast %238 : vector<1x16xf32> to vector<12x16xf32>
    %240 = arith.addf %237, %239 : vector<12x16xf32>
    %c0_107 = arith.constant 0 : index
    %c0_108 = arith.constant 0 : index
    %241 = vector.load %arg12[%c0_107, %c0_108] : memref<12x16xf32, #tpu.memory_space<vmem>>, vector<12x16xf32>
    tpu.vector_store %arg12[%c0_107, %c0_108], %240 {strides = array<i32>} : memref<12x16xf32, #tpu.memory_space<vmem>>, vector<12x16xf32>,
    %c0_i32_109 = arith.constant 0 : i32
    %c6_i32_110 = arith.constant 6 : i32
    %242 = arith.addi %c0_i32_109, %c6_i32_110 : i32
    %c1_i32_111 = arith.constant 1 : i32
    scf.for %arg15 = %c0_i32_109 to %242 step %c1_i32_111  : i32 {
      %c1_i32_141 = arith.constant 1 : i32
      %297 = arith.muli %arg15, %c1_i32_141 : i32
      %c0_i32_142 = arith.constant 0 : i32
      %298 = arith.addi %c0_i32_142, %297 : i32
      %c0_i32_143 = arith.constant 0 : i32
      %299 = arith.addi %c0_i32_143, %298 : i32
      %c0_144 = arith.constant 0 : index
      %c0_145 = arith.constant 0 : index
      %300 = vector.load %arg7[%c0_144, %c0_145] : memref<128x16xf32, #tpu.memory_space<vmem>>, vector<64x16xf32>
      %c0_146 = arith.constant 0 : index
      %c0_147 = arith.constant 0 : index
      %301 = vector.load %arg9[%c0_146, %c0_147] : memref<128x16xf32, #tpu.memory_space<vmem>>, vector<64x16xf32>
      %302 = arith.index_cast %299 : i32 to index
      %c0_148 = arith.constant 0 : index
      %303 = vector.load %arg12[%302, %c0_148] : memref<12x16xf32, #tpu.memory_space<vmem>>, vector<1x16xf32>
      %304 = vector.broadcast %303 : vector<1x16xf32> to vector<64x16xf32>
      %305 = arith.addf %301, %304 : vector<64x16xf32>
      %306 = arith.negf %305 : vector<64x16xf32>
      %307 = math.exp %306 : vector<64x16xf32>
      %cst_149 = arith.constant 1.000000e+00 : f32
      %308 = vector.broadcast %cst_149 : f32 to vector<64x16xf32>
      %309 = arith.addf %308, %307 : vector<64x16xf32>
      %310 = arith.divf %308, %309 : vector<64x16xf32>
      %311 = arith.mulf %310, %300 : vector<64x16xf32>
      %312 = arith.index_cast %299 : i32 to index
      %c0_150 = arith.constant 0 : index
      %313 = vector.load %arg10[%312, %c0_150] : memref<12x32xf32, #tpu.memory_space<vmem>>, vector<1x32xf32>
      %314 = arith.truncf %311 : vector<64x16xf32> to vector<64x16xbf16>
      %cst_151 = arith.constant dense<0.000000e+00> : vector<64x32xf32>
      %315 = tpu.matmul %314, %38, %cst_151 {dimension_numbers = #tpu.dot_dimension_numbers<[1], [0], [0], [1], [0, 0, 1, 1], [], []>} : vector<64x16xbf16>, vector<16x32xbf16>, vector<64x32xf32> -> vector<64x32xf32>
      %316 = vector.broadcast %313 : vector<1x32xf32> to vector<64x32xf32>
      %317 = arith.addf %315, %316 : vector<64x32xf32>
      %cst_152 = arith.constant 0.000000e+00 : f32
      %318 = vector.broadcast %cst_152 : f32 to vector<64x32xf32>
      %319 = arith.maximumf %317, %318 : vector<64x32xf32>
      %320 = vector.broadcast %35 : vector<1x32xf32> to vector<64x32xf32>
      %321 = arith.mulf %319, %320 : vector<64x32xf32>
      %cst_153 = arith.constant dense<0.000000e+00> : vector<64xf32>
      %322 = vector.multi_reduction <add>, %321, %cst_153 [1] : vector<64x32xf32> to vector<64xf32>
      %323 = vector.shape_cast %322 : vector<64xf32> to vector<64x1xf32>
      %324 = vector.broadcast %36 : vector<1x1xf32> to vector<64x1xf32>
      %325 = arith.addf %323, %324 : vector<64x1xf32>
      %cst_154 = arith.constant dense<0xFF800000> : vector<1xf32>
      %326 = vector.multi_reduction <maximumf>, %325, %cst_154 [0] : vector<64x1xf32> to vector<1xf32>
      %327 = vector.shape_cast %326 : vector<1xf32> to vector<1x1xf32>
      %328 = vector.broadcast %327 : vector<1x1xf32> to vector<64x1xf32>
      %329 = arith.subf %325, %328 : vector<64x1xf32>
      %330 = math.exp %329 : vector<64x1xf32>
      %cst_155 = arith.constant dense<0.000000e+00> : vector<1xf32>
      %331 = vector.multi_reduction <add>, %330, %cst_155 [0] : vector<64x1xf32> to vector<1xf32>
      %332 = vector.shape_cast %331 : vector<1xf32> to vector<1x1xf32>
      %333 = tpu.reciprocal %332 {approx = true} : vector<1x1xf32> -> vector<1x1xf32>
      %334 = vector.broadcast %333 : vector<1x1xf32> to vector<64x1xf32>
      %335 = arith.mulf %330, %334 : vector<64x1xf32>
      %336 = vector.broadcast %335 : vector<64x1xf32> to vector<64x16xf32>
      %337 = arith.mulf %336, %311 : vector<64x16xf32>
      %cst_156 = arith.constant dense<0.000000e+00> : vector<16xf32>
      %338 = vector.multi_reduction <add>, %337, %cst_156 [0] : vector<64x16xf32> to vector<16xf32>
      %339 = vector.shape_cast %338 : vector<16xf32> to vector<1x16xf32>
      %340 = arith.index_cast %299 : i32 to index
      %c0_157 = arith.constant 0 : index
      %341 = vector.load %arg14[%340, %c0_157] : memref<12x16xf32, #tpu.memory_space<vmem>>, vector<1x16xf32>
      tpu.vector_store %arg14[%340, %c0_157], %339 {strides = array<i32>} : memref<12x16xf32, #tpu.memory_space<vmem>>, vector<1x16xf32>,
    }
    %c6_i32_112 = arith.constant 6 : i32
    %c0_i32_113 = arith.constant 0 : i32
    %c6_i32_114 = arith.constant 6 : i32
    %243 = arith.addi %c0_i32_113, %c6_i32_114 : i32
    %c1_i32_115 = arith.constant 1 : i32
    scf.for %arg15 = %c0_i32_113 to %243 step %c1_i32_115  : i32 {
      %c1_i32_141 = arith.constant 1 : i32
      %297 = arith.muli %arg15, %c1_i32_141 : i32
      %c0_i32_142 = arith.constant 0 : i32
      %298 = arith.addi %c0_i32_142, %297 : i32
      %c6_i32_143 = arith.constant 6 : i32
      %299 = arith.addi %c6_i32_143, %298 : i32
      %c64_144 = arith.constant 64 : index
      %c0_145 = arith.constant 0 : index
      %300 = vector.load %arg7[%c64_144, %c0_145] : memref<128x16xf32, #tpu.memory_space<vmem>>, vector<64x16xf32>
      %c64_146 = arith.constant 64 : index
      %c0_147 = arith.constant 0 : index
      %301 = vector.load %arg9[%c64_146, %c0_147] : memref<128x16xf32, #tpu.memory_space<vmem>>, vector<64x16xf32>
      %302 = arith.index_cast %299 : i32 to index
      %c0_148 = arith.constant 0 : index
      %303 = vector.load %arg12[%302, %c0_148] : memref<12x16xf32, #tpu.memory_space<vmem>>, vector<1x16xf32>
      %304 = vector.broadcast %303 : vector<1x16xf32> to vector<64x16xf32>
      %305 = arith.addf %301, %304 : vector<64x16xf32>
      %306 = arith.negf %305 : vector<64x16xf32>
      %307 = math.exp %306 : vector<64x16xf32>
      %cst_149 = arith.constant 1.000000e+00 : f32
      %308 = vector.broadcast %cst_149 : f32 to vector<64x16xf32>
      %309 = arith.addf %308, %307 : vector<64x16xf32>
      %310 = arith.divf %308, %309 : vector<64x16xf32>
      %311 = arith.mulf %310, %300 : vector<64x16xf32>
      %312 = arith.index_cast %299 : i32 to index
      %c0_150 = arith.constant 0 : index
      %313 = vector.load %arg10[%312, %c0_150] : memref<12x32xf32, #tpu.memory_space<vmem>>, vector<1x32xf32>
      %314 = arith.truncf %311 : vector<64x16xf32> to vector<64x16xbf16>
      %cst_151 = arith.constant dense<0.000000e+00> : vector<64x32xf32>
      %315 = tpu.matmul %314, %38, %cst_151 {dimension_numbers = #tpu.dot_dimension_numbers<[1], [0], [0], [1], [0, 0, 1, 1], [], []>} : vector<64x16xbf16>, vector<16x32xbf16>, vector<64x32xf32> -> vector<64x32xf32>
      %316 = vector.broadcast %313 : vector<1x32xf32> to vector<64x32xf32>
      %317 = arith.addf %315, %316 : vector<64x32xf32>
      %cst_152 = arith.constant 0.000000e+00 : f32
      %318 = vector.broadcast %cst_152 : f32 to vector<64x32xf32>
      %319 = arith.maximumf %317, %318 : vector<64x32xf32>
      %320 = vector.broadcast %35 : vector<1x32xf32> to vector<64x32xf32>
      %321 = arith.mulf %319, %320 : vector<64x32xf32>
      %cst_153 = arith.constant dense<0.000000e+00> : vector<64xf32>
      %322 = vector.multi_reduction <add>, %321, %cst_153 [1] : vector<64x32xf32> to vector<64xf32>
      %323 = vector.shape_cast %322 : vector<64xf32> to vector<64x1xf32>
      %324 = vector.broadcast %36 : vector<1x1xf32> to vector<64x1xf32>
      %325 = arith.addf %323, %324 : vector<64x1xf32>
      %cst_154 = arith.constant dense<0xFF800000> : vector<1xf32>
      %326 = vector.multi_reduction <maximumf>, %325, %cst_154 [0] : vector<64x1xf32> to vector<1xf32>
      %327 = vector.shape_cast %326 : vector<1xf32> to vector<1x1xf32>
      %328 = vector.broadcast %327 : vector<1x1xf32> to vector<64x1xf32>
      %329 = arith.subf %325, %328 : vector<64x1xf32>
      %330 = math.exp %329 : vector<64x1xf32>
      %cst_155 = arith.constant dense<0.000000e+00> : vector<1xf32>
      %331 = vector.multi_reduction <add>, %330, %cst_155 [0] : vector<64x1xf32> to vector<1xf32>
      %332 = vector.shape_cast %331 : vector<1xf32> to vector<1x1xf32>
      %333 = tpu.reciprocal %332 {approx = true} : vector<1x1xf32> -> vector<1x1xf32>
      %334 = vector.broadcast %333 : vector<1x1xf32> to vector<64x1xf32>
      %335 = arith.mulf %330, %334 : vector<64x1xf32>
      %336 = vector.broadcast %335 : vector<64x1xf32> to vector<64x16xf32>
      %337 = arith.mulf %336, %311 : vector<64x16xf32>
      %cst_156 = arith.constant dense<0.000000e+00> : vector<16xf32>
      %338 = vector.multi_reduction <add>, %337, %cst_156 [0] : vector<64x16xf32> to vector<16xf32>
      %339 = vector.shape_cast %338 : vector<16xf32> to vector<1x16xf32>
      %340 = arith.index_cast %299 : i32 to index
      %c0_157 = arith.constant 0 : index
      %341 = vector.load %arg14[%340, %c0_157] : memref<12x16xf32, #tpu.memory_space<vmem>>, vector<1x16xf32>
      tpu.vector_store %arg14[%340, %c0_157], %339 {strides = array<i32>} : memref<12x16xf32, #tpu.memory_space<vmem>>, vector<1x16xf32>,
    }
    %c6_i32_116 = arith.constant 6 : i32
    %c0_117 = arith.constant 0 : index
    %c0_118 = arith.constant 0 : index
    %244 = vector.load %arg14[%c0_117, %c0_118] : memref<12x16xf32, #tpu.memory_space<vmem>>, vector<12x16xf32>
    %245 = arith.truncf %244 : vector<12x16xf32> to vector<12x16xbf16>
    %c112_119 = arith.constant 112 : index
    %c0_120 = arith.constant 0 : index
    %246 = vector.load %arg4[%c112_119, %c0_120] : memref<320x128xbf16, #tpu.memory_space<vmem>>, vector<16x32xbf16>
    %cst_121 = arith.constant dense<0.000000e+00> : vector<12x32xf32>
    %247 = tpu.matmul %245, %246, %cst_121 {dimension_numbers = #tpu.dot_dimension_numbers<[1], [0], [0], [1], [0, 0, 1, 1], [], []>} : vector<12x16xbf16>, vector<16x32xbf16>, vector<12x32xf32> -> vector<12x32xf32>
    %c5_122 = arith.constant 5 : index
    %c0_123 = arith.constant 0 : index
    %248 = vector.load %arg5[%c5_122, %c0_123] : memref<16x128xf32, #tpu.memory_space<vmem>>, vector<1x32xf32>
    %249 = vector.broadcast %248 : vector<1x32xf32> to vector<12x32xf32>
    %250 = arith.addf %247, %249 : vector<12x32xf32>
    %cst_124 = arith.constant 0.000000e+00 : f32
    %251 = vector.broadcast %cst_124 : f32 to vector<12x32xf32>
    %252 = arith.maximumf %250, %251 : vector<12x32xf32>
    %253 = arith.mulf %33, %252 : vector<12x32xf32>
    %cst_125 = arith.constant 0.000000e+00 : f32
    %254 = vector.broadcast %cst_125 : f32 to vector<12x32xf32>
    %255 = arith.maximumf %253, %254 : vector<12x32xf32>
    %256 = math.sqrt %255 : vector<12x32xf32>
    %cst_126 = arith.constant 0.000000e+00 : f32
    %257 = vector.broadcast %cst_126 : f32 to vector<12x32xf32>
    %258 = arith.subf %257, %253 : vector<12x32xf32>
    %cst_127 = arith.constant 0.000000e+00 : f32
    %259 = vector.broadcast %cst_127 : f32 to vector<12x32xf32>
    %260 = arith.maximumf %258, %259 : vector<12x32xf32>
    %261 = math.sqrt %260 : vector<12x32xf32>
    %262 = arith.subf %256, %261 : vector<12x32xf32>
    %263 = arith.mulf %262, %262 : vector<12x32xf32>
    %cst_128 = arith.constant dense<0.000000e+00> : vector<12xf32>
    %264 = vector.multi_reduction <add>, %263, %cst_128 [1] : vector<12x32xf32> to vector<12xf32>
    %265 = vector.shape_cast %264 : vector<12xf32> to vector<12x1xf32>
    %cst_129 = arith.constant 1.000000e-24 : f32
    %266 = vector.broadcast %cst_129 : f32 to vector<12x1xf32>
    %267 = arith.maximumf %265, %266 : vector<12x1xf32>
    %268 = math.rsqrt %267 : vector<12x1xf32>
    %269 = vector.broadcast %268 : vector<12x1xf32> to vector<12x32xf32>
    %270 = arith.mulf %262, %269 : vector<12x32xf32>
    %271 = arith.mulf %49, %252 : vector<12x32xf32>
    %272 = arith.negf %271 : vector<12x32xf32>
    %273 = math.exp %272 : vector<12x32xf32>
    %cst_130 = arith.constant 1.000000e+00 : f32
    %274 = vector.broadcast %cst_130 : f32 to vector<12x32xf32>
    %275 = arith.addf %274, %273 : vector<12x32xf32>
    %276 = arith.divf %274, %275 : vector<12x32xf32>
    %277 = arith.mulf %276, %67 : vector<12x32xf32>
    %cst_131 = arith.constant 1.000000e+00 : f32
    %278 = vector.broadcast %cst_131 : f32 to vector<12x32xf32>
    %279 = arith.subf %278, %276 : vector<12x32xf32>
    %280 = arith.mulf %279, %270 : vector<12x32xf32>
    %281 = arith.addf %277, %280 : vector<12x32xf32>
    %282 = arith.truncf %281 : vector<12x32xf32> to vector<12x32xbf16>
    %c224 = arith.constant 224 : index
    %c0_132 = arith.constant 0 : index
    %283 = vector.load %arg4[%c224, %c0_132] : memref<320x128xbf16, #tpu.memory_space<vmem>>, vector<32x64xbf16>
    %cst_133 = arith.constant dense<0.000000e+00> : vector<12x64xf32>
    %284 = tpu.matmul %282, %283, %cst_133 {dimension_numbers = #tpu.dot_dimension_numbers<[1], [0], [0], [1], [0, 0, 1, 1], [], []>} : vector<12x32xbf16>, vector<32x64xbf16>, vector<12x64xf32> -> vector<12x64xf32>
    %c9 = arith.constant 9 : index
    %c0_134 = arith.constant 0 : index
    %285 = vector.load %arg5[%c9, %c0_134] : memref<16x128xf32, #tpu.memory_space<vmem>>, vector<1x64xf32>
    %286 = vector.broadcast %285 : vector<1x64xf32> to vector<12x64xf32>
    %287 = arith.addf %284, %286 : vector<12x64xf32>
    %cst_135 = arith.constant 0.000000e+00 : f32
    %288 = vector.broadcast %cst_135 : f32 to vector<12x64xf32>
    %289 = arith.maximumf %287, %288 : vector<12x64xf32>
    %290 = arith.truncf %289 : vector<12x64xf32> to vector<12x64xbf16>
    %c256 = arith.constant 256 : index
    %c0_136 = arith.constant 0 : index
    %291 = vector.load %arg4[%c256, %c0_136] : memref<320x128xbf16, #tpu.memory_space<vmem>>, vector<64x128xbf16>
    %cst_137 = arith.constant dense<0.000000e+00> : vector<12x128xf32>
    %292 = tpu.matmul %290, %291, %cst_137 {dimension_numbers = #tpu.dot_dimension_numbers<[1], [0], [0], [1], [0, 0, 1, 1], [], []>} : vector<12x64xbf16>, vector<64x128xbf16>, vector<12x128xf32> -> vector<12x128xf32>
    %c10 = arith.constant 10 : index
    %c0_138 = arith.constant 0 : index
    %293 = vector.load %arg5[%c10, %c0_138] : memref<16x128xf32, #tpu.memory_space<vmem>>, vector<1x128xf32>
    %294 = vector.broadcast %293 : vector<1x128xf32> to vector<12x128xf32>
    %295 = arith.addf %292, %294 : vector<12x128xf32>
    %c0_139 = arith.constant 0 : index
    %c0_140 = arith.constant 0 : index
    %296 = vector.load %arg6[%c0_139, %c0_140] : memref<12x128xf32, #tpu.memory_space<vmem>>, vector<12x128xf32>
    tpu.vector_store %arg6[%c0_139, %c0_140], %295 {strides = array<i32>} : memref<12x128xf32, #tpu.memory_space<vmem>>, vector<12x128xf32>,
    return
  }
  func.func @transform_0(%arg0: i32) -> (i32, i32) {
    %c0_i32 = arith.constant 0 : i32
    %c0_i32_0 = arith.constant 0 : i32
    %c0_i32_1 = arith.constant 0 : i32
    return %c0_i32, %c0_i32_0 : i32, i32
  }
  func.func @transform_1(%arg0: i32) -> (i32, i32) {
    %c0_i32 = arith.constant 0 : i32
    %c0_i32_0 = arith.constant 0 : i32
    %c0_i32_1 = arith.constant 0 : i32
    return %c0_i32, %c0_i32_0 : i32, i32
  }
  func.func @transform_2(%arg0: i32) -> (i32, i32, i32) {
    %c0_i32 = arith.constant 0 : i32
    %c0_i32_0 = arith.constant 0 : i32
    %c0_i32_1 = arith.constant 0 : i32
    %c0_i32_2 = arith.constant 0 : i32
    return %c0_i32, %c0_i32_0, %c0_i32_1 : i32, i32, i32
  }
  func.func @transform_3(%arg0: i32) -> (i32, i32) {
    %c0_i32 = arith.constant 0 : i32
    %c0_i32_0 = arith.constant 0 : i32
    %c0_i32_1 = arith.constant 0 : i32
    return %c0_i32, %c0_i32_0 : i32, i32
  }
  func.func @transform_4(%arg0: i32) -> (i32, i32) {
    %c0_i32 = arith.constant 0 : i32
    %c0_i32_0 = arith.constant 0 : i32
    %c0_i32_1 = arith.constant 0 : i32
    return %c0_i32, %c0_i32_0 : i32, i32
  }
  func.func @transform_5(%arg0: i32) -> (i32, i32) {
    %c0_i32 = arith.constant 0 : i32
    %c0_i32_0 = arith.constant 0 : i32
    %c0_i32_1 = arith.constant 0 : i32
    return %c0_i32, %c0_i32_0 : i32, i32
  }
}

</mosaic_0001>

<bundles_post_ra>
// kernel: top_down_forward.1
= control target key start
LH: loop header
LB: loop body
LE: loop exit
PB: predicated region body
PF: predicated region fallthrough
CT: control target
= control target key end

     0   :  { %vm98_vm0 = vcmask 261120   ;;  %v4742_v15 = vmov 0.0   ;;  %vm4743_vm1 = vmmov 0   ;;  %vm236_vm2 = vcmask 130048   ;;  %s4744_s9 = smov 96   ;;  %s4988_s13 = smov 0   ;;  %s5640_s2 = inlined_call_operand.vmem [shape: f32[2,6,6], index: 2, kind: input, shape index: {}]   ;;  %s5641_s3 = inlined_call_operand.vmem [shape: bf16[320,128], index: 3, kind: input, shape index: {}]   ;;  %s5642_s5 = inlined_call_operand.vmem [shape: f32[12,128], index: 5, kind: output, shape index: {}]   ;;  %s5643_s0 = inlined_call_operand.vmem [shape: bf16[128,32], index: 0, kind: input, shape index: {}]   ;;  %s5644_s4 = inlined_call_operand.vmem [shape: f32[16,128], index: 4, kind: input, shape index: {}]   ;;  %s5645_s1 = inlined_call_operand.vmem [shape: bf16[12,32], index: 1, kind: input, shape index: {}]  }
   0x1   :  { %v4472_v0 = vld [vmem:[%s5641_s3] sm:$0xff]   ;;  %v4799_v1 = vld [vmem:[%s5641_s3 + $0x30] sm:$0xf]  ;;  %v4804_v2 = vld [vmem:[%s5641_s3 + $0x34] sm:$0xf]  ;;  %vm629_vm3 = vcmask 257024  }
   0x2   :  { %4205 = vmatprep.subr.bf16.mxu0 %v4472_v0  ;;  %v4473_v3 = vld [vmem:[%s5641_s3 + $0x8] sm:$0xff]   ;;  %v4474_v4 = vld [vmem:[%s5643_s0] sm:$0xff]   ;;  %v4476_v6 = vld [vmem:[%s5643_s0 + $0x10] sm:$0xff]  }
   0x3   :  { %4206 = vmatpush3.bf16.msra.mxu0 %v4472_v0  ;;  %4209 = vmatprep.mubr.msk.bf16.mxu0 %vm98_vm0, %v4474_v4  ;;  %v4475_v5 = vld [vmem:[%s5643_s0 + $0x8] sm:$0xff]   ;;  %v4477_v7 = vld [vmem:[%s5643_s0 + $0x18] sm:$0xff]   ;;  %v4478_v8 = vld [vmem:[%s5643_s0 + $0x20] sm:$0xff]  }
   0x4   :  { %4207 = vmatprep.subr.bf16.mxu0 %v4473_v3  ;;  %v4479_v9 = vld [vmem:[%s5643_s0 + $0x28] sm:$0xff]   ;;  %v4480_v10 = vld [vmem:[%s5643_s0 + $0x30] sm:$0xff]   ;;  %v4481_v11 = vld [vmem:[%s5643_s0 + $0x38] sm:$0xff]  }
   0x5   :  { %v4844_v12 = vld [vmem:[%s5644_s4 + $0x3] ss:$0 sm:$0xff]  ;;  %v4849_v13 = vld [vmem:[%s5644_s4 + $0x4] ss:$0 sm:$0xff]  ;;  %v4482_v14 = vld [vmem:[%s5641_s3 + $0x30] sm:$0xff]  }
   0x6   :  { %4225 = vmatprep.subr.bf16.mxu1 %v4482_v14  ;;  %v4861_v16 = vld [vmem:[%s5644_s4] ss:$0 sm:$0xff]  ;;  %v4483_v32 = vld [vmem:[%s5641_s3 + $0x10] sm:$0xff]   ;;  %v4484_v42 = vld [vmem:[%s5641_s3 + $0x18] sm:$0xff]  }
   0x7   :  { %4208 = vmatpush3.bf16.msra.mxu0 %v4473_v3  ;;  %4226 = vmatpush3.bf16.msra.mxu1 %v4482_v14 }
   0x8   :  { %4243 = vmatprep.subr.bf16.mxu1 %v4742_v15  ;;  %4251 = vmatprep.subr.bf16.mxu0 %v4742_v15 }
   0xa   :  { %4210 = vmatmul.mubr.msk.bf16.vlgmr.msra.gmra.mrb[0].mxu0 %vm98_vm0, %v4475_v5 }
   0xb   :  { %4213 = vmatprep.mubr.msk.bf16.mxu0 %vm98_vm0, %v4476_v6 }
  0x12   :  { %4214 = vmatmul.mubr.msk.bf16.gmra.mrb[4].mxu0 %vm98_vm0, %v4477_v7 }
  0x13   :  { %4217 = vmatprep.mubr.msk.bf16.mxu0 %vm98_vm0, %v4478_v8 }
  0x1a   :  { %4218 = vmatmul.mubr.msk.bf16.gmra.mrb[8].mxu0 %vm98_vm0, %v4479_v9 }
  0x1b   :  { %4221 = vmatprep.mubr.msk.bf16.mxu0 %vm98_vm0, %v4480_v10 }
  0x22   :  { %4222 = vmatmul.mubr.msk.bf16.gmra.mrb[12].mxu0 %vm98_vm0, %v4481_v11 }
  0x23   :  { %4255 = vmatprep.mubr.msk.bf16.mxu0 %vm4743_vm1, %v4742_v15 }
  0xdd   :  { %v4211_v17 = vpop.f32.mrb[0].mxu0 }
  0xde   :  { %v166_v18 = vadd.f32 %v4211_v17, %v4861_v16  ;;  %v157_v19 = vpop.f32.mrb[1].mxu0  ;;  %v4486_v17 = vld [vmem:[%s5641_s3 + $0x20] sm:$0xff]  }
  0xdf   :  { %v158_v20 = vadd.f32 %v4861_v16, %v157_v19  ;;  %v4212_v21 = vpop.f32.mrb[2].mxu0  ;;  %4252 = vmatpush3.bf16.msra.mxu0 %v4486_v17 }
  0xe0   :  { %v222_v22 = vmax.f32 %v166_v18, 0.0  ;;  %v169_v23 = vadd.f32 %v4212_v21, %v4861_v16  ;;  %v160_v24 = vpop.f32.mrb[3].mxu0  ;;  %4253 = vmatprep.subr.bf16.mxu0 %v4742_v15  ;;  %v4487_v18 = vld [vmem:[%s5641_s3 + $0x28] sm:$0xff]  }
  0xe1   :  { %v220_v25 = vmax.f32 %v158_v20, 0.0  ;;  %v161_v26 = vadd.f32 %v4861_v16, %v160_v24 }
  0xe2   :  { %239 = vst.msk [vmem:[#allocation2 + $0x10] sm:$0xff] %vm236_vm2, %v222_v22  ;;  %v223_v27 = vmax.f32 %v169_v23, 0.0 }
  0xe3   :  { %237 = vst.msk [vmem:[#allocation2] sm:$0xff] %vm236_vm2, %v220_v25  ;;  %v221_v28 = vmax.f32 %v161_v26, 0.0  ;;  %4254 = vmatpush3.bf16.msra.mxu0 %v4487_v18 }
  0xe4   :  { %240 = vst.msk [vmem:[#allocation2 + $0x18] sm:$0xff] %vm236_vm2, %v223_v27  ;;  %v254_v29 = vpack.c.bf16 %v223_v27, %v222_v22 }
  0xe5   :  { %238 = vst.msk [vmem:[#allocation2 + $0x8] sm:$0xff] %vm236_vm2, %v221_v28  ;;  %v4215_v30 = vpop.f32.mrb[4].mxu0  ;;  %v253_v31 = vpack.c.bf16 %v221_v28, %v220_v25 }
  0xe6   :  { %v182_v33 = vadd.f32 %v4215_v30, %v4861_v16  ;;  %v173_v34 = vpop.f32.mrb[5].mxu0 }
  0xe7   :  { %v174_v35 = vadd.f32 %v4861_v16, %v173_v34  ;;  %v4216_v36 = vpop.f32.mrb[6].mxu0  ;;  %4227 = vmatprep.mubr.msk.bf16.mxu1 %vm236_vm2, %v253_v31 }
  0xe8   :  { %v226_v37 = vmax.f32 %v182_v33, 0.0  ;;  %v185_v38 = vadd.f32 %v4216_v36, %v4861_v16  ;;  %v176_v39 = vpop.f32.mrb[7].mxu0  ;;  %4228 = vmatmul.mubr.msk.bf16.vlgmr.msra.gmra.mrb[0].mxu1 %vm236_vm2, %v254_v29 }
  0xe9   :  { %v224_v40 = vmax.f32 %v174_v35, 0.0  ;;  %v177_v41 = vadd.f32 %v4861_v16, %v176_v39  ;;  %4244 = vmatpush3.bf16.msra.mxu1 %v4483_v32  ;;  %v4006_v35 = vld [vmem:[%s5644_s4 + $0x1] ss:$0 sm:$0xff] }
  0xea   :  { %243 = vst.msk [vmem:[#allocation2 + $0x30] sm:$0xff] %vm236_vm2, %v226_v37  ;;  %v227_v43 = vmax.f32 %v185_v38, 0.0  ;;  %4245 = vmatprep.subr.bf16.mxu1 %v4742_v15 }
  0xeb   :  { %241 = vst.msk [vmem:[#allocation2 + $0x20] sm:$0xff] %vm236_vm2, %v224_v40  ;;  %v225_v44 = vmax.f32 %v177_v41, 0.0 }
  0xec   :  { %244 = vst.msk [vmem:[#allocation2 + $0x38] sm:$0xff] %vm236_vm2, %v227_v43  ;;  %v256_v45 = vpack.c.bf16 %v227_v43, %v226_v37 }
  0xed   :  { %242 = vst.msk [vmem:[#allocation2 + $0x28] sm:$0xff] %vm236_vm2, %v225_v44  ;;  %v255_v46 = vpack.c.bf16 %v225_v44, %v224_v40  ;;  %v4219_v47 = vpop.f32.mrb[8].mxu0  ;;  %4246 = vmatpush3.bf16.msra.mxu1 %v4484_v42 }
  0xee   :  { %v198_v48 = vadd.f32 %v4219_v47, %v4861_v16  ;;  %v189_v49 = vpop.f32.mrb[9].mxu0 }
  0xef   :  { %v190_v50 = vadd.f32 %v4861_v16, %v189_v49  ;;  %v4220_v51 = vpop.f32.mrb[10].mxu0  ;;  %4231 = vmatprep.mubr.msk.bf16.mxu1 %vm236_vm2, %v255_v46 }
  0xf0   :  { %v230_v52 = vmax.f32 %v198_v48, 0.0  ;;  %v201_v53 = vadd.f32 %v4220_v51, %v4861_v16  ;;  %v192_v54 = vpop.f32.mrb[11].mxu0  ;;  %4232 = vmatmul.mubr.msk.bf16.gmra.mrb[4].mxu1 %vm236_vm2, %v256_v45 }
  0xf1   :  { %v228_v55 = vmax.f32 %v190_v50, 0.0  ;;  %v193_v56 = vadd.f32 %v4861_v16, %v192_v54 }
  0xf2   :  { %247 = vst.msk [vmem:[#allocation2 + $0x50] sm:$0xff] %vm236_vm2, %v230_v52  ;;  %v231_v57 = vmax.f32 %v201_v53, 0.0 }
  0xf3   :  { %245 = vst.msk [vmem:[#allocation2 + $0x40] sm:$0xff] %vm236_vm2, %v228_v55  ;;  %v229_v58 = vmax.f32 %v193_v56, 0.0 }
  0xf4   :  { %248 = vst.msk [vmem:[#allocation2 + $0x58] sm:$0xff] %vm236_vm2, %v231_v57  ;;  %v258_v59 = vpack.c.bf16 %v231_v57, %v230_v52 }
  0xf5   :  { %246 = vst.msk [vmem:[#allocation2 + $0x48] sm:$0xff] %vm236_vm2, %v229_v58  ;;  %v257_v60 = vpack.c.bf16 %v229_v58, %v228_v55  ;;  %v4223_v61 = vpop.f32.mrb[12].mxu0 }
  0xf6   :  { %v214_v62 = vadd.f32 %v4223_v61, %v4861_v16  ;;  %v205_v63 = vpop.f32.mrb[13].mxu0  ;;  %v4011_v61 = vld [vmem:[%s5644_s4 + $0x2] ss:$0 sm:$0xff] }
  0xf7   :  { %v206_v0 = vadd.f32 %v4861_v16, %v205_v63  ;;  %v4224_v3 = vpop.f32.mrb[14].mxu0  ;;  %4235 = vmatprep.mubr.msk.bf16.mxu1 %vm236_vm2, %v257_v60 }
  0xf8   :  { %v234_v4 = vmax.f32 %v214_v62, 0.0  ;;  %v217_v5 = vadd.f32 %v4224_v3, %v4861_v16  ;;  %v208_v6 = vpop.f32.mrb[15].mxu0  ;;  %4236 = vmatmul.mubr.msk.bf16.gmra.mrb[8].mxu1 %vm236_vm2, %v258_v59 }
  0xf9   :  { %v232_v7 = vmax.f32 %v206_v0, 0.0  ;;  %v209_v8 = vadd.f32 %v4861_v16, %v208_v6  ;;  %v4485_v16 = vld [vmem:[%s5645_s1] sm:$0x3f]  }
  0xfa   :  { %251 = vst.msk [vmem:[#allocation2 + $0x70] sm:$0xff] %vm236_vm2, %v234_v4  ;;  %v235_v9 = vmax.f32 %v217_v5, 0.0 }
  0xfb   :  { %249 = vst.msk [vmem:[#allocation2 + $0x60] sm:$0xff] %vm236_vm2, %v232_v7  ;;  %v233_v10 = vmax.f32 %v209_v8, 0.0 }
  0xfc   :  { %252 = vst.msk [vmem:[#allocation2 + $0x78] sm:$0xff] %vm236_vm2, %v235_v9  ;;  %v260_v11 = vpack.c.bf16 %v235_v9, %v234_v4 }
  0xfd   :  { %250 = vst.msk [vmem:[#allocation2 + $0x68] sm:$0xff] %vm236_vm2, %v233_v10  ;;  %v259_v14 = vpack.c.bf16 %v233_v10, %v232_v7 }
  0xff   :  { %4239 = vmatprep.mubr.msk.bf16.mxu1 %vm236_vm2, %v259_v14 }
 0x100   :  { %4240 = vmatmul.mubr.msk.bf16.gmra.mrb[12].mxu1 %vm236_vm2, %v260_v11 }
 0x101   :  { %4247 = vmatprep.mubr.msk.bf16.mxu1 %vm4743_vm1, %v4742_v15 }
 0x108   :  { %4248 = vmatmul.mubr.msk.bf16.vlgmr.msra.gmra.mrb[16].mxu1 %vm98_vm0, %v4485_v16 }
 0x1bb   :  { %v4229_v19 = vpop.f32.mrb[0].mxu1 }
 0x1bc   :  { %392 = vst.msk [vmem:[#allocation3 + $0x10] sm:$0xff] %vm98_vm0, %v4229_v19  ;;  %426 = vrot.lane.b32.xlu1 %v4229_v19, %s4744_s9  ;;  %v327_v20 = vpop.f32.mrb[1].mxu1 }
 0x1bd   :  { %390 = vst.msk [vmem:[#allocation3] sm:$0xff] %vm98_vm0, %v327_v20  ;;  %422 = vrot.lane.b32.xlu0 %v327_v20, %s4744_s9  ;;  %v4230_v21 = vpop.f32.mrb[2].mxu1 }
 0x1be   :  { %393 = vst.msk [vmem:[#allocation3 + $0x18] sm:$0xff] %vm98_vm0, %v4230_v21  ;;  %v330_v22 = vpop.f32.mrb[3].mxu1 }
 0x1bf   :  { %391 = vst.msk [vmem:[#allocation3 + $0x8] sm:$0xff] %vm98_vm0, %v330_v22 }
 0x1c0   :  { %428 = vrot.lane.b32.xlu1 %v4230_v21, %s4744_s9 }
 0x1c1   :  { %424 = vrot.lane.b32.xlu0 %v330_v22, %s4744_s9 }
 0x1c3   :  { %v4233_v23 = vpop.f32.mrb[4].mxu1 }
 0x1c4   :  { %396 = vst.msk [vmem:[#allocation3 + $0x30] sm:$0xff] %vm98_vm0, %v4233_v23  ;;  %v343_v24 = vpop.f32.mrb[5].mxu1 }
 0x1c5   :  { %394 = vst.msk [vmem:[#allocation3 + $0x20] sm:$0xff] %vm98_vm0, %v343_v24  ;;  %434 = vrot.lane.b32.xlu0 %v4233_v23, %s4744_s9  ;;  %v4234_v25 = vpop.f32.mrb[6].mxu1 }
 0x1c6   :  { %397 = vst.msk [vmem:[#allocation3 + $0x38] sm:$0xff] %vm98_vm0, %v4234_v25  ;;  %436 = vrot.lane.b32.xlu1 %v4234_v25, %s4744_s9  ;;  %v346_v26 = vpop.f32.mrb[7].mxu1 }
 0x1c7   :  { %395 = vst.msk [vmem:[#allocation3 + $0x28] sm:$0xff] %vm98_vm0, %v346_v26 }
 0x1c9   :  { %430 = vrot.lane.b32.xlu0 %v343_v24, %s4744_s9 }
 0x1ca   :  { %432 = vrot.lane.b32.xlu1 %v346_v26, %s4744_s9 }
 0x1cb   :  { %v4237_v27 = vpop.f32.mrb[8].mxu1 }
 0x1cc   :  { %400 = vst.msk [vmem:[#allocation3 + $0x50] sm:$0xff] %vm98_vm0, %v4237_v27  ;;  %v359_v28 = vpop.f32.mrb[9].mxu1 }
 0x1cd   :  { %398 = vst.msk [vmem:[#allocation3 + $0x40] sm:$0xff] %vm98_vm0, %v359_v28  ;;  %442 = vrot.lane.b32.xlu0 %v4237_v27, %s4744_s9  ;;  %v4238_v29 = vpop.f32.mrb[10].mxu1 }
 0x1ce   :  { %401 = vst.msk [vmem:[#allocation3 + $0x58] sm:$0xff] %vm98_vm0, %v4238_v29  ;;  %444 = vrot.lane.b32.xlu1 %v4238_v29, %s4744_s9  ;;  %v362_v30 = vpop.f32.mrb[11].mxu1 }
 0x1cf   :  { %399 = vst.msk [vmem:[#allocation3 + $0x48] sm:$0xff] %vm98_vm0, %v362_v30 }
 0x1d1   :  { %438 = vrot.lane.b32.xlu0 %v359_v28, %s4744_s9 }
 0x1d2   :  { %440 = vrot.lane.b32.xlu1 %v362_v30, %s4744_s9 }
 0x1d3   :  { %v4241_v31 = vpop.f32.mrb[12].mxu1 }
 0x1d4   :  { %404 = vst.msk [vmem:[#allocation3 + $0x70] sm:$0xff] %vm98_vm0, %v4241_v31  ;;  %v375_v32 = vpop.f32.mrb[13].mxu1 }
 0x1d5   :  { %402 = vst.msk [vmem:[#allocation3 + $0x60] sm:$0xff] %vm98_vm0, %v375_v32  ;;  %446 = vrot.lane.b32.xlu0 %v375_v32, %s4744_s9  ;;  %v4242_v33 = vpop.f32.mrb[14].mxu1 }
 0x1d6   :  { %405 = vst.msk [vmem:[#allocation3 + $0x78] sm:$0xff] %vm98_vm0, %v4242_v33  ;;  %v378_v34 = vpop.f32.mrb[15].mxu1 }
 0x1d7   :  { %403 = vst.msk [vmem:[#allocation3 + $0x68] sm:$0xff] %vm98_vm0, %v378_v34  ;;  %448 = vrot.lane.b32.xlu1 %v378_v34, %s4744_s9 }
 0x1d9   :  { %450 = vrot.lane.b32.xlu0 %v4241_v31, %s4744_s9 }
 0x1db   :  { %452 = vrot.lane.b32.xlu1 %v4242_v33, %s4744_s9  ;;  %v551_v36 = vpop.f32.mrb[16].mxu1 }
 0x1dc   :  { %v552_v37 = vadd.f32 %v4006_v35, %v551_v36  ;;  %v4249_v38 = vpop.f32.mrb[17].mxu1 }
 0x1dd   :  { %v554_v39 = vpop.f32.mrb[18].mxu1 }
 0x1de   :  { %v555_v40 = vadd.f32 %v4006_v35, %v554_v39  ;;  %v4250_v41 = vpop.f32.mrb[19].mxu1  ;;  %v558_v42 = vmax.f32 %v552_v37, 0.0 }
 0x1e0   :  { %v559_v43 = vmax.f32 %v555_v40, 0.0 }
 0x1e2   :  { %v560_v44 = vpack.c.bf16 %v559_v43, %v558_v42 }
 0x1e4   :  { %4256 = vmatmul.mubr.msk.bf16.vlgmr.msra.gmra.mrb[16].mxu0 %vm98_vm0, %v560_v44 }
 0x22e   :  { %v427_v45 = vpop.permute.xlu1 %426 }
 0x22f   :  { %472 = vst.msk [vmem:[#allocation4 + $0x10] sm:$0xff] %vm236_vm2, %v427_v45  ;;  %v423_v46 = vpop.permute.xlu0 %422 }
 0x230   :  { %470 = vst.msk [vmem:[#allocation4] sm:$0xff] %vm236_vm2, %v423_v46 }
 0x232   :  { %v429_v47 = vpop.permute.xlu1 %428 }
 0x233   :  { %473 = vst.msk [vmem:[#allocation4 + $0x18] sm:$0xff] %vm236_vm2, %v429_v47  ;;  %v425_v48 = vpop.permute.xlu0 %424 }
 0x234   :  { %471 = vst.msk [vmem:[#allocation4 + $0x8] sm:$0xff] %vm236_vm2, %v425_v48 }
 0x237   :  { %v435_v49 = vpop.permute.xlu0 %434 }
 0x238   :  { %476 = vst.msk [vmem:[#allocation4 + $0x30] sm:$0xff] %vm236_vm2, %v435_v49  ;;  %v437_v50 = vpop.permute.xlu1 %436 }
 0x239   :  { %477 = vst.msk [vmem:[#allocation4 + $0x38] sm:$0xff] %vm236_vm2, %v437_v50 }
 0x23b   :  { %v431_v51 = vpop.permute.xlu0 %430 }
 0x23c   :  { %474 = vst.msk [vmem:[#allocation4 + $0x20] sm:$0xff] %vm236_vm2, %v431_v51  ;;  %v433_v52 = vpop.permute.xlu1 %432 }
 0x23d   :  { %475 = vst.msk [vmem:[#allocation4 + $0x28] sm:$0xff] %vm236_vm2, %v433_v52 }
 0x23f   :  { %v443_v53 = vpop.permute.xlu0 %442 }
 0x240   :  { %480 = vst.msk [vmem:[#allocation4 + $0x50] sm:$0xff] %vm236_vm2, %v443_v53  ;;  %v445_v54 = vpop.permute.xlu1 %444 }
 0x241   :  { %481 = vst.msk [vmem:[#allocation4 + $0x58] sm:$0xff] %vm236_vm2, %v445_v54 }
 0x243   :  { %v439_v55 = vpop.permute.xlu0 %438 }
 0x244   :  { %478 = vst.msk [vmem:[#allocation4 + $0x40] sm:$0xff] %vm236_vm2, %v439_v55  ;;  %v441_v56 = vpop.permute.xlu1 %440 }
 0x245   :  { %479 = vst.msk [vmem:[#allocation4 + $0x48] sm:$0xff] %vm236_vm2, %v441_v56 }
 0x247   :  { %v447_v57 = vpop.permute.xlu0 %446 }
 0x248   :  { %482 = vst.msk [vmem:[#allocation4 + $0x60] sm:$0xff] %vm236_vm2, %v447_v57 }
 0x249   :  { %v449_v58 = vpop.permute.xlu1 %448 }
 0x24a   :  { %483 = vst.msk [vmem:[#allocation4 + $0x68] sm:$0xff] %vm236_vm2, %v449_v58 }
 0x24b   :  { %v451_v59 = vpop.permute.xlu0 %450 }
 0x24c   :  { %484 = vst.msk [vmem:[#allocation4 + $0x70] sm:$0xff] %vm236_vm2, %v451_v59 }
 0x24d   :  { %v453_v60 = vpop.permute.xlu1 %452 }
 0x24e   :  { %485 = vst.msk [vmem:[#allocation4 + $0x78] sm:$0xff] %vm236_vm2, %v453_v60 }
 0x2b7   :  { %v619_v62 = vpop.f32.mrb[16].mxu0 }
 0x2b8   :  { %v4978_v63 = vadd.f32 %v4011_v61, %v619_v62  ;;  %v4257_v0 = vpop.f32.mrb[17].mxu0 }
 0x2b9   :  { %v622_v3 = vpop.f32.mrb[18].mxu0 }
 0x2ba   :  { %v626_v4 = vmax.f32 %v4978_v63, 0.0  ;;  %628 = vst.msk [vmem:[#allocation5] sm:$0xff] %vm98_vm0, %v4978_v63  ;;  %v4983_v5 = vadd.f32 %v4011_v61, %v622_v3  ;;  %v4258_v6 = vpop.f32.mrb[19].mxu0 }
 0x2bc   :  { %v627_v7 = vmax.f32 %v4983_v5, 0.0  ;;  %630 = vst.msk [vmem:[#allocation5 + $0x8] sm:$0xf] %vm629_vm3, %v4983_v5 }
 0x2bd LB: > { %v643_v8 = vld [vmem:[#allocation3 + $0x10] sm:$0xff]  ;;  %v641_v9 = vld [vmem:[#allocation3] sm:$0xff]  ;;  %v644_v10 = vld [vmem:[#allocation3 + $0x18] sm:$0xff]  ;;  %s649_s14 = scalar_lea.vmem [#allocation5], %s4728_s13  ;;  %v4745_v52 = vmov 0   ;;  %vm719_vm4 = vcmask 7168   ;;  %s4728_s13 = sphi %s4988_s13, %s640_s13  }
 0x2be   : > { %v642_v11 = vld [vmem:[#allocation3 + $0x8] sm:$0xff]  ;;  %v645_v16 = vld [vmem:[#allocation3 + $0x20] sm:$0xff]  ;;  %v648_v22 = vld [vmem:[#allocation3 + $0x38] sm:$0xff]  ;;  %4489 = vset.pattern.permute.xlu1 %v4745_v52  ;;  %4488 = vset.pattern.permute.xlu0 %v4745_v52  ;;  %vm873_vm5 = vcmask 122880   ;;  %s872_s15 = scalar_lea.vmem [#allocation8], %s4728_s13  ;;  %s640_s13 = sadd.s32 1, %s4728_s13  }
 0x2bf   : > { %v646_v14 = vld [vmem:[#allocation3 + $0x28] sm:$0xff]  ;;  %v647_v23 = vld [vmem:[#allocation3 + $0x30] sm:$0xff]  ;;  %p637_p0 = scmp.ge.s32.totalorder %s640_s13, 6  }
 0x2c0   :  { %s5047_s16 = smov (%p637_p0), 0  }
 0x2c3   : > { %v4015_v17 = vld [vmem:[%s649_s14] ss:$0 sm:$0xff] }
 0x2c4   : > { %v657_v18 = vadd.f32 %v4015_v17, %v643_v8  ;;  %v655_v19 = vadd.f32 %v4015_v17, %v641_v9  ;;  %v658_v20 = vadd.f32 %v4015_v17, %v644_v10  ;;  %v656_v21 = vadd.f32 %v4015_v17, %v642_v11 }
 0x2c5   : > { %v660_v24 = vadd.f32 %v4015_v17, %v646_v14  ;;  %v659_v25 = vadd.f32 %v4015_v17, %v645_v16  ;;  %v662_v32 = vadd.f32 %v4015_v17, %v648_v22  ;;  %v661_v33 = vadd.f32 %v4015_v17, %v647_v23 }
 0x2c6   : > { %v665_v26 = vmax.f32 %v657_v18, 0.0  ;;  %v663_v27 = vmax.f32 %v655_v19, 0.0  ;;  %v666_v28 = vmax.f32 %v658_v20, 0.0  ;;  %v664_v29 = vmax.f32 %v656_v21, 0.0 }
 0x2c7   : > { %v668_v30 = vmax.f32 %v660_v24, 0.0  ;;  %v667_v31 = vmax.f32 %v659_v25, 0.0  ;;  %v670_v40 = vmax.f32 %v662_v32, 0.0  ;;  %v669_v41 = vmax.f32 %v661_v33, 0.0 }
 0x2c8   : > { %v677_v34 = vmul.f32 %v4844_v12, %v665_v26  ;;  %v675_v35 = vmul.f32 %v4844_v12, %v663_v27  ;;  %v678_v36 = vmul.f32 %v4844_v12, %v666_v28  ;;  %v676_v37 = vmul.f32 %v4844_v12, %v664_v29 }
 0x2c9   : > { %v680_v44 = vmul.f32 %v4844_v12, %v668_v30  ;;  %v679_v45 = vmul.f32 %v4844_v12, %v667_v31  ;;  %v682_v48 = vmul.f32 %v4844_v12, %v670_v40  ;;  %v681_v49 = vmul.f32 %v4844_v12, %v669_v41 }
 0x2ca   : > { %v689_v38 = vsel %vm98_vm0, %v677_v34, 0.0  ;;  %v683_v39 = vsel %vm98_vm0, %v675_v35, 0.0  ;;  %v692_v42 = vsel %vm98_vm0, %v678_v36, 0.0  ;;  %v686_v43 = vsel %vm98_vm0, %v676_v37, 0.0 }
 0x2cb   : > { %690 = vadd.xlane.f32.xlu1 %v689_v38  ;;  %684 = vadd.xlane.f32.xlu0 %v683_v39  ;;  %v698_v46 = vsel %vm98_vm0, %v680_v44, 0.0  ;;  %v695_v47 = vsel %vm98_vm0, %v679_v45, 0.0  ;;  %v704_v50 = vsel %vm98_vm0, %v682_v48, 0.0  ;;  %v701_v51 = vsel %vm98_vm0, %v681_v49, 0.0 }
 0x2cf   : > { %693 = vadd.xlane.f32.xlu1 %v692_v42  ;;  %687 = vadd.xlane.f32.xlu0 %v686_v43 }
 0x2d3   : > { %699 = vadd.xlane.f32.xlu1 %v698_v46  ;;  %696 = vadd.xlane.f32.xlu0 %v695_v47 }
 0x2d7   : > { %705 = vadd.xlane.f32.xlu1 %v704_v50  ;;  %702 = vadd.xlane.f32.xlu0 %v701_v51 }
 0x358   : > { %v691_v53 = vpop.xlane.xlu1 %690  ;;  %v685_v54 = vpop.xlane.xlu0 %684 }
 0x359   : > { %v711_v59 = vadd.f32 %v4849_v13, %v685_v54  ;;  %v713_v0 = vadd.f32 %v4849_v13, %v691_v53 }
 0x35b   : > { %v720_v11 = vsel %vm719_vm4, %v711_v59, -inf  ;;  %v722_v20 = vsel %vm719_vm4, %v713_v0, -inf }
 0x35c   : > { %v694_v55 = vpop.xlane.xlu1 %693  ;;  %v688_v56 = vpop.xlane.xlu0 %687 }
 0x35d   : > { %v712_v60 = vadd.f32 %v4849_v13, %v688_v56  ;;  %v714_v3 = vadd.f32 %v4849_v13, %v694_v55 }
 0x35f   : > { %v721_v14 = vsel %vm719_vm4, %v712_v60, -inf  ;;  %v723_v21 = vsel %vm719_vm4, %v714_v3, -inf }
 0x360   : > { %v700_v57 = vpop.xlane.xlu1 %699  ;;  %v697_v58 = vpop.xlane.xlu0 %696 }
 0x361   : > { %v716_v61 = vadd.f32 %v4849_v13, %v700_v57  ;;  %v715_v62 = vadd.f32 %v4849_v13, %v697_v58 }
 0x363   : > { %v726_v6 = vsel %vm719_vm4, %v716_v61, -inf  ;;  %v724_v8 = vsel %vm719_vm4, %v715_v62, -inf }
 0x364   : > { %v706_v9 = vpop.xlane.xlu1 %705  ;;  %v703_v10 = vpop.xlane.xlu0 %702  ;;  %v727_v18 = vmax.f32 %v721_v14, %v726_v6  ;;  %v725_v19 = vmax.f32 %v720_v11, %v724_v8 }
 0x365   : > { %v718_v16 = vadd.f32 %v4849_v13, %v706_v9  ;;  %v717_v17 = vadd.f32 %v4849_v13, %v703_v10 }
 0x366   : > { %v732_v26 = vmax.f32 %v725_v19, %v727_v18 }
 0x367   : > { %v730_v22 = vsel %vm719_vm4, %v718_v16, -inf  ;;  %v728_v23 = vsel %vm719_vm4, %v717_v17, -inf }
 0x368   : > { %v731_v24 = vmax.f32 %v723_v21, %v730_v22  ;;  %v729_v25 = vmax.f32 %v722_v20, %v728_v23 }
 0x36a   : > { %v733_v27 = vmax.f32 %v729_v25, %v731_v24 }
 0x36c   : > { %v734_v28 = vmax.f32 %v732_v26, %v733_v27 }
 0x36e   : > { %v735_v29 = vrot.slane %v734_v28, 4 }
 0x370   : > { %v736_v30 = vmax.f32 %v734_v28, %v735_v29 }
 0x372   : > { %v737_v31 = vrot.slane %v736_v30, 2 }
 0x374   : > { %v738_v32 = vmax.f32 %v736_v30, %v737_v31 }
 0x376   : > { %v739_v33 = vrot.slane %v738_v32, 1 }
 0x378   : > { %v740_v34 = vmax.f32 %v738_v32, %v739_v33 }
 0x37a   : > { %v741_v35 = vsub.f32 %v711_v59, %v740_v34  ;;  %v742_v36 = vsub.f32 %v712_v60, %v740_v34  ;;  %v743_v37 = vsub.f32 %v713_v0, %v740_v34  ;;  %v744_v38 = vsub.f32 %v714_v3, %v740_v34 }
 0x37b   : > { %v745_v40 = vsub.f32 %v715_v62, %v740_v34  ;;  %v746_v43 = vsub.f32 %v716_v61, %v740_v34  ;;  %v747_v45 = vsub.f32 %v717_v17, %v740_v34  ;;  %v748_v47 = vsub.f32 %v718_v16, %v740_v34 }
 0x37c   : > { %v749_v39 = vmul.f32 1.442695, %v741_v35  ;;  %v751_v41 = vmul.f32 1.442695, %v742_v36  ;;  %v753_v42 = vmul.f32 1.442695, %v743_v37 }
 0x37d   : > { %v755_v44 = vmul.f32 1.442695, %v744_v38  ;;  %v757_v46 = vmul.f32 1.442695, %v745_v40  ;;  %v759_v48 = vmul.f32 1.442695, %v746_v43 }
 0x37e   : > { %4490 = vpow2.f32 %v749_v39  ;;  %v761_v49 = vmul.f32 1.442695, %v747_v45  ;;  %v763_v50 = vmul.f32 1.442695, %v748_v47  ;;  %v796_v36 = vld [vmem:[#allocation2 + $0x8] sm:$0xff]  ;;  %v795_v37 = vld [vmem:[#allocation2] sm:$0xff] }
 0x37f   : > { %4492 = vpow2.f32 %v751_v41  ;;  %v797_v39 = vld [vmem:[#allocation2 + $0x10] sm:$0xff]  ;;  %v798_v43 = vld [vmem:[#allocation2 + $0x18] sm:$0xff]  ;;  %v799_v45 = vld [vmem:[#allocation2 + $0x20] sm:$0xff] }
 0x380   : > { %4494 = vpow2.f32 %v753_v42 }
 0x381   : > { %4496 = vpow2.f32 %v755_v44 }
 0x382   : > { %4498 = vpow2.f32 %v757_v46 }
 0x383   : > { %4500 = vpow2.f32 %v759_v48 }
 0x384   : > { %4502 = vpow2.f32 %v761_v49 }
 0x385   : > { %4504 = vpow2.f32 %v763_v50  ;;  %v800_v50 = vld [vmem:[#allocation2 + $0x28] sm:$0xff] }
 0x388   : > { %v4491_v51 = vpop.eup %4490 }
 0x389   : > { %v4493_v52 = vpop.eup %4492  ;;  %v765_v53 = vsel %vm719_vm4, %v4491_v51, 0.0 }
 0x38a   : > { %v4495_v54 = vpop.eup %4494  ;;  %v766_v55 = vsel %vm719_vm4, %v4493_v52, 0.0 }
 0x38b   : > { %v4497_v56 = vpop.eup %4496  ;;  %v767_v57 = vadd.f32 %v766_v55, %v765_v53  ;;  %v768_v58 = vsel %vm719_vm4, %v4495_v54, 0.0 }
 0x38c   : > { %v4499_v59 = vpop.eup %4498  ;;  %v770_v61 = vsel %vm719_vm4, %v4497_v56, 0.0 }
 0x38d   : > { %v769_v60 = vadd.f32 %v768_v58, %v767_v57  ;;  %v4501_v62 = vpop.eup %4500  ;;  %v772_v3 = vsel %vm719_vm4, %v4499_v59, 0.0  ;;  %v801_v58 = vld [vmem:[#allocation2 + $0x30] sm:$0xff] }
 0x38e   : > { %v4503_v6 = vpop.eup %4502  ;;  %v774_v9 = vsel %vm719_vm4, %v4501_v62, 0.0 }
 0x38f   : > { %v771_v0 = vadd.f32 %v770_v61, %v769_v60  ;;  %v4505_v10 = vpop.eup %4504  ;;  %v776_v14 = vsel %vm719_vm4, %v4503_v6, 0.0 }
 0x390   : > { %v778_v17 = vsel %vm719_vm4, %v4505_v10, 0.0 }
 0x391   : > { %v773_v8 = vadd.f32 %v772_v3, %v771_v0 }
 0x393   : > { %v775_v11 = vadd.f32 %v774_v9, %v773_v8 }
 0x395   : > { %v777_v16 = vadd.f32 %v776_v14, %v775_v11 }
 0x397   : > { %v779_v18 = vadd.f32 %v778_v17, %v777_v16 }
 0x399   : > { %v780_v19 = vrot.slane %v779_v18, 4 }
 0x39b   : > { %v781_v20 = vadd.f32 %v780_v19, %v779_v18 }
 0x39d   : > { %v782_v21 = vrot.slane %v781_v20, 2 }
 0x39f   : > { %v783_v22 = vadd.f32 %v782_v21, %v781_v20 }
 0x3a1   : > { %v784_v23 = vrot.slane %v783_v22, 1 }
 0x3a3   : > { %v785_v24 = vadd.f32 %v784_v23, %v783_v22 }
 0x3a5   : > { %4506 = vrcp.f32 %v785_v24 }
 0x3af   : > { %v4507_v25 = vpop.eup %4506 }
 0x3b0   : > { %v788_v26 = vmul.f32 %v4507_v25, %v4493_v52  ;;  %v787_v27 = vmul.f32 %v4507_v25, %v4491_v51  ;;  %v789_v28 = vmul.f32 %v4507_v25, %v4495_v54  ;;  %v790_v29 = vmul.f32 %v4507_v25, %v4497_v56 }
 0x3b1   : > { %v791_v30 = vmul.f32 %v4507_v25, %v4499_v59  ;;  %v792_v31 = vmul.f32 %v4507_v25, %v4501_v62  ;;  %v793_v32 = vmul.f32 %v4507_v25, %v4503_v6  ;;  %v794_v33 = vmul.f32 %v4507_v25, %v4505_v10  ;;  %v802_v6 = vld [vmem:[#allocation2 + $0x38] sm:$0xff] }
 0x3b2   : > { %810 = vperm.xlu1 %4489, %v788_v26   ;;  %805 = vperm.xlu0 %4488, %v787_v27  }
 0x3b6   : > { %815 = vperm.xlu1 %4489, %v789_v28  }
 0x3ba   : > { %820 = vperm.xlu1 %4489, %v790_v29  }
 0x3be   : > { %825 = vperm.xlu1 %4489, %v791_v30  }
 0x3c2   : > { %830 = vperm.xlu1 %4489, %v792_v31  }
 0x3c6   : > { %835 = vperm.xlu1 %4489, %v793_v32  }
 0x3ca   : > { %840 = vperm.xlu1 %4489, %v794_v33  }
 0x431   : > { %v811_v34 = vpop.permute.xlu1 %810  ;;  %v806_v38 = vpop.permute.xlu0 %805 }
 0x432   : > { %v844_v41 = vmul.f32 %v811_v34, %v796_v36  ;;  %v843_v42 = vmul.f32 %v806_v38, %v795_v37 }
 0x434   : > { %v852_v47 = vsel %vm236_vm2, %v844_v41, 0.0  ;;  %v851_v48 = vsel %vm236_vm2, %v843_v42, 0.0 }
 0x435   : > { %v816_v35 = vpop.permute.xlu1 %815  ;;  %v853_v53 = vadd.f32 %v852_v47, %v851_v48 }
 0x436   : > { %v845_v44 = vmul.f32 %v816_v35, %v797_v39 }
 0x438   : > { %v854_v51 = vsel %vm236_vm2, %v845_v44, 0.0 }
 0x439   : > { %v821_v40 = vpop.permute.xlu1 %820  ;;  %v855_v57 = vadd.f32 %v854_v51, %v853_v53 }
 0x43a   : > { %v846_v49 = vmul.f32 %v821_v40, %v798_v43 }
 0x43c   : > { %v856_v55 = vsel %vm236_vm2, %v846_v49, 0.0 }
 0x43d   : > { %v826_v46 = vpop.permute.xlu1 %825  ;;  %v857_v60 = vadd.f32 %v856_v55, %v855_v57 }
 0x43e   : > { %v847_v52 = vmul.f32 %v826_v46, %v799_v45 }
 0x440   : > { %v858_v59 = vsel %vm236_vm2, %v847_v52, 0.0 }
 0x441   : > { %v831_v54 = vpop.permute.xlu1 %830  ;;  %v859_v3 = vadd.f32 %v858_v59, %v857_v60 }
 0x442   : > { %v848_v56 = vmul.f32 %v831_v54, %v800_v50 }
 0x444   : > { %v860_v62 = vsel %vm236_vm2, %v848_v56, 0.0 }
 0x445   : > { %v836_v61 = vpop.permute.xlu1 %835  ;;  %v861_v9 = vadd.f32 %v860_v62, %v859_v3 }
 0x446   : > { %v849_v0 = vmul.f32 %v836_v61, %v801_v58 }
 0x448   : > { %v862_v8 = vsel %vm236_vm2, %v849_v0, 0.0 }
 0x449   : > { %v841_v10 = vpop.permute.xlu1 %840  ;;  %v863_v14 = vadd.f32 %v862_v8, %v861_v9 }
 0x44a   : > { %v850_v11 = vmul.f32 %v841_v10, %v802_v6 }
 0x44c   : > { %v864_v16 = vsel %vm236_vm2, %v850_v11, 0.0 }
 0x44d   : > { %v865_v17 = vadd.f32 %v864_v16, %v863_v14 }
 0x44f   : > { %v866_v18 = vrot.slane %v865_v17, 4 }
 0x451   : > { %v867_v19 = vadd.f32 %v866_v18, %v865_v17 }
 0x453   : > { %v868_v20 = vrot.slane %v867_v19, 2 }
 0x455   : > { %v869_v21 = vadd.f32 %v868_v20, %v867_v19  ;;  %639 = sbr.rel (!%p637_p0) target bundleno = 701 (0x2bd), region = 79 }
 0x457   : > { %v870_v22 = vrot.slane %v869_v21, 1 }
 0x459   : > { %v871_v23 = vadd.f32 %v870_v22, %v869_v21 }
 0x45b   : > { %874 = vst.msk [vmem:[%s872_s15] sm:$0x1] %vm873_vm5, %v871_v23 }
 0x45c LB: > { %v884_v24 = vld [vmem:[#allocation3 + $0x50] sm:$0xff]  ;;  %v882_v25 = vld [vmem:[#allocation3 + $0x40] sm:$0xff]  ;;  %v885_v26 = vld [vmem:[#allocation3 + $0x58] sm:$0xff]  ;;  %s3945_s17 = scalar_lea.vmem [#allocation5], %s4732_s16  ;;  %v4746_v6 = vmov 0   ;;  %s3947_s18 = scalar_lea.vmem [#allocation8], %s4732_s16  ;;  %s4732_s16 = sphi %s5047_s16, %s880_s16  }
 0x45d   : > { %v883_v27 = vld [vmem:[#allocation3 + $0x48] sm:$0xff]  ;;  %v886_v29 = vld [vmem:[#allocation3 + $0x60] sm:$0xff]  ;;  %v889_v35 = vld [vmem:[#allocation3 + $0x78] sm:$0xff]  ;;  %4509 = vset.pattern.permute.xlu1 %v4746_v6  ;;  %4508 = vset.pattern.permute.xlu0 %v4746_v6  ;;  %s880_s16 = sadd.s32 1, %s4732_s16  }
 0x45e   : > { %v887_v28 = vld [vmem:[#allocation3 + $0x68] sm:$0xff]  ;;  %v4017_v30 = vld [vmem:[%s3945_s17 + $0x6] ss:$0 sm:$0xff]  ;;  %v888_v36 = vld [vmem:[#allocation3 + $0x70] sm:$0xff]  ;;  %p877_p1 = scmp.ge.s32.totalorder %s880_s16, 6  }
 0x45f   : > { %v898_v31 = vadd.f32 %v4017_v30, %v884_v24  ;;  %v896_v32 = vadd.f32 %v4017_v30, %v882_v25  ;;  %v899_v33 = vadd.f32 %v4017_v30, %v885_v26  ;;  %v897_v34 = vadd.f32 %v4017_v30, %v883_v27  ;;  %4259 = vmatprep.subr.bf16.mxu1 (%p877_p1), %v4742_v15  ;;  %s4747_s0 = smov (%p877_p1), 32   ;;  %s4748_s29 = smov (%p877_p1), 88  }
 0x460   : > { %v901_v37 = vadd.f32 %v4017_v30, %v887_v28  ;;  %v900_v38 = vadd.f32 %v4017_v30, %v886_v29  ;;  %v903_v45 = vadd.f32 %v4017_v30, %v889_v35  ;;  %v902_v46 = vadd.f32 %v4017_v30, %v888_v36  ;;  %4261 = vmatprep.mubr.msk.bf16.mxu1 (%p877_p1), %vm4743_vm1, %v4742_v15  ;;  %s4749_s30 = smov (%p877_p1), 80   ;;  %s4750_s6 = smov (%p877_p1), 120  }
 0x461   : > { %v906_v39 = vmax.f32 %v898_v31, 0.0  ;;  %v904_v40 = vmax.f32 %v896_v32, 0.0  ;;  %v907_v41 = vmax.f32 %v899_v33, 0.0  ;;  %v905_v42 = vmax.f32 %v897_v34, 0.0  ;;  %4265 = vmatprep.subr.bf16.mxu0 (%p877_p1), %v4742_v15  ;;  %4269 = vmatprep.mubr.msk.bf16.mxu0 (%p877_p1), %vm4743_vm1, %v4742_v15  ;;  %s4751_s7 = smov (%p877_p1), 72   ;;  %s4752_s8 = smov (%p877_p1), 112  }
 0x462   : > { %v909_v43 = vmax.f32 %v901_v37, 0.0  ;;  %v908_v44 = vmax.f32 %v900_v38, 0.0  ;;  %v911_v53 = vmax.f32 %v903_v45, 0.0  ;;  %v910_v54 = vmax.f32 %v902_v46, 0.0  ;;  %s4753_s1 = smov (%p877_p1), 104   ;;  %s4754_s10 = smov (%p877_p1), 64  }
 0x463   : > { %v918_v47 = vmul.f32 %v4844_v12, %v906_v39  ;;  %v916_v48 = vmul.f32 %v4844_v12, %v904_v40  ;;  %v919_v49 = vmul.f32 %v4844_v12, %v907_v41  ;;  %v917_v50 = vmul.f32 %v4844_v12, %v905_v42  ;;  %s4756_s15 = smov (%p877_p1), 56   ;;  %s4757_s16 = smov (%p877_p1), 40  }
 0x464   : > { %v921_v57 = vmul.f32 %v4844_v12, %v909_v43  ;;  %v920_v58 = vmul.f32 %v4844_v12, %v908_v44  ;;  %v923_v61 = vmul.f32 %v4844_v12, %v911_v53  ;;  %v922_v62 = vmul.f32 %v4844_v12, %v910_v54  ;;  %s4758_s17 = smov (%p877_p1), 8   ;;  %s4760_s19 = smov (%p877_p1), 24  }
 0x465   : > { %v930_v51 = vsel %vm98_vm0, %v918_v47, 0.0  ;;  %v924_v52 = vsel %vm98_vm0, %v916_v48, 0.0  ;;  %v933_v55 = vsel %vm98_vm0, %v919_v49, 0.0  ;;  %v927_v56 = vsel %vm98_vm0, %v917_v50, 0.0 }
 0x466   : > { %931 = vadd.xlane.f32.xlu1 %v930_v51  ;;  %925 = vadd.xlane.f32.xlu0 %v924_v52  ;;  %v939_v59 = vsel %vm98_vm0, %v921_v57, 0.0  ;;  %v936_v60 = vsel %vm98_vm0, %v920_v58, 0.0  ;;  %v945_v0 = vsel %vm98_vm0, %v923_v61, 0.0  ;;  %v942_v3 = vsel %vm98_vm0, %v922_v62, 0.0 }
 0x467   :  { %vm2012_vm14 = vcmask (%p877_p1), 1041408   ;;  %vm1319_vm15 = vcmask (%p877_p1), 64512  }
 0x46a   : > { %934 = vadd.xlane.f32.xlu1 %v933_v55  ;;  %928 = vadd.xlane.f32.xlu0 %v927_v56 }
 0x46e   : > { %940 = vadd.xlane.f32.xlu1 %v939_v59  ;;  %937 = vadd.xlane.f32.xlu0 %v936_v60 }
 0x472   : > { %946 = vadd.xlane.f32.xlu1 %v945_v0  ;;  %943 = vadd.xlane.f32.xlu0 %v942_v3 }
 0x4f3   : > { %v932_v8 = vpop.xlane.xlu1 %931  ;;  %v926_v9 = vpop.xlane.xlu0 %925 }
 0x4f4   : > { %v952_v17 = vadd.f32 %v4849_v13, %v926_v9  ;;  %v954_v21 = vadd.f32 %v4849_v13, %v932_v8 }
 0x4f6   : > { %v961_v27 = vsel %vm719_vm4, %v952_v17, -inf  ;;  %v963_v33 = vsel %vm719_vm4, %v954_v21, -inf }
 0x4f7   : > { %v935_v10 = vpop.xlane.xlu1 %934  ;;  %v929_v11 = vpop.xlane.xlu0 %928 }
 0x4f8   : > { %v953_v18 = vadd.f32 %v4849_v13, %v929_v11  ;;  %v955_v22 = vadd.f32 %v4849_v13, %v935_v10 }
 0x4fa   : > { %v962_v28 = vsel %vm719_vm4, %v953_v18, -inf  ;;  %v964_v34 = vsel %vm719_vm4, %v955_v22, -inf }
 0x4fb   : > { %v941_v14 = vpop.xlane.xlu1 %940  ;;  %v938_v16 = vpop.xlane.xlu0 %937 }
 0x4fc   : > { %v957_v19 = vadd.f32 %v4849_v13, %v941_v14  ;;  %v956_v20 = vadd.f32 %v4849_v13, %v938_v16 }
 0x4fe   : > { %v967_v23 = vsel %vm719_vm4, %v957_v19, -inf  ;;  %v965_v24 = vsel %vm719_vm4, %v956_v20, -inf }
 0x4ff   : > { %v947_v25 = vpop.xlane.xlu1 %946  ;;  %v944_v26 = vpop.xlane.xlu0 %943  ;;  %v968_v31 = vmax.f32 %v962_v28, %v967_v23  ;;  %v966_v32 = vmax.f32 %v961_v27, %v965_v24 }
 0x500   : > { %v959_v29 = vadd.f32 %v4849_v13, %v947_v25  ;;  %v958_v30 = vadd.f32 %v4849_v13, %v944_v26 }
 0x501   : > { %v973_v39 = vmax.f32 %v966_v32, %v968_v31 }
 0x502   : > { %v971_v35 = vsel %vm719_vm4, %v959_v29, -inf  ;;  %v969_v36 = vsel %vm719_vm4, %v958_v30, -inf }
 0x503   : > { %v972_v37 = vmax.f32 %v964_v34, %v971_v35  ;;  %v970_v38 = vmax.f32 %v963_v33, %v969_v36 }
 0x505   : > { %v974_v40 = vmax.f32 %v970_v38, %v972_v37 }
 0x507   : > { %v975_v41 = vmax.f32 %v973_v39, %v974_v40 }
 0x509   : > { %v976_v42 = vrot.slane %v975_v41, 4 }
 0x50b   : > { %v977_v43 = vmax.f32 %v975_v41, %v976_v42 }
 0x50d   : > { %v978_v44 = vrot.slane %v977_v43, 2 }
 0x50f   : > { %v979_v45 = vmax.f32 %v977_v43, %v978_v44 }
 0x511   : > { %v980_v46 = vrot.slane %v979_v45, 1 }
 0x513   : > { %v981_v47 = vmax.f32 %v979_v45, %v980_v46 }
 0x515   : > { %v982_v48 = vsub.f32 %v952_v17, %v981_v47  ;;  %v983_v49 = vsub.f32 %v953_v18, %v981_v47  ;;  %v984_v50 = vsub.f32 %v954_v21, %v981_v47  ;;  %v985_v51 = vsub.f32 %v955_v22, %v981_v47 }
 0x516   : > { %v986_v53 = vsub.f32 %v956_v20, %v981_v47  ;;  %v987_v56 = vsub.f32 %v957_v19, %v981_v47  ;;  %v988_v58 = vsub.f32 %v958_v30, %v981_v47  ;;  %v989_v60 = vsub.f32 %v959_v29, %v981_v47 }
 0x517   : > { %v990_v52 = vmul.f32 1.442695, %v982_v48  ;;  %v992_v54 = vmul.f32 1.442695, %v983_v49  ;;  %v994_v55 = vmul.f32 1.442695, %v984_v50 }
 0x518   : > { %v996_v57 = vmul.f32 1.442695, %v985_v51  ;;  %v998_v59 = vmul.f32 1.442695, %v986_v53  ;;  %v1000_v61 = vmul.f32 1.442695, %v987_v56 }
 0x519   : > { %4510 = vpow2.f32 %v990_v52  ;;  %v1002_v62 = vmul.f32 1.442695, %v988_v58  ;;  %v1004_v0 = vmul.f32 1.442695, %v989_v60  ;;  %v1037_v49 = vld [vmem:[#allocation2 + $0x48] sm:$0xff]  ;;  %v1036_v50 = vld [vmem:[#allocation2 + $0x40] sm:$0xff] }
 0x51a   : > { %4512 = vpow2.f32 %v992_v54  ;;  %v1038_v52 = vld [vmem:[#allocation2 + $0x50] sm:$0xff]  ;;  %v1039_v56 = vld [vmem:[#allocation2 + $0x58] sm:$0xff]  ;;  %v1040_v58 = vld [vmem:[#allocation2 + $0x60] sm:$0xff] }
 0x51b   : > { %4514 = vpow2.f32 %v994_v55 }
 0x51c   : > { %4516 = vpow2.f32 %v996_v57 }
 0x51d   : > { %4518 = vpow2.f32 %v998_v59 }
 0x51e   : > { %4520 = vpow2.f32 %v1000_v61 }
 0x51f   : > { %4522 = vpow2.f32 %v1002_v62 }
 0x520   : > { %4524 = vpow2.f32 %v1004_v0  ;;  %v1041_v0 = vld [vmem:[#allocation2 + $0x68] sm:$0xff] }
 0x523   : > { %v4511_v3 = vpop.eup %4510 }
 0x524   : > { %v4513_v6 = vpop.eup %4512  ;;  %v1006_v8 = vsel %vm719_vm4, %v4511_v3, 0.0 }
 0x525   : > { %v4515_v9 = vpop.eup %4514  ;;  %v1007_v10 = vsel %vm719_vm4, %v4513_v6, 0.0 }
 0x526   : > { %v4517_v11 = vpop.eup %4516  ;;  %v1008_v14 = vadd.f32 %v1007_v10, %v1006_v8  ;;  %v1009_v16 = vsel %vm719_vm4, %v4515_v9, 0.0 }
 0x527   : > { %v4519_v17 = vpop.eup %4518  ;;  %v1011_v19 = vsel %vm719_vm4, %v4517_v11, 0.0 }
 0x528   : > { %v1010_v18 = vadd.f32 %v1009_v16, %v1008_v14  ;;  %v4521_v20 = vpop.eup %4520  ;;  %v1013_v22 = vsel %vm719_vm4, %v4519_v17, 0.0  ;;  %v1042_v16 = vld [vmem:[#allocation2 + $0x70] sm:$0xff] }
 0x529   : > { %v4523_v23 = vpop.eup %4522  ;;  %v1015_v25 = vsel %vm719_vm4, %v4521_v20, 0.0 }
 0x52a   : > { %v1012_v21 = vadd.f32 %v1011_v19, %v1010_v18  ;;  %v4525_v26 = vpop.eup %4524  ;;  %v1017_v28 = vsel %vm719_vm4, %v4523_v23, 0.0 }
 0x52b   : > { %v1019_v30 = vsel %vm719_vm4, %v4525_v26, 0.0 }
 0x52c   : > { %v1014_v24 = vadd.f32 %v1013_v22, %v1012_v21 }
 0x52e   : > { %v1016_v27 = vadd.f32 %v1015_v25, %v1014_v24 }
 0x530   : > { %v1018_v29 = vadd.f32 %v1017_v28, %v1016_v27 }
 0x532   : > { %v1020_v31 = vadd.f32 %v1019_v30, %v1018_v29 }
 0x534   : > { %v1021_v32 = vrot.slane %v1020_v31, 4 }
 0x536   : > { %v1022_v33 = vadd.f32 %v1021_v32, %v1020_v31 }
 0x538   : > { %v1023_v34 = vrot.slane %v1022_v33, 2 }
 0x53a   : > { %v1024_v35 = vadd.f32 %v1023_v34, %v1022_v33 }
 0x53c   : > { %v1025_v36 = vrot.slane %v1024_v35, 1 }
 0x53e   : > { %v1026_v37 = vadd.f32 %v1025_v36, %v1024_v35 }
 0x540   : > { %4526 = vrcp.f32 %v1026_v37  ;;  %v4528_v37 = vld [vmem:[%s5641_s3 + $0x38] sm:$0xff] (%p877_p1)  }
 0x541   :  { %4260 = vmatpush3.bf16.msra.mxu1 (%p877_p1), %v4528_v37 }
 0x542   :  { %4273 = vmatprep.subr.mxu1 (%p877_p1), %v4742_v15 }
 0x54a   : > { %v4527_v38 = vpop.eup %4526 }
 0x54b   : > { %v1029_v39 = vmul.f32 %v4527_v38, %v4513_v6  ;;  %v1028_v40 = vmul.f32 %v4527_v38, %v4511_v3  ;;  %v1030_v41 = vmul.f32 %v4527_v38, %v4515_v9  ;;  %v1031_v42 = vmul.f32 %v4527_v38, %v4517_v11 }
 0x54c   : > { %v1032_v43 = vmul.f32 %v4527_v38, %v4519_v17  ;;  %v1033_v44 = vmul.f32 %v4527_v38, %v4521_v20  ;;  %v1034_v45 = vmul.f32 %v4527_v38, %v4523_v23  ;;  %v1035_v46 = vmul.f32 %v4527_v38, %v4525_v26  ;;  %v1043_v23 = vld [vmem:[#allocation2 + $0x78] sm:$0xff] }
 0x54d   : > { %1051 = vperm.xlu1 %4509, %v1029_v39   ;;  %1046 = vperm.xlu0 %4508, %v1028_v40  }
 0x551   : > { %1056 = vperm.xlu1 %4509, %v1030_v41   ;;  %v4019_v41 = vld [vmem:[%s5644_s4 + $0x5] ss:$0 sm:$0xff] (%p877_p1) }
 0x555   : > { %1061 = vperm.xlu1 %4509, %v1031_v42  }
 0x559   : > { %1066 = vperm.xlu1 %4509, %v1032_v43  }
 0x55d   : > { %1071 = vperm.xlu1 %4509, %v1033_v44  }
 0x561   : > { %1076 = vperm.xlu1 %4509, %v1034_v45  }
 0x565   : > { %1081 = vperm.xlu1 %4509, %v1035_v46  }
 0x5cc   : > { %v1052_v47 = vpop.permute.xlu1 %1051  ;;  %v1047_v51 = vpop.permute.xlu0 %1046 }
 0x5cd   : > { %v1085_v54 = vmul.f32 %v1052_v47, %v1037_v49  ;;  %v1084_v55 = vmul.f32 %v1047_v51, %v1036_v50 }
 0x5cf   : > { %v1093_v60 = vsel %vm236_vm2, %v1085_v54, 0.0  ;;  %v1092_v61 = vsel %vm236_vm2, %v1084_v55, 0.0 }
 0x5d0   : > { %v1057_v48 = vpop.permute.xlu1 %1056  ;;  %v1094_v8 = vadd.f32 %v1093_v60, %v1092_v61 }
 0x5d1   : > { %v1086_v57 = vmul.f32 %v1057_v48, %v1038_v52 }
 0x5d3   : > { %v1095_v3 = vsel %vm236_vm2, %v1086_v57, 0.0 }
 0x5d4   : > { %v1062_v53 = vpop.permute.xlu1 %1061  ;;  %v1096_v14 = vadd.f32 %v1095_v3, %v1094_v8 }
 0x5d5   : > { %v1087_v62 = vmul.f32 %v1062_v53, %v1039_v56 }
 0x5d7   : > { %v1097_v10 = vsel %vm236_vm2, %v1087_v62, 0.0 }
 0x5d8   : > { %v1067_v59 = vpop.permute.xlu1 %1066  ;;  %v1098_v18 = vadd.f32 %v1097_v10, %v1096_v14 }
 0x5d9   : > { %v1088_v6 = vmul.f32 %v1067_v59, %v1040_v58 }
 0x5db   : > { %v1099_v17 = vsel %vm236_vm2, %v1088_v6, 0.0 }
 0x5dc   : > { %v1072_v9 = vpop.permute.xlu1 %1071  ;;  %v1100_v22 = vadd.f32 %v1099_v17, %v1098_v18 }
 0x5dd   : > { %v1089_v11 = vmul.f32 %v1072_v9, %v1041_v0 }
 0x5df   : > { %v1101_v20 = vsel %vm236_vm2, %v1089_v11, 0.0 }
 0x5e0   : > { %v1077_v19 = vpop.permute.xlu1 %1076  ;;  %v1102_v25 = vadd.f32 %v1101_v20, %v1100_v22 }
 0x5e1   : > { %v1090_v21 = vmul.f32 %v1077_v19, %v1042_v16 }
 0x5e3   : > { %v1103_v24 = vsel %vm236_vm2, %v1090_v21, 0.0 }
 0x5e4   : > { %v1082_v26 = vpop.permute.xlu1 %1081  ;;  %v1104_v28 = vadd.f32 %v1103_v24, %v1102_v25 }
 0x5e5   : > { %v1091_v27 = vmul.f32 %v1082_v26, %v1043_v23 }
 0x5e7   : > { %v1105_v29 = vsel %vm236_vm2, %v1091_v27, 0.0 }
 0x5e8   : > { %v1106_v30 = vadd.f32 %v1105_v29, %v1104_v28 }
 0x5ea   : > { %v1107_v31 = vrot.slane %v1106_v30, 4 }
 0x5ec   : > { %v1108_v32 = vadd.f32 %v1107_v31, %v1106_v30 }
 0x5ee   : > { %v1109_v33 = vrot.slane %v1108_v32, 2 }
 0x5f0   : > { %v1110_v34 = vadd.f32 %v1109_v33, %v1108_v32  ;;  %879 = sbr.rel (!%p877_p1) target bundleno = 1116 (0x45c), region = 90  ;;  %v4529_v33 = vld [vmem:[%s5641_s3 + $0x40] sm:$0xff] (%p877_p1)  }
 0x5f1   :  { %4266 = vmatpush3.bf16.msra.mxu0 (%p877_p1), %v4529_v33 }
 0x5f2   : > { %v1111_v35 = vrot.slane %v1110_v34, 1  ;;  %4267 = vmatprep.subr.bf16.mxu0 (%p877_p1), %v4742_v15 }
 0x5f4   : > { %v1112_v36 = vadd.f32 %v1111_v35, %v1110_v34  ;;  %v4530_v34 = vld [vmem:[%s5641_s3 + $0x48] sm:$0xff] (%p877_p1)  }
 0x5f5   :  { %4268 = vmatpush3.bf16.msra.mxu0 (%p877_p1), %v4530_v34 }
 0x5f6   : > { %4018 = vst.msk [vmem:[%s3947_s18 + $0x6] sm:$0x1] %vm873_vm5, %v1112_v36  ;;  %4278 = vmatprep.subr.mxu0 (%p877_p1), %v4742_v15  ;;  %s4759_s18 = smov (%p877_p1), 16  }
 0x5fd   :  { %v1116_v38 = vld [vmem:[#allocation8] sm:$0xff]  ;;  %v1117_v39 = vld [vmem:[#allocation8 + $0x8] sm:$0xf] }
 0x5fe   :  { %v1118_v40 = vpack.c.bf16 %v1117_v39, %v1116_v38 }
 0x600   :  { %4262 = vmatmul.mubr.msk.bf16.vlgmr.msra.gmra.mrb[20].mxu1 %vm236_vm2, %v1118_v40 }
 0x601   :  { %4275 = vmatprep.mubr.msk.f32.mxu1 %vm4743_vm1, %v4742_v15 }
 0x6d3   :  { %v1169_v42 = vpop.f32.mrb[20].mxu1 }
 0x6d4   :  { %v5122_v43 = vadd.f32 %v4019_v41, %v1169_v42  ;;  %v4263_v44 = vpop.f32.mrb[21].mxu1 }
 0x6d5   :  { %v1172_v45 = vpop.f32.mrb[22].mxu1 }
 0x6d6   :  { %v1176_v46 = vmax.f32 %v5122_v43, 0.0  ;;  %v5125_v47 = vadd.f32 %v4019_v41, %v1172_v45  ;;  %v4264_v48 = vpop.f32.mrb[23].mxu1 }
 0x6d7   :  { %v4022_v48 = vld [vmem:[%s5644_s4 + $0x6] ss:$0 sm:$0xff] }
 0x6d8   :  { %1180 = vrot.lane.b32.xlu0 %v1176_v46, %s4747_s0  ;;  %v1177_v49 = vmax.f32 %v5125_v47, 0.0 }
 0x6dc   :  { %1182 = vrot.lane.b32.xlu0 %v1177_v49, %s4747_s0 }
 0x74a   :  { %v1181_v50 = vpop.permute.xlu0 %1180 }
 0x74b   :  { %v1186_v51 = vmul.f32 %v1181_v50, %v626_v4 }
 0x74d   :  { %v1188_v52 = vmax.f32 %v1186_v51, 0.0  ;;  %v1204_v53 = vsub.f32 0.0, %v1186_v51 }
 0x74e   :  { %v1183_v54 = vpop.permute.xlu0 %1182 }
 0x74f   :  { %4535 = vrsqrt.f32 %v1188_v52  ;;  %v1206_v55 = vmax.f32 %v1204_v53, 0.0  ;;  %v1187_v56 = vmul.f32 %v1183_v54, %v627_v7  ;;  %vm1192_vm6 = vcmp.eq.f32.partialorder %v1188_v52, inf }
 0x750   :  { %v1195_v8 = vand.u32 2147483648, %v1188_v52  ;;  %vm1194_vm8 = vcmp.eq.f32.partialorder %v1188_v52, 0.0 }
 0x751   :  { %v1189_v57 = vmax.f32 %v1187_v56, 0.0  ;;  %v1205_v58 = vsub.f32 0.0, %v1187_v56  ;;  %4537 = vrsqrt.f32 %v1206_v55  ;;  %vm1210_vm7 = vcmp.eq.f32.partialorder %v1206_v55, inf }
 0x752   :  { %v1213_v9 = vand.u32 2147483648, %v1206_v55  ;;  %vm1212_vm9 = vcmp.eq.f32.partialorder %v1206_v55, 0.0 }
 0x753   :  { %4539 = vrsqrt.f32 %v1189_v57  ;;  %v1207_v59 = vmax.f32 %v1205_v58, 0.0  ;;  %vm1199_vm10 = vcmp.eq.f32.partialorder %v1189_v57, inf  ;;  %v1202_v21 = vand.u32 2147483648, %v1189_v57 }
 0x754   :  { %vm1201_vm12 = vcmp.eq.f32.partialorder %v1189_v57, 0.0 }
 0x755   :  { %4541 = vrsqrt.f32 %v1207_v59  ;;  %vm1217_vm11 = vcmp.eq.f32.partialorder %v1207_v59, inf  ;;  %v1220_v22 = vand.u32 2147483648, %v1207_v59  ;;  %vm1219_vm13 = vcmp.eq.f32.partialorder %v1207_v59, 0.0 }
 0x759   :  { %v4536_v60 = vpop.eup %4535 }
 0x75a   :  { %v1191_v61 = vmul.f32 %v4536_v60, %v1188_v52 }
 0x75b   :  { %v4538_v62 = vpop.eup %4537 }
 0x75c   :  { %v1193_v0 = vsel %vm1192_vm6, %v1188_v52, %v1191_v61  ;;  %v1209_v3 = vmul.f32 %v4538_v62, %v1206_v55  ;;  %vm1414_vm6 = vcmask 1045504  }
 0x75d   :  { %v4540_v6 = vpop.eup %4539  ;;  %v1196_v16 = vsel %vm1194_vm8, %v1195_v8, %v1193_v0  ;;  %vm1410_vm8 = vcmask 48128  }
 0x75e   :  { %v1211_v10 = vsel %vm1210_vm7, %v1206_v55, %v1209_v3  ;;  %v1198_v11 = vmul.f32 %v4540_v6, %v1189_v57  ;;  %vm1396_vm7 = vcmask 46080  }
 0x75f   :  { %v4542_v14 = vpop.eup %4541  ;;  %v1214_v17 = vsel %vm1212_vm9, %v1213_v9, %v1211_v10  ;;  %vm2005_vm9 = vcmask 195584  }
 0x760   :  { %v1222_v18 = vsub.f32 %v1196_v16, %v1214_v17  ;;  %v1200_v19 = vsel %vm1199_vm10, %v1189_v57, %v1198_v11  ;;  %v1216_v20 = vmul.f32 %v4542_v14, %v1207_v59  ;;  %vm2007_vm10 = vcmask 259072  }
 0x761   :  { %v1203_v25 = vsel %vm1201_vm12, %v1202_v21, %v1200_v19 }
 0x762   :  { %v1224_v23 = vmul.f32 %v1222_v18, %v1222_v18  ;;  %v1218_v24 = vsel %vm1217_vm11, %v1207_v59, %v1216_v20  ;;  %v1315_v20 = vld [vmem:[%s5640_s2] sm:$0x3f]  ;;  %vm2837_vm11 = vcmask 125952  }
 0x763   :  { %v1221_v26 = vsel %vm1219_vm13, %v1220_v22, %v1218_v24 }
 0x764   :  { %1228 = vrot.lane.b32.xlu1 %v1224_v23, %s4744_s9  ;;  %v1223_v27 = vsub.f32 %v1203_v25, %v1221_v26 }
 0x766   :  { %v1225_v28 = vmul.f32 %v1223_v27, %v1223_v27 }
 0x768   :  { %1230 = vrot.lane.b32.xlu1 %v1225_v28, %s4744_s9 }
 0x7d6   :  { %v1229_v29 = vpop.permute.xlu1 %1228 }
 0x7d7   :  { %v1234_v30 = vsel %vm98_vm0, %v1229_v29, 0.0 }
 0x7d8   :  { %1235 = vadd.xlane.f32.xlu0 %v1234_v30 }
 0x7da   :  { %v1231_v31 = vpop.permute.xlu1 %1230 }
 0x7db   :  { %v1237_v32 = vsel %vm629_vm3, %v1231_v31, 0.0 }
 0x7dc   :  { %1238 = vadd.xlane.f32.xlu1 %v1237_v32 }
 0x865   :  { %v1236_v35 = vpop.xlane.xlu0 %1235 }
 0x866   :  { %v1240_v36 = vmax.f32 %v1236_v35, 1e-24 }
 0x868   :  { %4543 = vrsqrt.f32 %v1240_v36 }
 0x869   :  { %v1239_v37 = vpop.xlane.xlu1 %1238 }
 0x86a   :  { %v1241_v38 = vmax.f32 %v1239_v37, 1e-24 }
 0x86c   :  { %4545 = vrsqrt.f32 %v1241_v38 }
 0x872   :  { %v4544_v39 = vpop.eup %4543 }
 0x873   :  { %v5150_v41 = vmul.f32 %v4544_v39, %v1222_v18 }
 0x876   :  { %v4546_v40 = vpop.eup %4545 }
 0x877   :  { %v5152_v42 = vmul.f32 %v4546_v40, %v1223_v27  ;;  %v4042_v40 = vld [vmem:[%s5640_s2 + $0x8] sm:$0x3f]  ;;  %s4755_s2 = smov 48  }
 0x879   :  { %v1246_v44 = vpack.c.bf16 %v5152_v42, %v5150_v41 }
 0x87b   :  { %1257 = vrot.lane.b32.xlu0 %v1246_v44, %s4744_s9 }
 0x8ed   :  { %v1258_v45 = vpop.permute.xlu0 %1257 }
 0x8ee   :  { %4270 = vmatmul.mubr.msk.bf16.vlgmr.msra.gmra.mrb[20].mxu0 %vm98_vm0, %v1258_v45 }
 0x8ef   :  { %4280 = vmatprep.mubr.msk.f32.mxu0 %vm4743_vm1, %v4742_v15 }
 0x9c1   :  { %v1308_v50 = vpop.f32.mrb[20].mxu0 }
 0x9c2   :  { %v5163_v51 = vadd.f32 %v4022_v48, %v1308_v50  ;;  %v4271_v52 = vpop.f32.mrb[21].mxu0 }
 0x9c3   :  { %v1311_v53 = vpop.f32.mrb[22].mxu0 }
 0x9c4   :  { %1489 = vrot.lane.b32.xlu0 %v5163_v51, %s4748_s29  ;;  %1317 = vrot.lane.b32.xlu1 %v5163_v51, %s4744_s9  ;;  %v4272_v54 = vpop.f32.mrb[23].mxu0  ;;  %v1312_v55 = vadd.f32 %v4022_v48, %v1311_v53  ;;  %v2013_v57 = vrot.slane %v5163_v51, 6 }
 0x9c6   :  { %v2014_v56 = vrot.slane %v1312_v55, 6 }
 0x9c8   :  { %1657 = vrot.lane.b32.xlu0 %v5163_v51, %s4749_s30  ;;  %1487 = vrot.lane.b32.xlu1 %v5163_v51, %s4750_s6  ;;  %v5173_v58 = vsel %vm2012_vm14, %v2013_v57, %v2014_v56 }
 0x9cc   :  { %1825 = vrot.lane.b32.xlu0 %v5163_v51, %s4751_s7  ;;  %1655 = vrot.lane.b32.xlu1 %v5163_v51, %s4752_s8 }
 0x9d0   :  { %1823 = vrot.lane.b32.xlu1 %v5163_v51, %s4753_s1  ;;  %2016 = vrot.lane.b32.xlu0 %v5173_v58, %s4744_s9 }
 0x9d4   :  { %2184 = vrot.lane.b32.xlu1 %v5173_v58, %s4748_s29  ;;  %2182 = vrot.lane.b32.xlu0 %v5173_v58, %s4750_s6 }
 0x9d8   :  { %2352 = vrot.lane.b32.xlu1 %v5173_v58, %s4749_s30  ;;  %2350 = vrot.lane.b32.xlu0 %v5173_v58, %s4752_s8 }
 0x9dc   :  { %2520 = vrot.lane.b32.xlu1 %v5173_v58, %s4751_s7  ;;  %2518 = vrot.lane.b32.xlu0 %v5173_v58, %s4753_s1  ;;  %s5351_s7 = smov 0  }
 0x9e0   :  { %1408 = vrot.lane.b32.xlu1 %v5163_v51, %s4754_s10 }
 0xa36   :  { %v1490_v59 = vpop.permute.xlu0 %1489  ;;  %v1318_v60 = vpop.permute.xlu1 %1317 }
 0xa37   :  { %4274 = vmatpush3.xpose.msk.msra.mxu1 %vm1319_vm15, %v1318_v60 }
 0xa38   :  { %4283 = vmatprep.subr.mxu1 %v4742_v15 }
 0xa3a   :  { %v1658_v61 = vpop.permute.xlu0 %1657  ;;  %4276 = vmatmul.mubr.msk.f32.vlgmr.msra.gmra.mrb[24].mxu1 %vm1319_vm15, %v5163_v51  ;;  %v1488_v62 = vpop.permute.xlu1 %1487 }
 0xa3b   :  { %4284 = vmatpush3.xpose.msk.msra.mxu1 %vm1319_vm15, %v1490_v59  ;;  %4285 = vmatprep.mubr.msk.f32.mxu1 %vm4743_vm1, %v4742_v15 }
 0xa3c   :  { %4293 = vmatprep.subr.mxu1 %v4742_v15 }
 0xa3e   :  { %v1826_v0 = vpop.permute.xlu0 %1825  ;;  %4286 = vmatmul.mubr.msk.f32.vlgmr.msra.gmra.mrb[26].mxu1 %vm1319_vm15, %v1488_v62  ;;  %v1656_v3 = vpop.permute.xlu1 %1655 }
 0xa3f   :  { %4294 = vmatpush3.xpose.msk.msra.mxu1 %vm1319_vm15, %v1658_v61  ;;  %4295 = vmatprep.mubr.msk.f32.mxu1 %vm4743_vm1, %v4742_v15 }
 0xa40   :  { %4303 = vmatprep.subr.mxu1 %v4742_v15 }
 0xa42   :  { %4296 = vmatmul.mubr.msk.f32.vlgmr.msra.gmra.mrb[28].mxu1 %vm1319_vm15, %v1656_v3  ;;  %v1824_v6 = vpop.permute.xlu1 %1823  ;;  %v2017_v8 = vpop.permute.xlu0 %2016 }
 0xa43   :  { %4304 = vmatpush3.xpose.msk.msra.mxu1 %vm1319_vm15, %v1826_v0  ;;  %4305 = vmatprep.mubr.msk.f32.mxu1 %vm4743_vm1, %v4742_v15 }
 0xa44   :  { %4313 = vmatprep.subr.mxu1 %v4742_v15 }
 0xa46   :  { %4306 = vmatmul.mubr.msk.f32.vlgmr.msra.gmra.mrb[30].mxu1 %vm1319_vm15, %v1824_v6  ;;  %v2185_v9 = vpop.permute.xlu1 %2184  ;;  %v2183_v10 = vpop.permute.xlu0 %2182 }
 0xa47   :  { %4314 = vmatpush3.xpose.msk.msra.mxu1 %vm1319_vm15, %v2017_v8  ;;  %4315 = vmatprep.mubr.msk.f32.mxu1 %vm4743_vm1, %v4742_v15 }
 0xa48   :  { %4323 = vmatprep.subr.mxu1 %v4742_v15 }
 0xa4a   :  { %v2353_v11 = vpop.permute.xlu1 %2352  ;;  %4316 = vmatmul.mubr.msk.f32.vlgmr.msra.gmra.mrb[32].mxu1 %vm1319_vm15, %v5173_v58  ;;  %v2351_v16 = vpop.permute.xlu0 %2350 }
 0xa4b   :  { %4324 = vmatpush3.xpose.msk.msra.mxu1 %vm1319_vm15, %v2185_v9  ;;  %4325 = vmatprep.mubr.msk.f32.mxu1 %vm4743_vm1, %v4742_v15 }
 0xa4c   :  { %4333 = vmatprep.subr.mxu1 %v4742_v15 }
 0xa4e   :  { %v2521_v14 = vpop.permute.xlu1 %2520  ;;  %4326 = vmatmul.mubr.msk.f32.vlgmr.msra.gmra.mrb[34].mxu1 %vm1319_vm15, %v2183_v10  ;;  %v2519_v18 = vpop.permute.xlu0 %2518 }
 0xa4f   :  { %4334 = vmatpush3.xpose.msk.msra.mxu1 %vm1319_vm15, %v2353_v11  ;;  %4335 = vmatprep.mubr.msk.f32.mxu1 %vm4743_vm1, %v4742_v15 }
 0xa50   :  { %4343 = vmatprep.subr.mxu1 %v4742_v15 }
 0xa52   :  { %v1409_v17 = vpop.permute.xlu1 %1408  ;;  %4336 = vmatmul.mubr.msk.f32.vlgmr.msra.gmra.mrb[36].mxu1 %vm1319_vm15, %v2351_v16 }
 0xa53   :  { %4279 = vmatpush3.msk.msra.mxu0 %vm1414_vm6, %v1409_v17  ;;  %4344 = vmatpush3.xpose.msk.msra.mxu1 %vm1319_vm15, %v2521_v14 }
 0xa54   :  { %4345 = vmatprep.mubr.msk.f32.mxu1 %vm4743_vm1, %v4742_v15  ;;  %4288 = vmatprep.subr.mxu0 %v4742_v15 }
 0xa55   :  { %4353 = vmatprep.subr.bf16.mxu1 %v4742_v15 }
 0xa56   :  { %4346 = vmatmul.mubr.msk.f32.vlgmr.msra.gmra.mrb[38].mxu1 %vm1319_vm15, %v2519_v18 }
 0xa57   :  { %4357 = vmatprep.mubr.msk.bf16.mxu1 %vm4743_vm1, %v4742_v15 }
 0xb0d   :  { %v1390_v19 = vpop.f32.mrb[24].mxu1 }
 0xb0e   :  { %v1394_v21 = vmul.f32 0.35355338, %v1390_v19  ;;  %v4277_v22 = vpop.f32.mrb[25].mxu1 }
 0xb10   :  { %v1395_v23 = vadd.f32 %v1394_v21, %v1315_v20 }
 0xb11   :  { %v1561_v24 = vpop.f32.mrb[26].mxu1 }
 0xb12   :  { %v1565_v25 = vmul.f32 0.35355338, %v1561_v24  ;;  %v4287_v26 = vpop.f32.mrb[27].mxu1  ;;  %v1397_v27 = vsel %vm1396_vm7, %v1395_v23, -inf }
 0xb13   :  { %1398 = vmax.xlane.f32.xlu1 %v1397_v27 }
 0xb14   :  { %v1566_v28 = vadd.f32 %v1565_v25, %v1315_v20 }
 0xb15   :  { %v1729_v29 = vpop.f32.mrb[28].mxu1 }
 0xb16   :  { %v1733_v30 = vmul.f32 0.35355338, %v1729_v29  ;;  %v4297_v31 = vpop.f32.mrb[29].mxu1  ;;  %v1567_v32 = vsel %vm1396_vm7, %v1566_v28, -inf }
 0xb17   :  { %1568 = vmax.xlane.f32.xlu0 %v1567_v32 }
 0xb18   :  { %v1734_v33 = vadd.f32 %v1733_v30, %v1315_v20 }
 0xb19   :  { %v1897_v34 = vpop.f32.mrb[30].mxu1 }
 0xb1a   :  { %v1901_v35 = vmul.f32 0.35355338, %v1897_v34  ;;  %v4307_v36 = vpop.f32.mrb[31].mxu1  ;;  %v1735_v37 = vsel %vm1396_vm7, %v1734_v33, -inf }
 0xb1b   :  { %1736 = vmax.xlane.f32.xlu0 %v1735_v37 }
 0xb1c   :  { %v1902_v38 = vadd.f32 %v1901_v35, %v1315_v20 }
 0xb1d   :  { %v2088_v39 = vpop.f32.mrb[32].mxu1 }
 0xb1e   :  { %v2092_v44 = vmul.f32 0.35355338, %v2088_v39  ;;  %v4317_v45 = vpop.f32.mrb[33].mxu1  ;;  %v1903_v48 = vsel %vm1396_vm7, %v1902_v38, -inf }
 0xb1f   :  { %1904 = vmax.xlane.f32.xlu1 %v1903_v48 }
 0xb20   :  { %v2093_v50 = vadd.f32 %v4042_v40, %v2092_v44 }
 0xb21   :  { %v2256_v52 = vpop.f32.mrb[34].mxu1 }
 0xb22   :  { %v2260_v53 = vmul.f32 0.35355338, %v2256_v52  ;;  %v4327_v54 = vpop.f32.mrb[35].mxu1  ;;  %v2094_v55 = vsel %vm1396_vm7, %v2093_v50, -inf }
 0xb23   :  { %2095 = vmax.xlane.f32.xlu0 %v2094_v55 }
 0xb24   :  { %v2261_v56 = vadd.f32 %v4042_v40, %v2260_v53 }
 0xb25   :  { %v2424_v57 = vpop.f32.mrb[36].mxu1 }
 0xb26   :  { %v2428_v59 = vmul.f32 0.35355338, %v2424_v57  ;;  %v4337_v60 = vpop.f32.mrb[37].mxu1  ;;  %v2262_v61 = vsel %vm1396_vm7, %v2261_v56, -inf }
 0xb27   :  { %2263 = vmax.xlane.f32.xlu1 %v2262_v61 }
 0xb28   :  { %v2429_v62 = vadd.f32 %v4042_v40, %v2428_v59 }
 0xb29   :  { %v2592_v0 = vpop.f32.mrb[38].mxu1 }
 0xb2a   :  { %v4347_v3 = vpop.f32.mrb[39].mxu1  ;;  %v2430_v6 = vsel %vm1396_vm7, %v2429_v62, -inf  ;;  %v2596_v8 = vmul.f32 0.35355338, %v2592_v0 }
 0xb2b   :  { %2431 = vmax.xlane.f32.xlu0 %v2430_v6 }
 0xb2c   :  { %v2597_v9 = vadd.f32 %v4042_v40, %v2596_v8 }
 0xb2e   :  { %v2598_v10 = vsel %vm1396_vm7, %v2597_v9, -inf }
 0xb38   :  { %1746 = vrot.lane.b32.xlu1 %v5163_v51, %s4755_s2 }
 0xb41   :  { %1578 = vrot.lane.b32.xlu0 %v5163_v51, %s4756_s15 }
 0xb5c   :  { %2599 = vmax.xlane.f32.xlu1 %v2598_v10 }
 0xb6d   :  { %1914 = vrot.lane.b32.xlu1 %v5163_v51, %s4757_s16 }
 0xba0   :  { %v1399_v11 = vpop.xlane.xlu1 %1398 }
 0xba1   :  { %v1400_v14 = vsub.f32 %v1395_v23, %v1399_v11 }
 0xba3   :  { %v1401_v16 = vmul.f32 1.442695, %v1400_v14 }
 0xba4   :  { %v1569_v17 = vpop.xlane.xlu0 %1568 }
 0xba5   :  { %4547 = vpow2.f32 %v1401_v16  ;;  %v1570_v18 = vsub.f32 %v1566_v28, %v1569_v17 }
 0xba7   :  { %v1571_v19 = vmul.f32 1.442695, %v1570_v18 }
 0xba8   :  { %v1737_v20 = vpop.xlane.xlu0 %1736 }
 0xba9   :  { %4549 = vpow2.f32 %v1571_v19  ;;  %v1738_v21 = vsub.f32 %v1734_v33, %v1737_v20 }
 0xbab   :  { %v1739_v22 = vmul.f32 1.442695, %v1738_v21 }
 0xbac   :  { %v1905_v28 = vpop.xlane.xlu1 %1904 }
 0xbad   :  { %4551 = vpow2.f32 %v1739_v22  ;;  %v1906_v29 = vsub.f32 %v1902_v38, %v1905_v28 }
 0xbaf   :  { %v4548_v24 = vpop.eup %4547  ;;  %v1907_v33 = vmul.f32 1.442695, %v1906_v29 }
 0xbb0   :  { %v1403_v25 = vsel %vm1396_vm7, %v4548_v24, 0.0  ;;  %v2096_v30 = vpop.xlane.xlu0 %2095 }
 0xbb1   :  { %1404 = vadd.xlane.f32.xlu0 %v1403_v25  ;;  %v2097_v32 = vsub.f32 %v2093_v50, %v2096_v30  ;;  %4553 = vpow2.f32 %v1907_v33 }
 0xbb3   :  { %v4550_v26 = vpop.eup %4549  ;;  %v2098_v36 = vmul.f32 1.442695, %v2097_v32 }
 0xbb4   :  { %v1573_v27 = vsel %vm1396_vm7, %v4550_v26, 0.0  ;;  %v2264_v31 = vpop.xlane.xlu1 %2263 }
 0xbb5   :  { %1574 = vadd.xlane.f32.xlu1 %v1573_v27  ;;  %v2265_v34 = vsub.f32 %v2261_v56, %v2264_v31  ;;  %4555 = vpow2.f32 %v2098_v36 }
 0xbb7   :  { %v5252_v51 = vpop.eup %4551  ;;  %v2266_v37 = vmul.f32 1.442695, %v2265_v34 }
 0xbb8   :  { %v1741_v23 = vsel %vm1396_vm7, %v5252_v51, 0.0  ;;  %v2432_v35 = vpop.xlane.xlu0 %2431  ;;  %v1747_v44 = vpop.permute.xlu1 %1746 }
 0xbb9   :  { %1742 = vadd.xlane.f32.xlu0 %v1741_v23  ;;  %v2433_v39 = vsub.f32 %v2429_v62, %v2432_v35  ;;  %4557 = vpow2.f32 %v2266_v37 }
 0xbbb   :  { %v2434_v40 = vmul.f32 1.442695, %v2433_v39  ;;  %v4554_v45 = vpop.eup %4553 }
 0xbbc   :  { %v1909_v38 = vsel %vm1396_vm7, %v4554_v45, 0.0  ;;  %v1579_v62 = vpop.permute.xlu0 %1578 }
 0xbbd   :  { %4559 = vpow2.f32 %v2434_v40 }
 0xbbf   :  { %v5260_v48 = vpop.eup %4555 }
 0xbc0   :  { %v2100_v55 = vsel %vm1396_vm7, %v5260_v48, 0.0 }
 0xbc3   :  { %v5263_v53 = vpop.eup %4557 }
 0xbc4   :  { %v2268_v56 = vsel %vm1396_vm7, %v5263_v53, 0.0 }
 0xbc6   :  { %2105 = vrot.lane.b32.xlu1 %v5173_v58, %s4754_s10 }
 0xbc7   :  { %v5269_v57 = vpop.eup %4559 }
 0xbc8   :  { %v2436_v59 = vsel %vm1396_vm7, %v5269_v57, 0.0 }
 0xbcf   :  { %2273 = vrot.lane.b32.xlu0 %v5173_v58, %s4756_s15 }
 0xbe9   :  { %v2600_v52 = vpop.xlane.xlu1 %2599 }
 0xbea   :  { %v2601_v50 = vsub.f32 %v2597_v9, %v2600_v52  ;;  %1910 = vadd.xlane.f32.xlu1 %v1909_v38 }
 0xbec   :  { %v2602_v54 = vmul.f32 1.442695, %v2601_v50  ;;  %v4532_v50 = vld [vmem:[%s5641_s3 + $0x58] sm:$0xff]  }
 0xbed   :  { %v1915_v0 = vpop.permute.xlu1 %1914 }
 0xbee   :  { %4561 = vpow2.f32 %v2602_v54  ;;  %2101 = vadd.xlane.f32.xlu0 %v2100_v55  ;;  %2269 = vadd.xlane.f32.xlu1 %v2268_v56 }
 0xbf2   :  { %2437 = vadd.xlane.f32.xlu0 %v2436_v59 }
 0xbf8   :  { %v5273_v60 = vpop.eup %4561 }
 0xbf9   :  { %v2604_v61 = vsel %vm1396_vm7, %v5273_v60, 0.0 }
 0xbfa   :  { %2605 = vadd.xlane.f32.xlu0 %v2604_v61 }
 0xbff   :  { %2441 = vrot.lane.b32.xlu1 %v5173_v58, %s4755_s2 }
 0xc10   :  { %2609 = vrot.lane.b32.xlu0 %v5173_v58, %s4757_s16 }
 0xc3e   :  { %v1405_v3 = vpop.xlane.xlu0 %1404 }
 0xc3f   :  { %4563 = vrcp.f32 %v1405_v3 }
 0xc42   :  { %v1575_v6 = vpop.xlane.xlu1 %1574 }
 0xc43   :  { %4565 = vrcp.f32 %v1575_v6 }
 0xc46   :  { %v1743_v8 = vpop.xlane.xlu0 %1742  ;;  %v2106_v17 = vpop.permute.xlu1 %2105 }
 0xc47   :  { %4567 = vrcp.f32 %v1743_v8 }
 0xc49   :  { %v4564_v9 = vpop.eup %4563 }
 0xc4a   :  { %v1407_v10 = vmul.f32 %v4564_v9, %v4548_v24  ;;  %v2274_v18 = vpop.permute.xlu0 %2273 }
 0xc4c   :  { %4281 = vmatmul.mubr.msk.f32.vlgmr.msra.gmra.mrb[24].mxu0 %vm1410_vm8, %v1407_v10 }
 0xc4d   :  { %v4566_v11 = vpop.eup %4565  ;;  %4289 = vmatpush3.msk.msra.mxu0 %vm1414_vm6, %v1579_v62  ;;  %4290 = vmatprep.mubr.msk.f32.mxu0 %vm4743_vm1, %v4742_v15 }
 0xc4e   :  { %v1577_v58 = vmul.f32 %v4566_v11, %v4550_v26  ;;  %4298 = vmatprep.subr.mxu0 %v4742_v15 }
 0xc50   :  { %4291 = vmatmul.mubr.msk.f32.vlgmr.msra.gmra.mrb[26].mxu0 %vm1410_vm8, %v1577_v58 }
 0xc51   :  { %v4568_v14 = vpop.eup %4567  ;;  %4299 = vmatpush3.msk.msra.mxu0 %vm1414_vm6, %v1747_v44  ;;  %4300 = vmatprep.mubr.msk.f32.mxu0 %vm4743_vm1, %v4742_v15 }
 0xc52   :  { %v1745_v16 = vmul.f32 %v4568_v14, %v5252_v51  ;;  %4308 = vmatprep.subr.mxu0 %v4742_v15 }
 0xc54   :  { %4301 = vmatmul.mubr.msk.f32.vlgmr.msra.gmra.mrb[28].mxu0 %vm1410_vm8, %v1745_v16 }
 0xc55   :  { %4309 = vmatpush3.msk.msra.mxu0 %vm1414_vm6, %v1915_v0  ;;  %4310 = vmatprep.mubr.msk.f32.mxu0 %vm4743_vm1, %v4742_v15 }
 0xc56   :  { %4318 = vmatprep.subr.mxu0 %v4742_v15 }
 0xc77   :  { %v1911_v19 = vpop.xlane.xlu1 %1910 }
 0xc78   :  { %4569 = vrcp.f32 %v1911_v19 }
 0xc7b   :  { %v2102_v20 = vpop.xlane.xlu0 %2101  ;;  %v2270_v21 = vpop.xlane.xlu1 %2269 }
 0xc7c   :  { %4571 = vrcp.f32 %v2102_v20  ;;  %v4533_v20 = vld [vmem:[%s5641_s3 + $0x60] sm:$0xff]  }
 0xc7d   :  { %4573 = vrcp.f32 %v2270_v21  ;;  %v4534_v21 = vld [vmem:[%s5641_s3 + $0x68] sm:$0xff]  }
 0xc7f   :  { %v2438_v22 = vpop.xlane.xlu0 %2437  ;;  %v2442_v30 = vpop.permute.xlu1 %2441 }
 0xc80   :  { %4575 = vrcp.f32 %v2438_v22  ;;  %v4059_v22 = vld [vmem:[%s5644_s4 + $0x7] ss:$0 sm:$0xff] }
 0xc82   :  { %v4570_v24 = vpop.eup %4569 }
 0xc83   :  { %v1913_v25 = vmul.f32 %v4570_v24, %v4554_v45 }
 0xc85   :  { %4311 = vmatmul.mubr.msk.f32.vlgmr.msra.gmra.mrb[30].mxu0 %vm1410_vm8, %v1913_v25 }
 0xc86   :  { %v4572_v26 = vpop.eup %4571  ;;  %4319 = vmatpush3.msk.msra.mxu0 %vm1414_vm6, %v2106_v17  ;;  %4320 = vmatprep.mubr.msk.f32.mxu0 %vm4743_vm1, %v4742_v15 }
 0xc87   :  { %v2104_v27 = vmul.f32 %v4572_v26, %v5260_v48  ;;  %v2606_v51 = vpop.xlane.xlu0 %2605  ;;  %4328 = vmatprep.subr.mxu0 %v4742_v15  ;;  %v4574_v23 = vpop.eup %4573 }
 0xc88   :  { %4577 = vrcp.f32 %v2606_v51  ;;  %v2272_v28 = vmul.f32 %v4574_v23, %v5263_v53  ;;  %v4531_v53 = vld [vmem:[%s5641_s3 + $0x50] sm:$0xff]  }
 0xc89   :  { %4321 = vmatmul.mubr.msk.f32.vlgmr.msra.gmra.mrb[32].mxu0 %vm1410_vm8, %v2104_v27  ;;  %4354 = vmatpush3.bf16.msra.mxu1 %v4531_v53 }
 0xc8a   :  { %4329 = vmatpush3.msk.msra.mxu0 %vm1414_vm6, %v2274_v18  ;;  %4330 = vmatprep.mubr.msk.f32.mxu0 %vm4743_vm1, %v4742_v15  ;;  %v4576_v29 = vpop.eup %4575 }
 0xc8b   :  { %4338 = vmatprep.subr.mxu0 %v4742_v15  ;;  %v2440_v31 = vmul.f32 %v4576_v29, %v5269_v57  ;;  %v2610_v32 = vpop.permute.xlu0 %2609  ;;  %4355 = vmatprep.subr.bf16.mxu1 %v4742_v15  ;;  %v4063_v29 = vld [vmem:[%s5644_s4 + $0x8] ss:$0 sm:$0xff] }
 0xc8d   :  { %4331 = vmatmul.mubr.msk.f32.vlgmr.msra.gmra.mrb[34].mxu0 %vm1410_vm8, %v2272_v28  ;;  %4356 = vmatpush3.bf16.msra.mxu1 %v4532_v50 }
 0xc8e   :  { %4339 = vmatpush3.msk.msra.mxu0 %vm1414_vm6, %v2442_v30  ;;  %4340 = vmatprep.mubr.msk.f32.mxu0 %vm4743_vm1, %v4742_v15 }
 0xc8f   :  { %4348 = vmatprep.subr.mxu0 %v4742_v15 }
 0xc91   :  { %4341 = vmatmul.mubr.msk.f32.vlgmr.msra.gmra.mrb[36].mxu0 %vm1410_vm8, %v2440_v31 }
 0xc92   :  { %v4578_v33 = vpop.eup %4577  ;;  %4349 = vmatpush3.msk.msra.mxu0 %vm1414_vm6, %v2610_v32  ;;  %4350 = vmatprep.mubr.msk.f32.mxu0 %vm4743_vm1, %v4742_v15 }
 0xc93   :  { %v2608_v34 = vmul.f32 %v4578_v33, %v5273_v60  ;;  %4361 = vmatprep.subr.bf16.mxu0 %v4742_v15 }
 0xc95   :  { %4351 = vmatmul.mubr.msk.f32.vlgmr.msra.gmra.mrb[38].mxu0 %vm1410_vm8, %v2608_v34 }
 0xc96   :  { %4365 = vmatprep.mubr.msk.bf16.mxu0 %vm4743_vm1, %v4742_v15  ;;  %4362 = vmatpush3.bf16.msra.mxu0 %v4533_v20 }
 0xc97   :  { %4363 = vmatprep.subr.bf16.mxu0 %v4742_v15 }
 0xc9a   :  { %4364 = vmatpush3.bf16.msra.mxu0 %v4534_v21 }
 0xd1f   :  { %v1483_v35 = vpop.f32.mrb[24].mxu0 }
 0xd20   :  { %v4282_v36 = vpop.f32.mrb[25].mxu0 }
 0xd23   :  { %v1651_v37 = vpop.f32.mrb[26].mxu0 }
 0xd24   :  { %1992 = vrot.lane.b32.xlu1 %v1651_v37, %s4758_s17  ;;  %v4292_v39 = vpop.f32.mrb[27].mxu0 }
 0xd27   :  { %v1819_v40 = vpop.f32.mrb[28].mxu0 }
 0xd28   :  { %1996 = vrot.lane.b32.xlu1 %v1819_v40, %s4759_s18  ;;  %v4302_v44 = vpop.f32.mrb[29].mxu0 }
 0xd58   :  { %v1987_v45 = vpop.f32.mrb[30].mxu0 }
 0xd59   :  { %2000 = vrot.lane.b32.xlu1 %v1987_v45, %s4760_s19  ;;  %v4312_v48 = vpop.f32.mrb[31].mxu0 }
 0xd5c   :  { %v2178_v52 = vpop.f32.mrb[32].mxu0 }
 0xd5d   :  { %v4322_v38 = vpop.f32.mrb[33].mxu0 }
 0xd60   :  { %v2346_v54 = vpop.f32.mrb[34].mxu0 }
 0xd61   :  { %2687 = vrot.lane.b32.xlu0 %v2346_v54, %s4758_s17  ;;  %v4332_v55 = vpop.f32.mrb[35].mxu0 }
 0xd64   :  { %v2514_v56 = vpop.f32.mrb[36].mxu0 }
 0xd65   :  { %2691 = vrot.lane.b32.xlu0 %v2514_v56, %s4759_s18  ;;  %v4342_v57 = vpop.f32.mrb[37].mxu0 }
 0xd68   :  { %v2682_v59 = vpop.f32.mrb[38].mxu0 }
 0xd69   :  { %2695 = vrot.lane.b32.xlu0 %v2682_v59, %s4760_s19  ;;  %v4352_v60 = vpop.f32.mrb[39].mxu0 }
 0xd96   :  { %v1993_v61 = vpop.permute.xlu1 %1992 }
 0xd97   :  { %v2003_v0 = vsel %vm1319_vm15, %v1483_v35, %v1993_v61 }
 0xd9a   :  { %v1997_v62 = vpop.permute.xlu1 %1996 }
 0xd9b   :  { %v2004_v3 = vsel %vm236_vm2, %v2003_v0, %v1997_v62 }
 0xdcb   :  { %v2001_v6 = vpop.permute.xlu1 %2000 }
 0xdcc   :  { %v2006_v8 = vsel %vm2005_vm9, %v2004_v3, %v2001_v6 }
 0xdcd   :  { %2008 = vst.msk [vmem:[#allocation6] sm:$0x3f] %vm2007_vm10, %v2006_v8 }
 0xdd3   :  { %v2688_v9 = vpop.permute.xlu0 %2687 }
 0xdd4   :  { %v2698_v11 = vsel %vm1319_vm15, %v2178_v52, %v2688_v9 }
 0xdd7   :  { %v2692_v10 = vpop.permute.xlu0 %2691 }
 0xdd8   :  { %v2699_v58 = vsel %vm236_vm2, %v2698_v11, %v2692_v10 }
 0xddb   :  { %v2696_v14 = vpop.permute.xlu0 %2695 }
 0xddc   :  { %v2700_v16 = vsel %vm2005_vm9, %v2699_v58, %v2696_v14 }
 0xddd   :  { %2701 = vst.msk [vmem:[#allocation6 + $0x6] sm:$0x3f] %vm2007_vm10, %v2700_v16 }
 0xde4   :  { %v2702_v17 = vld [vmem:[#allocation6] sm:$0xff]  ;;  %v2703_v18 = vld [vmem:[#allocation6 + $0x8] sm:$0xf] }
 0xde5   :  { %v2704_v19 = vpack.c.bf16 %v2703_v18, %v2702_v17 }
 0xde7   :  { %4358 = vmatmul.mubr.msk.bf16.vlgmr.msra.gmra.mrb[40].mxu1 %vm98_vm0, %v2704_v19 }
 0xeba   :  { %v2763_v24 = vpop.f32.mrb[40].mxu1 }
 0xebb   :  { %v4359_v25 = vpop.f32.mrb[41].mxu1  ;;  %v2764_v27 = vadd.f32 %v4059_v22, %v2763_v24 }
 0xebc   :  { %v2766_v26 = vpop.f32.mrb[42].mxu1 }
 0xebd   :  { %v2767_v51 = vadd.f32 %v4059_v22, %v2766_v26  ;;  %v4360_v23 = vpop.f32.mrb[43].mxu1 }
 0xebf   :  { %v2770_v28 = vpack.c.bf16 %v2767_v51, %v2764_v27 }
 0xec1   :  { %4366 = vmatmul.mubr.msk.bf16.vlgmr.msra.gmra.mrb[40].mxu0 %vm98_vm0, %v2770_v28 }
 0xf94   :  { %v2829_v30 = vpop.f32.mrb[40].mxu0 }
 0xf95   :  { %v2830_v31 = vadd.f32 %v4063_v29, %v2829_v30  ;;  %v4367_v32 = vpop.f32.mrb[41].mxu0 }
 0xf96   :  { %v2832_v33 = vpop.f32.mrb[42].mxu0 }
 0xf97   :  { %2836 = vst.msk [vmem:[#allocation7] sm:$0xff] %vm236_vm2, %v2830_v31  ;;  %v2833_v34 = vadd.f32 %v4063_v29, %v2832_v33  ;;  %v4368_v35 = vpop.f32.mrb[43].mxu0 }
 0xf99   :  { %2838 = vst.msk [vmem:[#allocation7 + $0x8] sm:$0xf] %vm2837_vm11, %v2833_v34 }
 0xf9a LB: > { %v5358_v36 = vcombine.low %v4799_v1, %v4804_v2  ;;  %v2853_v37 = vld [vmem:[#allocation4] sm:$0xff]  ;;  %v2854_v39 = vld [vmem:[#allocation4 + $0x8] sm:$0xff]  ;;  %v2855_v40 = vld [vmem:[#allocation4 + $0x10] sm:$0xff]  ;;  %s2861_s8 = scalar_lea.vmem [#allocation7], %s4736_s7  ;;  %s2931_s1 = scalar_lea.vmem [#allocation5], %s4736_s7  ;;  %s4736_s7 = sphi %s5351_s7, %s2844_s7  }
 0xf9b   : > { %v2856_v44 = vld [vmem:[#allocation4 + $0x18] sm:$0xff]  ;;  %v2857_v48 = vld [vmem:[#allocation4 + $0x20] sm:$0xff]  ;;  %v2858_v54 = vld [vmem:[#allocation4 + $0x28] sm:$0xff]  ;;  %s3225_s10 = scalar_lea.vmem [#allocation9], %s4736_s7  ;;  %s2844_s7 = sadd.s32 1, %s4736_s7  }
 0xf9c   : > { %4369 = vmatprep.subr.bf16.mxu0 %v5358_v36  ;;  %4415 = vmatprep.subr.bf16.mxu1 %v5358_v36  ;;  %v2859_v57 = vld [vmem:[#allocation4 + $0x30] sm:$0xff]  ;;  %v2860_v59 = vld [vmem:[#allocation4 + $0x38] sm:$0xff]  ;;  %v2845_v29 = vld [vmem:[#allocation2] sm:$0xff]  ;;  %p2841_p2 = scmp.ge.s32.totalorder %s2844_s7, 6  }
 0xf9d   : > { %4370 = vmatpush3.bf16.msra.mxu0 %v5358_v36  ;;  %4416 = vmatpush3.bf16.msra.mxu1 %v5358_v36  ;;  %v2846_v30 = vld [vmem:[#allocation2 + $0x8] sm:$0xff]  ;;  %v2847_v32 = vld [vmem:[#allocation2 + $0x10] sm:$0xff]  ;;  %v2848_v35 = vld [vmem:[#allocation2 + $0x18] sm:$0xff]  ;;  %s5455_s11 = smov (%p2841_p2), 0  }
 0xfa0   : > { %v4067_v45 = vld [vmem:[%s2861_s8] ss:$0 sm:$0xff] }
 0xfa1   : > { %v2867_v52 = vadd.f32 %v4067_v45, %v2853_v37  ;;  %v2868_v38 = vadd.f32 %v4067_v45, %v2854_v39  ;;  %v2869_v53 = vadd.f32 %v4067_v45, %v2855_v40  ;;  %v2870_v50 = vadd.f32 %v4067_v45, %v2856_v44  ;;  %v2849_v40 = vld [vmem:[#allocation2 + $0x20] sm:$0xff] }
 0xfa2   : > { %v2871_v55 = vadd.f32 %v4067_v45, %v2857_v48  ;;  %v2872_v56 = vadd.f32 %v4067_v45, %v2858_v54  ;;  %v2873_v0 = vadd.f32 %v4067_v45, %v2859_v57  ;;  %v2874_v6 = vadd.f32 %v4067_v45, %v2860_v59  ;;  %v2850_v48 = vld [vmem:[#allocation2 + $0x28] sm:$0xff] }
 0xfa3   : > { %v4068_v60 = vmul.f32 -1.442695, %v2867_v52  ;;  %v4069_v61 = vmul.f32 -1.442695, %v2868_v38  ;;  %v4070_v62 = vmul.f32 -1.442695, %v2869_v53 }
 0xfa4   : > { %v4071_v3 = vmul.f32 -1.442695, %v2870_v50  ;;  %v4072_v8 = vmul.f32 -1.442695, %v2871_v55  ;;  %v4073_v9 = vmul.f32 -1.442695, %v2872_v56 }
 0xfa5   : > { %4581 = vpow2.f32 %v4068_v60  ;;  %v4074_v10 = vmul.f32 -1.442695, %v2873_v0  ;;  %v4075_v11 = vmul.f32 -1.442695, %v2874_v6  ;;  %v2851_v50 = vld [vmem:[#allocation2 + $0x30] sm:$0xff]  ;;  %v2852_v56 = vld [vmem:[#allocation2 + $0x38] sm:$0xff] }
 0xfa6   : > { %4583 = vpow2.f32 %v4069_v61 }
 0xfa7   : > { %4585 = vpow2.f32 %v4070_v62 }
 0xfa8   : > { %4587 = vpow2.f32 %v4071_v3 }
 0xfa9   : > { %4589 = vpow2.f32 %v4072_v8  ;;  %v4076_v8 = vld [vmem:[%s2931_s1] ss:$0 sm:$0xff] }
 0xfaa   : > { %4591 = vpow2.f32 %v4073_v9 }
 0xfab   : > { %4593 = vpow2.f32 %v4074_v10 }
 0xfac   : > { %4595 = vpow2.f32 %v4075_v11 }
 0xfaf   : > { %v4582_v58 = vpop.eup %4581 }
 0xfb0   : > { %v4584_v14 = vpop.eup %4583  ;;  %v2899_v16 = vadd.f32 1.0, %v4582_v58 }
 0xfb1   : > { %v4586_v17 = vpop.eup %4585  ;;  %v2900_v18 = vadd.f32 1.0, %v4584_v14 }
 0xfb2   : > { %v4588_v19 = vpop.eup %4587  ;;  %4597 = vrcp.f32 %v2899_v16  ;;  %v2901_v20 = vadd.f32 1.0, %v4586_v17 }
 0xfb3   : > { %v4590_v21 = vpop.eup %4589  ;;  %4599 = vrcp.f32 %v2900_v18  ;;  %v2902_v22 = vadd.f32 1.0, %v4588_v19 }
 0xfb4   : > { %v4592_v24 = vpop.eup %4591  ;;  %4601 = vrcp.f32 %v2901_v20  ;;  %v2903_v25 = vadd.f32 1.0, %v4590_v21 }
 0xfb5   : > { %v4594_v26 = vpop.eup %4593  ;;  %4603 = vrcp.f32 %v2902_v22  ;;  %v2904_v27 = vadd.f32 1.0, %v4592_v24 }
 0xfb6   : > { %v4596_v51 = vpop.eup %4595  ;;  %4605 = vrcp.f32 %v2903_v25  ;;  %v2905_v23 = vadd.f32 1.0, %v4594_v26 }
 0xfb7   : > { %4607 = vrcp.f32 %v2904_v27  ;;  %v2906_v28 = vadd.f32 1.0, %v4596_v51 }
 0xfb8   : > { %4609 = vrcp.f32 %v2905_v23 }
 0xfb9   : > { %4611 = vrcp.f32 %v2906_v28 }
 0xfbc   : > { %v4598_v31 = vpop.eup %4597 }
 0xfbd   : > { %v4600_v33 = vpop.eup %4599  ;;  %v5365_v34 = vmul.f32 %v4598_v31, %v2845_v29 }
 0xfbe   : > { %v4602_v37 = vpop.eup %4601  ;;  %v5367_v39 = vmul.f32 %v4600_v33, %v2846_v30 }
 0xfbf   : > { %v4604_v44 = vpop.eup %4603  ;;  %v5369_v45 = vmul.f32 %v4602_v37, %v2847_v32 }
 0xfc0   : > { %v4606_v52 = vpop.eup %4605  ;;  %v2933_v38 = vpack.c.bf16 %v5367_v39, %v5365_v34  ;;  %v5373_v53 = vmul.f32 %v4604_v44, %v2848_v35 }
 0xfc1   : > { %v4608_v54 = vpop.eup %4607  ;;  %v5375_v55 = vmul.f32 %v4606_v52, %v2849_v40 }
 0xfc2   : > { %v4610_v57 = vpop.eup %4609  ;;  %4371 = vmatprep.mubr.msk.bf16.mxu0 %vm236_vm2, %v2933_v38  ;;  %v2934_v59 = vpack.c.bf16 %v5373_v53, %v5369_v45  ;;  %v5380_v60 = vmul.f32 %v4608_v54, %v2850_v48 }
 0xfc3   : > { %v4612_v61 = vpop.eup %4611  ;;  %v5382_v62 = vmul.f32 %v4610_v57, %v2851_v50 }
 0xfc4   : > { %4372 = vmatmul.mubr.msk.bf16.vlgmr.msra.gmra.mrb[0].mxu0 %vm236_vm2, %v2934_v59  ;;  %v2935_v0 = vpack.c.bf16 %v5380_v60, %v5375_v55  ;;  %v5387_v3 = vmul.f32 %v4612_v61, %v2852_v56 }
 0xfc6   : > { %4375 = vmatprep.mubr.msk.bf16.mxu1 %vm236_vm2, %v2935_v0  ;;  %v2936_v6 = vpack.c.bf16 %v5387_v3, %v5382_v62 }
 0xfc8   : > { %4376 = vmatmul.mubr.msk.bf16.vlgmr.msra.gmra.mrb[0].mxu1 %vm236_vm2, %v2936_v6 }
0x1097   : > { %v4373_v9 = vpop.f32.mrb[0].mxu0 }
0x1098   : > { %v3002_v10 = vadd.f32 %v4373_v9, %v4076_v8  ;;  %v2993_v11 = vpop.f32.mrb[1].mxu0  ;;  %v4761_v9 = vmov 0  }
0x1099   : > { %v2994_v58 = vadd.f32 %v4076_v8, %v2993_v11  ;;  %v4374_v14 = vpop.f32.mrb[2].mxu0  ;;  %4580 = vset.pattern.permute.xlu1 %v4761_v9  ;;  %4579 = vset.pattern.permute.xlu0 %v4761_v9 }
0x109a   : > { %v3005_v16 = vadd.f32 %v4374_v14, %v4076_v8  ;;  %v2996_v17 = vpop.f32.mrb[3].mxu0  ;;  %v3026_v18 = vmax.f32 %v3002_v10, 0.0 }
0x109b   : > { %v4377_v19 = vpop.f32.mrb[0].mxu1  ;;  %v2997_v20 = vadd.f32 %v4076_v8, %v2996_v17  ;;  %v3024_v21 = vmax.f32 %v2994_v58, 0.0 }
0x109c   : > { %v3027_v22 = vmax.f32 %v3005_v16, 0.0  ;;  %v3009_v24 = vpop.f32.mrb[1].mxu1  ;;  %v3038_v25 = vmul.f32 %v4844_v12, %v3026_v18  ;;  %v3018_v23 = vadd.f32 %v4377_v19, %v4076_v8 }
0x109d   : > { %v3010_v26 = vadd.f32 %v4076_v8, %v3009_v24  ;;  %v4378_v27 = vpop.f32.mrb[2].mxu1  ;;  %v3036_v51 = vmul.f32 %v4844_v12, %v3024_v21  ;;  %v3025_v33 = vmax.f32 %v2997_v20, 0.0 }
0x109e   : > { %v3021_v28 = vadd.f32 %v4378_v27, %v4076_v8  ;;  %v3012_v29 = vpop.f32.mrb[3].mxu1  ;;  %v3050_v30 = vsel %vm98_vm0, %v3038_v25, 0.0  ;;  %v3039_v31 = vmul.f32 %v4844_v12, %v3027_v22  ;;  %v3030_v38 = vmax.f32 %v3018_v23, 0.0 }
0x109f   : > { %v3028_v32 = vmax.f32 %v3010_v26, 0.0  ;;  %v3013_v35 = vadd.f32 %v4076_v8, %v3012_v29  ;;  %3051 = vadd.xlane.f32.xlu1 %v3050_v30  ;;  %v3044_v37 = vsel %vm98_vm0, %v3036_v51, 0.0  ;;  %v3037_v56 = vmul.f32 %v4844_v12, %v3025_v33 }
0x10a0   : > { %3045 = vadd.xlane.f32.xlu0 %v3044_v37  ;;  %v3031_v48 = vmax.f32 %v3021_v28, 0.0  ;;  %v3053_v52 = vsel %vm98_vm0, %v3039_v31, 0.0  ;;  %v3042_v0 = vmul.f32 %v4844_v12, %v3030_v38 }
0x10a1   : > { %v3029_v40 = vmax.f32 %v3013_v35, 0.0  ;;  %v3040_v44 = vmul.f32 %v4844_v12, %v3028_v32  ;;  %v3047_v61 = vsel %vm98_vm0, %v3037_v56, 0.0 }
0x10a2   : > { %v3043_v59 = vmul.f32 %v4844_v12, %v3031_v48  ;;  %v3062_v8 = vsel %vm98_vm0, %v3042_v0, 0.0 }
0x10a3   : > { %3054 = vadd.xlane.f32.xlu1 %v3053_v52  ;;  %v3056_v50 = vsel %vm98_vm0, %v3040_v44, 0.0  ;;  %v3041_v54 = vmul.f32 %v4844_v12, %v3029_v40 }
0x10a4   : > { %3057 = vadd.xlane.f32.xlu0 %v3056_v50  ;;  %v3065_v6 = vsel %vm98_vm0, %v3043_v59, 0.0 }
0x10a5   : > { %v3059_v57 = vsel %vm98_vm0, %v3041_v54, 0.0 }
0x10a7   : > { %3060 = vadd.xlane.f32.xlu1 %v3059_v57 }
0x10a8   : > { %3048 = vadd.xlane.f32.xlu0 %v3047_v61 }
0x10ab   : > { %3066 = vadd.xlane.f32.xlu1 %v3065_v6 }
0x10ac   : > { %3063 = vadd.xlane.f32.xlu0 %v3062_v8 }
0x112c   : > { %v3052_v10 = vpop.xlane.xlu1 %3051 }
0x112d   : > { %v3046_v11 = vpop.xlane.xlu0 %3045  ;;  %v3074_v22 = vadd.f32 %v4849_v13, %v3052_v10 }
0x112e   : > { %v3072_v24 = vadd.f32 %v4849_v13, %v3046_v11 }
0x112f   : > { %v3083_v33 = vsel %vm719_vm4, %v3074_v22, -inf }
0x1130   : > { %v3055_v58 = vpop.xlane.xlu1 %3054  ;;  %v3081_v35 = vsel %vm719_vm4, %v3072_v24, -inf }
0x1131   : > { %v3058_v14 = vpop.xlane.xlu0 %3057  ;;  %v3075_v21 = vadd.f32 %v4849_v13, %v3055_v58 }
0x1132   : > { %v3076_v19 = vadd.f32 %v4849_v13, %v3058_v14 }
0x1133   : > { %v3084_v30 = vsel %vm719_vm4, %v3075_v21, -inf }
0x1134   : > { %v3061_v16 = vpop.xlane.xlu1 %3060  ;;  %v3085_v28 = vsel %vm719_vm4, %v3076_v19, -inf }
0x1135   : > { %v3077_v17 = vadd.f32 %v4849_v13, %v3061_v16  ;;  %v3049_v18 = vpop.xlane.xlu0 %3048  ;;  %v3086_v44 = vmax.f32 %v3081_v35, %v3085_v28 }
0x1136   : > { %v3073_v20 = vadd.f32 %v4849_v13, %v3049_v18 }
0x1137   : > { %v3087_v25 = vsel %vm719_vm4, %v3077_v17, -inf }
0x1138   : > { %v3082_v26 = vsel %vm719_vm4, %v3073_v20, -inf  ;;  %v3067_v27 = vpop.xlane.xlu1 %3066 }
0x1139   : > { %v3079_v51 = vadd.f32 %v4849_v13, %v3067_v27  ;;  %v3064_v23 = vpop.xlane.xlu0 %3063  ;;  %v3088_v31 = vmax.f32 %v3082_v26, %v3087_v25 }
0x113a   : > { %v3078_v29 = vadd.f32 %v4849_v13, %v3064_v23 }
0x113b   : > { %v3091_v32 = vsel %vm719_vm4, %v3079_v51, -inf  ;;  %v3093_v52 = vmax.f32 %v3086_v44, %v3088_v31 }
0x113c   : > { %v3092_v37 = vmax.f32 %v3084_v30, %v3091_v32  ;;  %v3089_v40 = vsel %vm719_vm4, %v3078_v29, -inf }
0x113d   : > { %v3090_v48 = vmax.f32 %v3083_v33, %v3089_v40 }
0x113f   : > { %v3094_v38 = vmax.f32 %v3090_v48, %v3092_v37 }
0x1141   : > { %v3095_v50 = vmax.f32 %v3093_v52, %v3094_v38 }
0x1143   : > { %v3096_v54 = vrot.slane %v3095_v50, 4 }
0x1145   : > { %v3097_v56 = vmax.f32 %v3095_v50, %v3096_v54 }
0x1147   : > { %v3098_v57 = vrot.slane %v3097_v56, 2 }
0x1149   : > { %v3099_v59 = vmax.f32 %v3097_v56, %v3098_v57 }
0x114b   : > { %v3100_v61 = vrot.slane %v3099_v59, 1 }
0x114d   : > { %v3101_v0 = vmax.f32 %v3099_v59, %v3100_v61 }
0x114f   : > { %v3102_v6 = vsub.f32 %v3072_v24, %v3101_v0  ;;  %v3103_v8 = vsub.f32 %v3073_v20, %v3101_v0  ;;  %v3104_v9 = vsub.f32 %v3074_v22, %v3101_v0  ;;  %v3105_v10 = vsub.f32 %v3075_v21, %v3101_v0 }
0x1150   : > { %v3106_v58 = vsub.f32 %v3076_v19, %v3101_v0  ;;  %v3107_v18 = vsub.f32 %v3077_v17, %v3101_v0  ;;  %v3108_v26 = vsub.f32 %v3078_v29, %v3101_v0  ;;  %v3109_v23 = vsub.f32 %v3079_v51, %v3101_v0 }
0x1151   : > { %v3110_v11 = vmul.f32 1.442695, %v3102_v6  ;;  %v3112_v14 = vmul.f32 1.442695, %v3103_v8  ;;  %v3114_v16 = vmul.f32 1.442695, %v3104_v9 }
0x1152   : > { %v3116_v25 = vmul.f32 1.442695, %v3105_v10  ;;  %v3118_v27 = vmul.f32 1.442695, %v3106_v58  ;;  %v3120_v28 = vmul.f32 1.442695, %v3107_v18 }
0x1153   : > { %4613 = vpow2.f32 %v3110_v11  ;;  %v3122_v30 = vmul.f32 1.442695, %v3108_v26  ;;  %v3124_v20 = vmul.f32 1.442695, %v3109_v23 }
0x1154   : > { %4615 = vpow2.f32 %v3112_v14 }
0x1155   : > { %4617 = vpow2.f32 %v3114_v16 }
0x1156   : > { %4619 = vpow2.f32 %v3116_v25 }
0x1157   : > { %4621 = vpow2.f32 %v3118_v27 }
0x1158   : > { %4623 = vpow2.f32 %v3120_v28 }
0x1159   : > { %4625 = vpow2.f32 %v3122_v30 }
0x115a   : > { %4627 = vpow2.f32 %v3124_v20 }
0x115d   : > { %v4614_v21 = vpop.eup %4613 }
0x115e   : > { %v4616_v22 = vpop.eup %4615  ;;  %v3126_v19 = vsel %vm719_vm4, %v4614_v21, 0.0 }
0x115f   : > { %v4618_v17 = vpop.eup %4617  ;;  %v3127_v24 = vsel %vm719_vm4, %v4616_v22, 0.0 }
0x1160   : > { %v4620_v29 = vpop.eup %4619  ;;  %v3128_v31 = vadd.f32 %v3127_v24, %v3126_v19  ;;  %v3129_v32 = vsel %vm719_vm4, %v4618_v17, 0.0 }
0x1161   : > { %v4622_v51 = vpop.eup %4621  ;;  %v3131_v35 = vsel %vm719_vm4, %v4620_v29, 0.0 }
0x1162   : > { %v3130_v33 = vadd.f32 %v3129_v32, %v3128_v31  ;;  %v4624_v37 = vpop.eup %4623  ;;  %v3133_v44 = vsel %vm719_vm4, %v4622_v51, 0.0 }
0x1163   : > { %v4626_v48 = vpop.eup %4625  ;;  %v3135_v38 = vsel %vm719_vm4, %v4624_v37, 0.0 }
0x1164   : > { %v3132_v40 = vadd.f32 %v3131_v35, %v3130_v33  ;;  %v4628_v50 = vpop.eup %4627  ;;  %v3137_v56 = vsel %vm719_vm4, %v4626_v48, 0.0 }
0x1165   : > { %v3139_v59 = vsel %vm719_vm4, %v4628_v50, 0.0 }
0x1166   : > { %v3134_v52 = vadd.f32 %v3133_v44, %v3132_v40 }
0x1168   : > { %v3136_v54 = vadd.f32 %v3135_v38, %v3134_v52 }
0x116a   : > { %v3138_v57 = vadd.f32 %v3137_v56, %v3136_v54 }
0x116c   : > { %v3140_v61 = vadd.f32 %v3139_v59, %v3138_v57 }
0x116e   : > { %v3141_v0 = vrot.slane %v3140_v61, 4 }
0x1170   : > { %v3142_v6 = vadd.f32 %v3141_v0, %v3140_v61 }
0x1172   : > { %v3143_v8 = vrot.slane %v3142_v6, 2 }
0x1174   : > { %v3144_v9 = vadd.f32 %v3143_v8, %v3142_v6 }
0x1176   : > { %v3145_v10 = vrot.slane %v3144_v9, 1 }
0x1178   : > { %v3146_v11 = vadd.f32 %v3145_v10, %v3144_v9 }
0x117a   : > { %4629 = vrcp.f32 %v3146_v11 }
0x1184   : > { %v4630_v58 = vpop.eup %4629 }
0x1185   : > { %v3149_v14 = vmul.f32 %v4630_v58, %v4616_v22  ;;  %v3148_v16 = vmul.f32 %v4630_v58, %v4614_v21  ;;  %v3150_v18 = vmul.f32 %v4630_v58, %v4618_v17  ;;  %v3151_v25 = vmul.f32 %v4630_v58, %v4620_v29 }
0x1186   : > { %v3152_v26 = vmul.f32 %v4630_v58, %v4622_v51  ;;  %v3153_v27 = vmul.f32 %v4630_v58, %v4624_v37  ;;  %v3154_v23 = vmul.f32 %v4630_v58, %v4626_v48  ;;  %v3155_v28 = vmul.f32 %v4630_v58, %v4628_v50 }
0x1187   : > { %3163 = vperm.xlu1 %4580, %v3149_v14   ;;  %3158 = vperm.xlu0 %4579, %v3148_v16  }
0x118b   : > { %3168 = vperm.xlu1 %4580, %v3150_v18  }
0x118f   : > { %3173 = vperm.xlu1 %4580, %v3151_v25  }
0x1193   : > { %3178 = vperm.xlu1 %4580, %v3152_v26  }
0x1197   : > { %3183 = vperm.xlu1 %4580, %v3153_v27  }
0x119b   : > { %3188 = vperm.xlu1 %4580, %v3154_v23  }
0x119f   : > { %3193 = vperm.xlu1 %4580, %v3155_v28  }
0x1206   : > { %v3164_v30 = vpop.permute.xlu1 %3163  ;;  %v3159_v19 = vpop.permute.xlu0 %3158 }
0x1207   : > { %v3197_v21 = vmul.f32 %v3164_v30, %v5367_v39  ;;  %v3196_v22 = vmul.f32 %v3159_v19, %v5365_v34 }
0x1209   : > { %v3205_v31 = vsel %vm236_vm2, %v3197_v21, 0.0  ;;  %v3204_v32 = vsel %vm236_vm2, %v3196_v22, 0.0 }
0x120a   : > { %v3169_v20 = vpop.permute.xlu1 %3168  ;;  %v3206_v37 = vadd.f32 %v3205_v31, %v3204_v32 }
0x120b   : > { %v3198_v17 = vmul.f32 %v3169_v20, %v5369_v45 }
0x120d   : > { %v3207_v33 = vsel %vm236_vm2, %v3198_v17, 0.0 }
0x120e   : > { %v3174_v24 = vpop.permute.xlu1 %3173  ;;  %v3208_v34 = vadd.f32 %v3207_v33, %v3206_v37 }
0x120f   : > { %v3199_v51 = vmul.f32 %v3174_v24, %v5373_v53 }
0x1211   : > { %v3209_v44 = vsel %vm236_vm2, %v3199_v51, 0.0 }
0x1212   : > { %v3179_v29 = vpop.permute.xlu1 %3178  ;;  %v3210_v48 = vadd.f32 %v3209_v44, %v3208_v34 }
0x1213   : > { %v3200_v35 = vmul.f32 %v3179_v29, %v5375_v55 }
0x1215   : > { %v3211_v45 = vsel %vm236_vm2, %v3200_v35, 0.0 }
0x1216   : > { %v3184_v40 = vpop.permute.xlu1 %3183  ;;  %v3212_v50 = vadd.f32 %v3211_v45, %v3210_v48 }
0x1217   : > { %v3201_v39 = vmul.f32 %v3184_v40, %v5380_v60 }
0x1219   : > { %v3213_v38 = vsel %vm236_vm2, %v3201_v39, 0.0 }
0x121a   : > { %v3189_v52 = vpop.permute.xlu1 %3188  ;;  %v3214_v55 = vadd.f32 %v3213_v38, %v3212_v50 }
0x121b   : > { %v3202_v53 = vmul.f32 %v3189_v52, %v5382_v62 }
0x121d   : > { %v3215_v54 = vsel %vm236_vm2, %v3202_v53, 0.0 }
0x121e   : > { %v3194_v56 = vpop.permute.xlu1 %3193  ;;  %v3216_v59 = vadd.f32 %v3215_v54, %v3214_v55 }
0x121f   : > { %v3203_v57 = vmul.f32 %v3194_v56, %v5387_v3 }
0x1221   : > { %v3217_v60 = vsel %vm236_vm2, %v3203_v57, 0.0 }
0x1222   : > { %v3218_v61 = vadd.f32 %v3217_v60, %v3216_v59 }
0x1224   : > { %v3219_v0 = vrot.slane %v3218_v61, 4 }
0x1226   : > { %v3220_v6 = vadd.f32 %v3219_v0, %v3218_v61 }
0x1228   : > { %v3221_v8 = vrot.slane %v3220_v6, 2 }
0x122a   : > { %v3222_v9 = vadd.f32 %v3221_v8, %v3220_v6  ;;  %2843 = sbr.rel (!%p2841_p2) target bundleno = 3994 (0xf9a), region = 101 }
0x122c   : > { %v3223_v10 = vrot.slane %v3222_v9, 1 }
0x122e   : > { %v3224_v11 = vadd.f32 %v3223_v10, %v3222_v9 }
0x1230   : > { %3227 = vst.msk [vmem:[%s3225_s10] sm:$0x1] %vm873_vm5, %v3224_v11 }
0x1231 LB: > { %4379 = vmatprep.subr.bf16.mxu0 %v5358_v36  ;;  %4417 = vmatprep.subr.bf16.mxu1 %v5358_v36  ;;  %v3243_v62 = vld [vmem:[#allocation4 + $0x40] sm:$0xff]  ;;  %v3244_v3 = vld [vmem:[#allocation4 + $0x48] sm:$0xff]  ;;  %v3245_v58 = vld [vmem:[#allocation4 + $0x50] sm:$0xff]  ;;  %s3952_s12 = scalar_lea.vmem [#allocation7], %s4740_s11  ;;  %s3954_s13 = scalar_lea.vmem [#allocation5], %s4740_s11  ;;  %s4740_s11 = sphi %s5455_s11, %s3233_s11  }
0x1232   : > { %4380 = vmatpush3.bf16.msra.mxu0 %v5358_v36  ;;  %4418 = vmatpush3.bf16.msra.mxu1 %v5358_v36  ;;  %v3246_v14 = vld [vmem:[#allocation4 + $0x58] sm:$0xff]  ;;  %v4083_v1 = vld [vmem:[%s3952_s12 + $0x6] ss:$0 sm:$0xff]  ;;  %v3248_v27 = vld [vmem:[#allocation4 + $0x68] sm:$0xff]  ;;  %s3956_s14 = scalar_lea.vmem [#allocation9], %s4740_s11  ;;  %s3233_s11 = sadd.s32 1, %s4740_s11  }
0x1233   : > { %v3247_v2 = vld [vmem:[#allocation4 + $0x60] sm:$0xff]  ;;  %v3257_v16 = vadd.f32 %v4083_v1, %v3243_v62  ;;  %v3258_v18 = vadd.f32 %v4083_v1, %v3244_v3  ;;  %v3259_v25 = vadd.f32 %v4083_v1, %v3245_v58  ;;  %v3260_v26 = vadd.f32 %v4083_v1, %v3246_v14  ;;  %v3249_v30 = vld [vmem:[#allocation4 + $0x70] sm:$0xff]  ;;  %v3250_v20 = vld [vmem:[#allocation4 + $0x78] sm:$0xff]  ;;  %p3230_p3 = scmp.ge.s32.totalorder %s3233_s11, 6  }
0x1234   : > { %v3261_v23 = vadd.f32 %v4083_v1, %v3247_v2  ;;  %v3262_v28 = vadd.f32 %v4083_v1, %v3248_v27  ;;  %v3263_v22 = vadd.f32 %v4083_v1, %v3249_v30  ;;  %v3264_v29 = vadd.f32 %v4083_v1, %v3250_v20  ;;  %v3235_v59 = vld [vmem:[#allocation2 + $0x40] sm:$0xff]  ;;  %v3236_v60 = vld [vmem:[#allocation2 + $0x48] sm:$0xff]  ;;  %v3237_v0 = vld [vmem:[#allocation2 + $0x50] sm:$0xff]  ;;  %4389 = vmatprep.subr.bf16.mxu1 (%p3230_p3), %v4742_v15 }
0x1235   : > { %v4084_v19 = vmul.f32 -1.442695, %v3257_v16  ;;  %v4085_v24 = vmul.f32 -1.442695, %v3258_v18  ;;  %v4086_v21 = vmul.f32 -1.442695, %v3259_v25  ;;  %4403 = vmatprep.subr.bf16.mxu0 (%p3230_p3), %v4742_v15 }
0x1236   : > { %v4087_v17 = vmul.f32 -1.442695, %v3260_v26  ;;  %v4088_v31 = vmul.f32 -1.442695, %v3261_v23  ;;  %v4089_v32 = vmul.f32 -1.442695, %v3262_v28 }
0x1237   : > { %4633 = vpow2.f32 %v4084_v19  ;;  %v4090_v51 = vmul.f32 -1.442695, %v3263_v22  ;;  %v4091_v33 = vmul.f32 -1.442695, %v3264_v29  ;;  %v3238_v9 = vld [vmem:[#allocation2 + $0x58] sm:$0xff]  ;;  %v3239_v62 = vld [vmem:[#allocation2 + $0x60] sm:$0xff] }
0x1238   : > { %4635 = vpow2.f32 %v4085_v24  ;;  %v3240_v14 = vld [vmem:[#allocation2 + $0x68] sm:$0xff]  ;;  %v3241_v18 = vld [vmem:[#allocation2 + $0x70] sm:$0xff]  ;;  %v3242_v27 = vld [vmem:[#allocation2 + $0x78] sm:$0xff] }
0x1239   : > { %4637 = vpow2.f32 %v4086_v21 }
0x123a   : > { %4639 = vpow2.f32 %v4087_v17  ;;  %v4093_v17 = vld [vmem:[%s3954_s13 + $0x6] ss:$0 sm:$0xff] }
0x123b   : > { %4641 = vpow2.f32 %v4088_v31 }
0x123c   : > { %4643 = vpow2.f32 %v4089_v32 }
0x123d   : > { %4645 = vpow2.f32 %v4090_v51 }
0x123e   : > { %4647 = vpow2.f32 %v4091_v33 }
0x1241   : > { %v4634_v35 = vpop.eup %4633 }
0x1242   : > { %v4636_v37 = vpop.eup %4635  ;;  %v3289_v40 = vadd.f32 1.0, %v4634_v35 }
0x1243   : > { %v4638_v44 = vpop.eup %4637  ;;  %v3290_v39 = vadd.f32 1.0, %v4636_v37 }
0x1244   : > { %v4640_v34 = vpop.eup %4639  ;;  %4649 = vrcp.f32 %v3289_v40  ;;  %v3291_v45 = vadd.f32 1.0, %v4638_v44 }
0x1245   : > { %v4642_v48 = vpop.eup %4641  ;;  %4651 = vrcp.f32 %v3290_v39  ;;  %v3292_v52 = vadd.f32 1.0, %v4640_v34 }
0x1246   : > { %v4644_v38 = vpop.eup %4643  ;;  %4653 = vrcp.f32 %v3291_v45  ;;  %v3293_v53 = vadd.f32 1.0, %v4642_v48 }
0x1247   : > { %v4646_v50 = vpop.eup %4645  ;;  %4655 = vrcp.f32 %v3292_v52  ;;  %v3294_v54 = vadd.f32 1.0, %v4644_v38 }
0x1248   : > { %v4648_v55 = vpop.eup %4647  ;;  %4657 = vrcp.f32 %v3293_v53  ;;  %v3295_v56 = vadd.f32 1.0, %v4646_v50 }
0x1249   : > { %4659 = vrcp.f32 %v3294_v54  ;;  %v3296_v57 = vadd.f32 1.0, %v4648_v55 }
0x124a   : > { %4661 = vrcp.f32 %v3295_v56 }
0x124b   : > { %4663 = vrcp.f32 %v3296_v57 }
0x124e   : > { %v4650_v61 = vpop.eup %4649 }
0x124f   : > { %v4652_v6 = vpop.eup %4651  ;;  %v5465_v8 = vmul.f32 %v4650_v61, %v3235_v59 }
0x1250   : > { %v4654_v10 = vpop.eup %4653  ;;  %v5467_v11 = vmul.f32 %v4652_v6, %v3236_v60 }
0x1251   : > { %v4656_v3 = vpop.eup %4655  ;;  %v5469_v58 = vmul.f32 %v4654_v10, %v3237_v0 }
0x1252   : > { %v4658_v1 = vpop.eup %4657  ;;  %v3323_v2 = vpack.c.bf16 %v5467_v11, %v5465_v8  ;;  %v5473_v16 = vmul.f32 %v4656_v3, %v3238_v9 }
0x1253   : > { %v4660_v25 = vpop.eup %4659  ;;  %v5475_v26 = vmul.f32 %v4658_v1, %v3239_v62 }
0x1254   : > { %v4662_v23 = vpop.eup %4661  ;;  %4381 = vmatprep.mubr.msk.bf16.mxu0 %vm236_vm2, %v3323_v2  ;;  %v3324_v28 = vpack.c.bf16 %v5473_v16, %v5469_v58  ;;  %v5480_v30 = vmul.f32 %v4660_v25, %v3240_v14 }
0x1255   : > { %v4664_v20 = vpop.eup %4663  ;;  %v5482_v19 = vmul.f32 %v4662_v23, %v3241_v18 }
0x1256   : > { %4382 = vmatmul.mubr.msk.bf16.vlgmr.msra.gmra.mrb[0].mxu0 %vm236_vm2, %v3324_v28  ;;  %v3325_v24 = vpack.c.bf16 %v5480_v30, %v5475_v26  ;;  %v5487_v21 = vmul.f32 %v4664_v20, %v3242_v27 }
0x1257   :  { %4411 = vmatprep.mubr.msk.bf16.mxu0 (%p3230_p3), %vm4743_vm1, %v4742_v15 }
0x1258   : > { %4385 = vmatprep.mubr.msk.bf16.mxu1 %vm236_vm2, %v3325_v24  ;;  %v3326_v22 = vpack.c.bf16 %v5487_v21, %v5482_v19 }
0x125a   : > { %4386 = vmatmul.mubr.msk.bf16.vlgmr.msra.gmra.mrb[0].mxu1 %vm236_vm2, %v3326_v22  ;;  %v4762_v22 = vmov 0  }
0x125b   : > { %4632 = vset.pattern.permute.xlu1 %v4762_v22  ;;  %4631 = vset.pattern.permute.xlu0 %v4762_v22 }
0x125c   :  { %4391 = vmatprep.mubr.msk.bf16.mxu1 (%p3230_p3), %vm4743_vm1, %v4742_v15 }
0x1329   : > { %v4383_v29 = vpop.f32.mrb[0].mxu0 }
0x132a   : > { %v3392_v31 = vadd.f32 %v4383_v29, %v4093_v17  ;;  %v3383_v32 = vpop.f32.mrb[1].mxu0 }
0x132b   : > { %v3384_v51 = vadd.f32 %v4093_v17, %v3383_v32  ;;  %v4384_v33 = vpop.f32.mrb[2].mxu0 }
0x132c   : > { %v3395_v35 = vadd.f32 %v4384_v33, %v4093_v17  ;;  %v3386_v37 = vpop.f32.mrb[3].mxu0  ;;  %v3416_v40 = vmax.f32 %v3392_v31, 0.0 }
0x132d   : > { %v4387_v44 = vpop.f32.mrb[0].mxu1  ;;  %v3387_v39 = vadd.f32 %v4093_v17, %v3386_v37  ;;  %v3414_v34 = vmax.f32 %v3384_v51, 0.0 }
0x132e   : > { %v3417_v45 = vmax.f32 %v3395_v35, 0.0  ;;  %v3399_v48 = vpop.f32.mrb[1].mxu1  ;;  %v3428_v52 = vmul.f32 %v4844_v12, %v3416_v40  ;;  %v3408_v54 = vadd.f32 %v4387_v44, %v4093_v17 }
0x132f   : > { %v3400_v38 = vadd.f32 %v4093_v17, %v3399_v48  ;;  %v4388_v53 = vpop.f32.mrb[2].mxu1  ;;  %v3426_v50 = vmul.f32 %v4844_v12, %v3414_v34  ;;  %v3415_v61 = vmax.f32 %v3387_v39, 0.0 }
0x1330   : > { %v3411_v55 = vadd.f32 %v4388_v53, %v4093_v17  ;;  %v3402_v56 = vpop.f32.mrb[3].mxu1  ;;  %v3440_v57 = vsel %vm98_vm0, %v3428_v52, 0.0  ;;  %v3429_v59 = vmul.f32 %v4844_v12, %v3417_v45  ;;  %v3420_v14 = vmax.f32 %v3408_v54, 0.0 }
0x1331   : > { %v3418_v60 = vmax.f32 %v3400_v38, 0.0  ;;  %v3403_v0 = vadd.f32 %v4093_v17, %v3402_v56  ;;  %3441 = vadd.xlane.f32.xlu1 %v3440_v57  ;;  %v3434_v6 = vsel %vm98_vm0, %v3426_v50, 0.0  ;;  %v3427_v18 = vmul.f32 %v4844_v12, %v3415_v61 }
0x1332   : > { %3435 = vadd.xlane.f32.xlu0 %v3434_v6  ;;  %v3421_v62 = vmax.f32 %v3411_v55, 0.0  ;;  %v3443_v3 = vsel %vm98_vm0, %v3429_v59, 0.0  ;;  %v3432_v28 = vmul.f32 %v4844_v12, %v3420_v14 }
0x1333   : > { %v3419_v9 = vmax.f32 %v3403_v0, 0.0  ;;  %v3430_v10 = vmul.f32 %v4844_v12, %v3418_v60  ;;  %v3437_v23 = vsel %vm98_vm0, %v3427_v18, 0.0 }
0x1334   : > { %v3433_v27 = vmul.f32 %v4844_v12, %v3421_v62  ;;  %v3452_v24 = vsel %vm98_vm0, %v3432_v28, 0.0 }
0x1335   : > { %3444 = vadd.xlane.f32.xlu1 %v3443_v3  ;;  %v3446_v1 = vsel %vm98_vm0, %v3430_v10, 0.0  ;;  %v3431_v2 = vmul.f32 %v4844_v12, %v3419_v9  ;;  %v4100_v12 = vld [vmem:[%s5644_s4 + $0x5] ss:$0 sm:$0xff] (%p3230_p3) }
0x1336   : > { %3447 = vadd.xlane.f32.xlu0 %v3446_v1  ;;  %v3455_v20 = vsel %vm98_vm0, %v3433_v27, 0.0 }
0x1337   : > { %v3449_v25 = vsel %vm98_vm0, %v3431_v2, 0.0 }
0x1339   : > { %3450 = vadd.xlane.f32.xlu1 %v3449_v25 }
0x133a   : > { %3438 = vadd.xlane.f32.xlu0 %v3437_v23 }
0x133d   : > { %3456 = vadd.xlane.f32.xlu1 %v3455_v20 }
0x133e   : > { %3453 = vadd.xlane.f32.xlu0 %v3452_v24 }
0x13be   : > { %v3442_v17 = vpop.xlane.xlu1 %3441 }
0x13bf   : > { %v3436_v29 = vpop.xlane.xlu0 %3435  ;;  %v3464_v39 = vadd.f32 %v4849_v13, %v3442_v17 }
0x13c0   : > { %v3462_v34 = vadd.f32 %v4849_v13, %v3436_v29 }
0x13c1   : > { %v3473_v59 = vsel %vm719_vm4, %v3464_v39, -inf }
0x13c2   : > { %v3445_v31 = vpop.xlane.xlu1 %3444  ;;  %v3471_v60 = vsel %vm719_vm4, %v3462_v34, -inf }
0x13c3   : > { %v3448_v32 = vpop.xlane.xlu0 %3447  ;;  %v3465_v44 = vadd.f32 %v4849_v13, %v3445_v31 }
0x13c4   : > { %v3466_v37 = vadd.f32 %v4849_v13, %v3448_v32 }
0x13c5   : > { %v3474_v55 = vsel %vm719_vm4, %v3465_v44, -inf }
0x13c6   : > { %v3451_v51 = vpop.xlane.xlu1 %3450  ;;  %v3475_v50 = vsel %vm719_vm4, %v3466_v37, -inf }
0x13c7   : > { %v3467_v33 = vadd.f32 %v4849_v13, %v3451_v51  ;;  %v3439_v35 = vpop.xlane.xlu0 %3438  ;;  %v3476_v6 = vmax.f32 %v3471_v60, %v3475_v50 }
0x13c8   : > { %v3463_v40 = vadd.f32 %v4849_v13, %v3439_v35 }
0x13c9   : > { %v3477_v45 = vsel %vm719_vm4, %v3467_v33, -inf }
0x13ca   : > { %v3472_v48 = vsel %vm719_vm4, %v3463_v40, -inf  ;;  %v3457_v52 = vpop.xlane.xlu1 %3456 }
0x13cb   : > { %v3469_v38 = vadd.f32 %v4849_v13, %v3457_v52  ;;  %v3454_v53 = vpop.xlane.xlu0 %3453  ;;  %v3478_v56 = vmax.f32 %v3472_v48, %v3477_v45 }
0x13cc   : > { %v3468_v54 = vadd.f32 %v4849_v13, %v3454_v53 }
0x13cd   : > { %v3481_v57 = vsel %vm719_vm4, %v3469_v38, -inf  ;;  %v3483_v10 = vmax.f32 %v3476_v6, %v3478_v56 }
0x13ce   : > { %v3482_v61 = vmax.f32 %v3474_v55, %v3481_v57  ;;  %v3479_v0 = vsel %vm719_vm4, %v3468_v54, -inf }
0x13cf   : > { %v3480_v9 = vmax.f32 %v3473_v59, %v3479_v0 }
0x13d1   : > { %v3484_v62 = vmax.f32 %v3480_v9, %v3482_v61 }
0x13d3   : > { %v3485_v3 = vmax.f32 %v3483_v10, %v3484_v62 }
0x13d5   : > { %v3486_v14 = vrot.slane %v3485_v3, 4 }
0x13d7   : > { %v3487_v1 = vmax.f32 %v3485_v3, %v3486_v14 }
0x13d9   : > { %v3488_v2 = vrot.slane %v3487_v1, 2 }
0x13db   : > { %v3489_v18 = vmax.f32 %v3487_v1, %v3488_v2 }
0x13dd   : > { %v3490_v25 = vrot.slane %v3489_v18, 1 }
0x13df   : > { %v3491_v27 = vmax.f32 %v3489_v18, %v3490_v25 }
0x13e1   : > { %v3492_v23 = vsub.f32 %v3462_v34, %v3491_v27  ;;  %v3493_v28 = vsub.f32 %v3463_v40, %v3491_v27  ;;  %v3494_v20 = vsub.f32 %v3464_v39, %v3491_v27  ;;  %v3495_v24 = vsub.f32 %v3465_v44, %v3491_v27 }
0x13e2   : > { %v3496_v17 = vsub.f32 %v3466_v37, %v3491_v27  ;;  %v3497_v32 = vsub.f32 %v3467_v33, %v3491_v27  ;;  %v3498_v35 = vsub.f32 %v3468_v54, %v3491_v27  ;;  %v3499_v48 = vsub.f32 %v3469_v38, %v3491_v27 }
0x13e3   : > { %v3500_v22 = vmul.f32 1.442695, %v3492_v23  ;;  %v3502_v29 = vmul.f32 1.442695, %v3493_v28  ;;  %v3504_v31 = vmul.f32 1.442695, %v3494_v20 }
0x13e4   : > { %v3506_v51 = vmul.f32 1.442695, %v3495_v24  ;;  %v3508_v45 = vmul.f32 1.442695, %v3496_v17  ;;  %v3510_v52 = vmul.f32 1.442695, %v3497_v32 }
0x13e5   : > { %4665 = vpow2.f32 %v3500_v22  ;;  %v3512_v53 = vmul.f32 1.442695, %v3498_v35  ;;  %v3514_v40 = vmul.f32 1.442695, %v3499_v48 }
0x13e6   : > { %4667 = vpow2.f32 %v3502_v29 }
0x13e7   : > { %4669 = vpow2.f32 %v3504_v31 }
0x13e8   : > { %4671 = vpow2.f32 %v3506_v51 }
0x13e9   : > { %4673 = vpow2.f32 %v3508_v45 }
0x13ea   : > { %4675 = vpow2.f32 %v3510_v52 }
0x13eb   : > { %4677 = vpow2.f32 %v3512_v53 }
0x13ec   : > { %4679 = vpow2.f32 %v3514_v40 }
0x13ef   : > { %v4666_v44 = vpop.eup %4665 }
0x13f0   : > { %v4668_v39 = vpop.eup %4667  ;;  %v3516_v37 = vsel %vm719_vm4, %v4666_v44, 0.0 }
0x13f1   : > { %v4670_v33 = vpop.eup %4669  ;;  %v3517_v34 = vsel %vm719_vm4, %v4668_v39, 0.0 }
0x13f2   : > { %v4672_v50 = vpop.eup %4671  ;;  %v3518_v54 = vadd.f32 %v3517_v34, %v3516_v37  ;;  %v3519_v55 = vsel %vm719_vm4, %v4670_v33, 0.0 }
0x13f3   : > { %v4674_v38 = vpop.eup %4673  ;;  %v3521_v57 = vsel %vm719_vm4, %v4672_v50, 0.0 }
0x13f4   : > { %v3520_v56 = vadd.f32 %v3519_v55, %v3518_v54  ;;  %v4676_v59 = vpop.eup %4675  ;;  %v3523_v61 = vsel %vm719_vm4, %v4674_v38, 0.0 }
0x13f5   : > { %v4678_v0 = vpop.eup %4677  ;;  %v3525_v9 = vsel %vm719_vm4, %v4676_v59, 0.0 }
0x13f6   : > { %v3522_v60 = vadd.f32 %v3521_v57, %v3520_v56  ;;  %v4680_v10 = vpop.eup %4679  ;;  %v3527_v3 = vsel %vm719_vm4, %v4678_v0, 0.0 }
0x13f7   : > { %v3529_v1 = vsel %vm719_vm4, %v4680_v10, 0.0 }
0x13f8   : > { %v3524_v6 = vadd.f32 %v3523_v61, %v3522_v60 }
0x13fa   : > { %v3526_v62 = vadd.f32 %v3525_v9, %v3524_v6 }
0x13fc   : > { %v3528_v14 = vadd.f32 %v3527_v3, %v3526_v62 }
0x13fe   : > { %v3530_v2 = vadd.f32 %v3529_v1, %v3528_v14 }
0x1400   : > { %v3531_v18 = vrot.slane %v3530_v2, 4 }
0x1402   : > { %v3532_v25 = vadd.f32 %v3531_v18, %v3530_v2 }
0x1404   : > { %v3533_v27 = vrot.slane %v3532_v25, 2 }
0x1406   : > { %v3534_v23 = vadd.f32 %v3533_v27, %v3532_v25 }
0x1408   : > { %v3535_v28 = vrot.slane %v3534_v23, 1 }
0x140a   : > { %v3536_v20 = vadd.f32 %v3535_v28, %v3534_v23 }
0x140c   : > { %4681 = vrcp.f32 %v3536_v20 }
0x1416   : > { %v4682_v24 = vpop.eup %4681 }
0x1417   : > { %v3539_v22 = vmul.f32 %v4682_v24, %v4668_v39  ;;  %v3538_v17 = vmul.f32 %v4682_v24, %v4666_v44  ;;  %v3540_v29 = vmul.f32 %v4682_v24, %v4670_v33  ;;  %v3541_v31 = vmul.f32 %v4682_v24, %v4672_v50 }
0x1418   : > { %v3542_v32 = vmul.f32 %v4682_v24, %v4674_v38  ;;  %v3543_v51 = vmul.f32 %v4682_v24, %v4676_v59  ;;  %v3544_v35 = vmul.f32 %v4682_v24, %v4678_v0  ;;  %v3545_v45 = vmul.f32 %v4682_v24, %v4680_v10 }
0x1419   : > { %3553 = vperm.xlu1 %4632, %v3539_v22   ;;  %3548 = vperm.xlu0 %4631, %v3538_v17  }
0x141d   : > { %3558 = vperm.xlu1 %4632, %v3540_v29  }
0x1421   : > { %3563 = vperm.xlu1 %4632, %v3541_v31  }
0x1425   : > { %3568 = vperm.xlu1 %4632, %v3542_v32  }
0x1429   : > { %3573 = vperm.xlu1 %4632, %v3543_v51  }
0x142d   : > { %3578 = vperm.xlu1 %4632, %v3544_v35  }
0x1431   : > { %3583 = vperm.xlu1 %4632, %v3545_v45  }
0x1498   : > { %v3554_v48 = vpop.permute.xlu1 %3553  ;;  %v3549_v53 = vpop.permute.xlu0 %3548 }
0x1499   : > { %v3587_v44 = vmul.f32 %v3554_v48, %v5467_v11  ;;  %v3586_v39 = vmul.f32 %v3549_v53, %v5465_v8 }
0x149b   : > { %v3595_v34 = vsel %vm236_vm2, %v3587_v44, 0.0  ;;  %v3594_v50 = vsel %vm236_vm2, %v3586_v39, 0.0 }
0x149c   : > { %v3559_v52 = vpop.permute.xlu1 %3558  ;;  %v3596_v56 = vadd.f32 %v3595_v34, %v3594_v50 }
0x149d   : > { %v3588_v37 = vmul.f32 %v3559_v52, %v5469_v58 }
0x149f   : > { %v3597_v55 = vsel %vm236_vm2, %v3588_v37, 0.0 }
0x14a0   : > { %v3564_v40 = vpop.permute.xlu1 %3563  ;;  %v3598_v8 = vadd.f32 %v3597_v55, %v3596_v56 }
0x14a1   : > { %v3589_v54 = vmul.f32 %v3564_v40, %v5473_v16 }
0x14a3   : > { %v3599_v59 = vsel %vm236_vm2, %v3589_v54, 0.0 }
0x14a4   : > { %v3569_v33 = vpop.permute.xlu1 %3568  ;;  %v3600_v60 = vadd.f32 %v3599_v59, %v3598_v8 }
0x14a5   : > { %v3590_v38 = vmul.f32 %v3569_v33, %v5475_v26 }
0x14a7   : > { %v3601_v58 = vsel %vm236_vm2, %v3590_v38, 0.0 }
0x14a8   : > { %v3574_v57 = vpop.permute.xlu1 %3573  ;;  %v3602_v6 = vadd.f32 %v3601_v58, %v3600_v60 }
0x14a9   : > { %v3591_v11 = vmul.f32 %v3574_v57, %v5480_v30 }
0x14ab   : > { %v3603_v0 = vsel %vm236_vm2, %v3591_v11, 0.0 }
0x14ac   : > { %v3579_v61 = vpop.permute.xlu1 %3578  ;;  %v3604_v26 = vadd.f32 %v3603_v0, %v3602_v6 }
0x14ad   : > { %v3592_v16 = vmul.f32 %v3579_v61, %v5482_v19  ;;  %v4683_v19 = vld [vmem:[%s5641_s3 + $0x38] sm:$0xff] (%p3230_p3)  }
0x14ae   :  { %4390 = vmatpush3.bf16.msra.mxu1 (%p3230_p3), %v4683_v19 }
0x14af   : > { %v3605_v9 = vsel %vm236_vm2, %v3592_v16, 0.0  ;;  %4395 = vmatprep.subr.bf16.mxu1 (%p3230_p3), %v4742_v15 }
0x14b0   : > { %v3584_v10 = vpop.permute.xlu1 %3583  ;;  %v3606_v3 = vadd.f32 %v3605_v9, %v3604_v26 }
0x14b1   : > { %v3593_v62 = vmul.f32 %v3584_v10, %v5487_v21 }
0x14b3   : > { %v3607_v30 = vsel %vm236_vm2, %v3593_v62, 0.0 }
0x14b4   : > { %v3608_v14 = vadd.f32 %v3607_v30, %v3606_v3 }
0x14b6   : > { %v3609_v1 = vrot.slane %v3608_v14, 4 }
0x14b8   : > { %v3610_v2 = vadd.f32 %v3609_v1, %v3608_v14 }
0x14ba   : > { %v3611_v18 = vrot.slane %v3610_v2, 2 }
0x14bc   : > { %v3612_v25 = vadd.f32 %v3611_v18, %v3610_v2  ;;  %3232 = sbr.rel (!%p3230_p3) target bundleno = 4657 (0x1231), region = 112 }
0x14be   : > { %v3613_v27 = vrot.slane %v3612_v25, 1 }
0x14c0   : > { %v3614_v23 = vadd.f32 %v3613_v27, %v3612_v25  ;;  %v4684_v27 = vld [vmem:[%s5641_s3 + $0x70] sm:$0xff] (%p3230_p3)  }
0x14c2   : > { %4099 = vst.msk [vmem:[%s3956_s14 + $0x6] sm:$0x1] %vm873_vm5, %v3614_v23 }
0x14c9   :  { %v3618_v21 = vld [vmem:[#allocation9] sm:$0xff]  ;;  %v3619_v28 = vld [vmem:[#allocation9 + $0x8] sm:$0xf] }
0x14ca   :  { %v3620_v20 = vpack.c.bf16 %v3619_v28, %v3618_v21  ;;  %v4687_v21 = vld [vmem:[%s5641_s3 + $0x88] sm:$0xff]  }
0x14cc   :  { %4392 = vmatmul.mubr.msk.bf16.vlgmr.msra.gmra.mrb[0].mxu1 %vm236_vm2, %v3620_v20 }
0x14cd   :  { %4399 = vmatprep.mubr.msk.bf16.mxu1 %vm4743_vm1, %v4742_v15  ;;  %4396 = vmatpush3.bf16.msra.mxu1 %v4684_v27 }
0x14ce   :  { %4397 = vmatprep.subr.bf16.mxu1 %v4742_v15 }
0x159f   :  { %v3671_v13 = vpop.f32.mrb[0].mxu1 }
0x15a0   :  { %v5571_v36 = vadd.f32 %v4100_v12, %v3671_v13  ;;  %v4393_v24 = vpop.f32.mrb[1].mxu1 }
0x15a1   :  { %v3674_v22 = vpop.f32.mrb[2].mxu1 }
0x15a2   :  { %v3678_v17 = vmax.f32 %v5571_v36, 0.0  ;;  %v5574_v29 = vadd.f32 %v4100_v12, %v3674_v22  ;;  %v4394_v31 = vpop.f32.mrb[3].mxu1 }
0x15a4   :  { %3682 = vrot.lane.b32.xlu0 %v3678_v17, %s4747_s0  ;;  %v3679_v32 = vmax.f32 %v5574_v29, 0.0  ;;  %v3748_v12 = vmul.f32 %v3678_v17, %v1176_v46 }
0x15a6   :  { %v3749_v13 = vmul.f32 %v3679_v32, %v1177_v49  ;;  %v4103_v24 = vmul.f32 -1.442695, %v3748_v12 }
0x15a8   :  { %3684 = vrot.lane.b32.xlu0 %v3679_v32, %s4747_s0  ;;  %v4104_v22 = vmul.f32 -1.442695, %v3749_v13 }
0x1616   :  { %v3683_v51 = vpop.permute.xlu0 %3682 }
0x1617   :  { %v3688_v35 = vmul.f32 %v3683_v51, %v626_v4 }
0x1619   :  { %v3690_v45 = vmax.f32 %v3688_v35, 0.0  ;;  %v3706_v48 = vsub.f32 0.0, %v3688_v35 }
0x161a   :  { %v3685_v52 = vpop.permute.xlu0 %3684 }
0x161b   :  { %4690 = vrsqrt.f32 %v3690_v45  ;;  %v3708_v53 = vmax.f32 %v3706_v48, 0.0  ;;  %v3689_v40 = vmul.f32 %v3685_v52, %v627_v7  ;;  %vm3694_vm1 = vcmp.eq.f32.partialorder %v3690_v45, inf }
0x161c   :  { %v3697_v55 = vand.u32 2147483648, %v3690_v45  ;;  %vm3696_vm4 = vcmp.eq.f32.partialorder %v3690_v45, 0.0 }
0x161d   :  { %v3691_v44 = vmax.f32 %v3689_v40, 0.0  ;;  %v3707_v39 = vsub.f32 0.0, %v3689_v40  ;;  %4692 = vrsqrt.f32 %v3708_v53  ;;  %vm3712_vm2 = vcmp.eq.f32.partialorder %v3708_v53, inf }
0x161e   :  { %v3715_v38 = vand.u32 2147483648, %v3708_v53  ;;  %vm3714_vm5 = vcmp.eq.f32.partialorder %v3708_v53, 0.0 }
0x161f   :  { %4694 = vrsqrt.f32 %v3691_v44  ;;  %v3709_v37 = vmax.f32 %v3707_v39, 0.0  ;;  %vm3701_vm12 = vcmp.eq.f32.partialorder %v3691_v44, inf  ;;  %v3704_v60 = vand.u32 2147483648, %v3691_v44 }
0x1620   :  { %vm3703_vm14 = vcmp.eq.f32.partialorder %v3691_v44, 0.0 }
0x1621   :  { %4696 = vrsqrt.f32 %v3709_v37  ;;  %vm3719_vm13 = vcmp.eq.f32.partialorder %v3709_v37, inf  ;;  %v3722_v61 = vand.u32 2147483648, %v3709_v37  ;;  %vm3721_vm15 = vcmp.eq.f32.partialorder %v3709_v37, 0.0 }
0x1625   :  { %v4691_v33 = vpop.eup %4690 }
0x1626   :  { %v3693_v34 = vmul.f32 %v4691_v33, %v3690_v45  ;;  %v4688_v33 = vld [vmem:[%s5641_s3 + $0x90] sm:$0xff]  }
0x1627   :  { %v4693_v50 = vpop.eup %4692 }
0x1628   :  { %v3695_v63 = vsel %vm3694_vm1, %v3690_v45, %v3693_v34  ;;  %v3711_v4 = vmul.f32 %v4693_v50, %v3708_v53  ;;  %v4689_v34 = vld [vmem:[%s5641_s3 + $0x98] sm:$0xff]   ;;  %v4105_v50 = vld [vmem:[%s5644_s4 + $0x9] ss:$0 sm:$0xff] }
0x1629   :  { %v4695_v54 = vpop.eup %4694  ;;  %v3698_v57 = vsel %vm3696_vm4, %v3697_v55, %v3695_v63 }
0x162a   :  { %v3713_v56 = vsel %vm3712_vm2, %v3708_v53, %v3711_v4  ;;  %v3700_v5 = vmul.f32 %v4695_v54, %v3691_v44 }
0x162b   :  { %v4697_v7 = vpop.eup %4696  ;;  %v3716_v59 = vsel %vm3714_vm5, %v3715_v38, %v3713_v56 }
0x162c   :  { %v3724_v11 = vsub.f32 %v3698_v57, %v3716_v59  ;;  %v3702_v8 = vsel %vm3701_vm12, %v3691_v44, %v3700_v5  ;;  %v3718_v58 = vmul.f32 %v4697_v7, %v3709_v37 }
0x162d   :  { %v3705_v6 = vsel %vm3703_vm14, %v3704_v60, %v3702_v8 }
0x162e   :  { %v3726_v0 = vmul.f32 %v3724_v11, %v3724_v11  ;;  %v3720_v16 = vsel %vm3719_vm13, %v3709_v37, %v3718_v58 }
0x162f   :  { %v3723_v9 = vsel %vm3721_vm15, %v3722_v61, %v3720_v16 }
0x1630   :  { %3730 = vrot.lane.b32.xlu1 %v3726_v0, %s4744_s9  ;;  %v3725_v26 = vsub.f32 %v3705_v6, %v3723_v9 }
0x1632   :  { %v3727_v10 = vmul.f32 %v3725_v26, %v3725_v26 }
0x1634   :  { %3732 = vrot.lane.b32.xlu1 %v3727_v10, %s4744_s9 }
0x16a2   :  { %v3731_v62 = vpop.permute.xlu1 %3730 }
0x16a3   :  { %v3736_v3 = vsel %vm98_vm0, %v3731_v62, 0.0 }
0x16a4   :  { %3737 = vadd.xlane.f32.xlu0 %v3736_v3 }
0x16a6   :  { %v3733_v30 = vpop.permute.xlu1 %3732 }
0x16a7   :  { %v3739_v14 = vsel %vm629_vm3, %v3733_v30, 0.0 }
0x16a8   :  { %3740 = vadd.xlane.f32.xlu1 %v3739_v14 }
0x16b9   :  { %3766 = vrot.lane.b32.xlu1 %v5152_v42, %s4744_s9  ;;  %v4685_v42 = vld [vmem:[%s5641_s3 + $0x78] sm:$0xff]  }
0x16ba   :  { %3764 = vrot.lane.b32.xlu0 %v5150_v41, %s4744_s9  ;;  %4398 = vmatpush3.bf16.msra.mxu1 %v4685_v42  ;;  %v4686_v41 = vld [vmem:[%s5641_s3 + $0x80] sm:$0xff]  }
0x16bb   :  { %4404 = vmatpush3.bf16.msra.mxu0 %v4686_v41 }
0x16bc   :  { %4405 = vmatprep.subr.bf16.mxu0 %v4742_v15 }
0x16bf   :  { %4406 = vmatpush3.bf16.msra.mxu0 %v4687_v21 }
0x16c0   :  { %4407 = vmatprep.subr.bf16.mxu0 %v4742_v15 }
0x16c3   :  { %4408 = vmatpush3.bf16.msra.mxu0 %v4688_v33 }
0x16c4   :  { %4409 = vmatprep.subr.bf16.mxu0 %v4742_v15  ;;  %v4109_v15 = vld [vmem:[%s5644_s4 + $0xa] ss:$0 sm:$0xff] }
0x16c7   :  { %4410 = vmatpush3.bf16.msra.mxu0 %v4689_v34 }
0x1731   :  { %v3738_v1 = vpop.xlane.xlu0 %3737 }
0x1732   :  { %v3742_v2 = vmax.f32 %v3738_v1, 1e-24 }
0x1734   :  { %4698 = vrsqrt.f32 %v3742_v2 }
0x1735   :  { %v3741_v18 = vpop.xlane.xlu1 %3740  ;;  %v3765_v48 = vpop.permute.xlu0 %3764 }
0x1736   :  { %v3743_v25 = vmax.f32 %v3741_v18, 1e-24 }
0x1738   :  { %4700 = vrsqrt.f32 %v3743_v25 }
0x1739   :  { %4702 = vpow2.f32 %v4103_v24  ;;  %v3767_v36 = vpop.permute.xlu1 %3766 }
0x173a   :  { %4704 = vpow2.f32 %v4104_v22 }
0x173e   :  { %v4699_v23 = vpop.eup %4698 }
0x173f   :  { %v3746_v19 = vmul.f32 %v4699_v23, %v3724_v11 }
0x1741   :  { %3776 = vrot.lane.b32.xlu0 %v3746_v19, %s4744_s9 }
0x1742   :  { %v4701_v28 = vpop.eup %4700 }
0x1743   :  { %v3747_v20 = vmul.f32 %v4701_v28, %v3725_v26  ;;  %v4703_v31 = vpop.eup %4702 }
0x1744   :  { %v4705_v51 = vpop.eup %4704  ;;  %v3756_v35 = vadd.f32 1.0, %v4703_v31 }
0x1745   :  { %3778 = vrot.lane.b32.xlu1 %v3747_v20, %s4744_s9  ;;  %v3757_v45 = vadd.f32 1.0, %v4705_v51 }
0x1746   :  { %4706 = vrcp.f32 %v3756_v35 }
0x1747   :  { %4708 = vrcp.f32 %v3757_v45 }
0x1750   :  { %v4707_v43 = vpop.eup %4706 }
0x1751   :  { %v4709_v52 = vpop.eup %4708  ;;  %v3772_v17 = vsub.f32 1.0, %v4707_v43  ;;  %v3770_v49 = vmul.f32 %v4707_v43, %v3765_v48 }
0x1752   :  { %v3773_v53 = vsub.f32 1.0, %v4709_v52  ;;  %v3771_v32 = vmul.f32 %v4709_v52, %v3767_v36 }
0x17b3   :  { %v3777_v46 = vpop.permute.xlu0 %3776 }
0x17b4   :  { %v3782_v47 = vmul.f32 %v3777_v46, %v3772_v17 }
0x17b6   :  { %v3784_v44 = vadd.f32 %v3782_v47, %v3770_v49 }
0x17b7   :  { %v3779_v29 = vpop.permute.xlu1 %3778 }
0x17b8   :  { %v3783_v40 = vmul.f32 %v3779_v29, %v3773_v53 }
0x17ba   :  { %v3785_v39 = vadd.f32 %v3783_v40, %v3771_v32 }
0x17bc   :  { %v3786_v37 = vpack.c.bf16 %v3785_v39, %v3784_v44 }
0x17be   :  { %4400 = vmatmul.mubr.msk.bf16.vlgmr.msra.gmra.mrb[4].mxu1 %vm98_vm0, %v3786_v37  ;;  %vm3892_vm0 = vcmask 523264  }
0x1891   :  { %v3845_v63 = vpop.f32.mrb[4].mxu1 }
0x1892   :  { %v3846_v4 = vadd.f32 %v4105_v50, %v3845_v63  ;;  %v4401_v54 = vpop.f32.mrb[5].mxu1 }
0x1893   :  { %v3848_v55 = vpop.f32.mrb[6].mxu1 }
0x1894   :  { %v3849_v38 = vadd.f32 %v4105_v50, %v3848_v55  ;;  %v4402_v56 = vpop.f32.mrb[7].mxu1  ;;  %v3852_v5 = vmax.f32 %v3846_v4, 0.0 }
0x1896   :  { %v3853_v7 = vmax.f32 %v3849_v38, 0.0 }
0x1898   :  { %v3854_v57 = vpack.c.bf16 %v3853_v7, %v3852_v5 }
0x189a   :  { %4412 = vmatmul.mubr.msk.bf16.vlgmr.msra.gmra.mrb[0].mxu0 %vm3892_vm0, %v3854_v57 }
0x196d   :  { %v3930_v59 = vpop.f32.mrb[0].mxu0 }
0x196e   :  { %v3931_v11 = vadd.f32 %v4109_v15, %v3930_v59  ;;  %v4413_v8 = vpop.f32.mrb[1].mxu0 }
0x196f   :  { %v3933_v58 = vpop.f32.mrb[2].mxu0 }
0x1970   :  { %3937 = vst [vmem:[%s5642_s5] sm:$0xff] %v3931_v11  ;;  %v3934_v60 = vadd.f32 %v4109_v15, %v3933_v58  ;;  %v4414_v61 = vpop.f32.mrb[3].mxu0 }
0x1972   :  { %3938 = vst [vmem:[%s5642_s5 + $0x8] sm:$0xf] %v3934_v60 }

</bundles_post_ra>
